<compile_context>
chip_gen: v5e
topology: v5e:2x2
jax: 0.10.0
libtpu: 0.0.40
codegen_flags: <defaults>
</compile_context>

<pallas_src>
import functools
import math

import jax
import jax.numpy as jnp
from jax import lax
from jax.experimental import pallas as pl
from jax.experimental.pallas import tpu as pltpu


def _detect_buffered():
    """Check that this jax version supports pipeline_mode=pl.Buffered on BlockSpec."""
    try:
        pl.BlockSpec((8, 128), lambda b: (0, 0), pipeline_mode=pl.Buffered(1))
        return True
    except Exception:
        return False


_HAS_BUFFERED = _detect_buffered()


def _dot(x, w):
    """MXU matmul with f32 accumulation; activation cast to the weight dtype
    (bf16 weights double MXU throughput on v5e/v6e/v7x, state stays f32)."""
    return jnp.dot(x.astype(w.dtype), w, preferred_element_type=jnp.float32)


def mac_kernel(context_ref, question_ref, know_ref,
               pos_w_ref, cq_w_ref, rmem_w_ref, rproj_w_ref,
               wconcat_w_ref, cross_w_ref, memupd_w_ref,
               mem_out_ref, *, approx_recip, unroll_steps):
    n_mem = rmem_w_ref.shape[0]
    d = rmem_w_ref.shape[1]
    max_step = pos_w_ref.shape[0]
    Bb = context_ref.shape[0]          # batch block

    def softmax_last(logits):
        # logits (Bb, 1, X): lane-dense softmax over the last axis (EUP exp, XLU reduce).
        e = jnp.exp(logits - jnp.max(logits, axis=-1, keepdims=True))
        inv = pl.reciprocal(jnp.sum(e, axis=-1, keepdims=True), approx=approx_recip)
        return e * inv

    def step_body(s, carry):
        control, mems = carry                      # (Bb, d), tuple of n_mem (Bb, d)

        # Ref reads inside the body: VMEM-resident, keeps vreg live ranges short.
        context = context_ref[...]                 # (Bb, S, d)  f32
        know = know_ref[...]                       # (Bb, K, d)  f32

        # ---------------- ControlUnit ----------------
        pa = _dot(question_ref[...], pos_w_ref[s])                               # (Bb, d)
        # concat-free split; attn_c already folded into cq_w's output columns (wrapper).
        cq = _dot(control, cq_w_ref[:d, :]) + _dot(pa, cq_w_ref[d:, :])          # (Bb, d)
        c_logits = jnp.einsum('bqd,bsd->bqs', cq[:, None, :], context,
                              preferred_element_type=jnp.float32)                # (Bb,1,S)
        c_attn = softmax_last(c_logits)
        new_control = jnp.einsum('bqs,bsd->bqd', c_attn, context,
                                 preferred_element_type=jnp.float32).reshape(Bb, d)

        # ---------------- ReadUnit (algebraically collapsed) ----------------
        #   r_logits[b,k] = sum_c know[b,k,c] * ( m[b,c]*t1[b,c] + t2[b,c] )
        # with t1/t2 = new_control through the rattn-folded transposed rconcat halves;
        # all n_mem projections fused into ONE (Bb,d) x (d, n_mem*2d) matmul.
        rp_all = _dot(new_control, rproj_w_ref[...])                             # (Bb, n_mem*2d)
        reads = []
        for i in range(n_mem):
            m = _dot(mems[i], rmem_w_ref[i])                                     # (Bb, d)
            t1 = rp_all[:, i * 2 * d: i * 2 * d + d]
            t2 = rp_all[:, i * 2 * d + d: (i + 1) * 2 * d]
            v = m * t1 + t2                                                      # (Bb, d)
            r_logits = jnp.einsum('bqd,bkd->bqk', v[:, None, :], know,
                                  preferred_element_type=jnp.float32)            # (Bb,1,K)
            r_attn = softmax_last(r_logits)
            reads.append(jnp.einsum('bqk,bkd->bqd', r_attn, know,
                                    preferred_element_type=jnp.float32).reshape(Bb, d))

        # ---------------- WriteUnit ----------------
        # concat-free split of the (2d -> d) concat projections
        indep = [
            _dot(reads[i], wconcat_w_ref[i, :d, :]) +
            _dot(mems[i], wconcat_w_ref[i, d:, :])
            for i in range(n_mem)
        ]
        # All n_mem*n_mem cross-attention logits in ONE (Bb,d) x (d, n_mem^2*d) matmul
        # (new_control is the same LHS for every i).
        logits_all = _dot(new_control, cross_w_ref[...])                          # (Bb, n_mem^2*d)
        new_mems = []
        for i in range(n_mem):
            groups = [logits_all[:, (i * n_mem + j) * d:(i * n_mem + j + 1) * d]
                      for j in range(n_mem)]
            gmax = groups[0]
            for j in range(1, n_mem):
                gmax = jnp.maximum(gmax, groups[j])
            exps = [jnp.exp(g - gmax) for g in groups]
            den = exps[0]
            for j in range(1, n_mem):
                den = den + exps[j]
            inv = pl.reciprocal(den, approx=approx_recip)
            combined = exps[0] * inv * indep[0]
            for j in range(1, n_mem):
                combined = combined + exps[j] * inv * indep[j]
            new_mems.append(_dot(combined, memupd_w_ref[i]))                      # (Bb, d)

        return new_control, tuple(new_mems)

    # control_0 / mem_0 are zero parameters in the reference module.
    init = (jnp.zeros((Bb, d), jnp.float32),
            tuple(jnp.zeros((Bb, d), jnp.float32) for _ in range(n_mem)))
    _, final_mems = lax.fori_loop(0, max_step, step_body, init, unroll=unroll_steps)

    # Single write of the final state (no per-step output stores).
    for i in range(n_mem):
        mem_out_ref[i] = final_mems[i].astype(mem_out_ref.dtype)


def mac_unit_forward(context, question, knowledge, params, *, max_step,
                     use_bf16_matmul=False, approx_recip=False,
                     batch_block=None, unroll_steps=1, single_buffer_weights=True):
    """context (B,S,d), question (B,2d), knowledge (B,d,K) -> list of n_mem (B,d)."""
    B, S, d = context.shape
    know_kd = jnp.transpose(knowledge, (0, 2, 1))     # (B, K, d) lane-dense layout
    K = know_kd.shape[1]
    n_mem = params['rmem_w'].shape[0]

    if batch_block is None:
        b_blk = B                                     # single block (v5e/v6e single TC)
    else:
        b_blk = int(batch_block)                      # e.g. B//2 on v7x megacore
        assert B % b_blk == 0, "batch_block must divide B"
    if b_blk != B:
        assert b_blk % 8 == 0, "batch_block must be a multiple of 8 ((8,128) tiling rule)"
    nb = pl.cdiv(B, b_blk)

    # ---------- weight preparation (exact algebraic folds, done once outside the kernel) ----------
    attn_c = params['attn_c_w'][0]                                    # (d,)
    cq_w_f = params['cq_w'] * attn_c[None, :]                         # fold attn_c into columns

    rproj_blocks = []
    for i in range(n_mem):
        ra = params['rattn_w'][i, 0]                                  # (d,)
        w1 = params['rconcat_w'][i, :d, :] * ra[None, :]              # (d_in, d) scaled cols
        w2 = params['rconcat_w'][i, d:, :] * ra[None, :]
        rproj_blocks.append(jnp.concatenate([w1.T, w2.T], axis=1))    # (d, 2d)
    rproj_flat = jnp.concatenate(rproj_blocks, axis=1)                # (d, n_mem*2d)

    # (n_mem, n_mem, d, d) -> (d, n_mem*n_mem*d): one matmul yields every (i,j) logit block.
    cross_flat = jnp.transpose(params['cross_w'], (2, 0, 1, 3)).reshape(d, n_mem * n_mem * d)

    mm_dtype = jnp.bfloat16 if use_bf16_matmul else jnp.float32
    mm = lambda w: w.astype(mm_dtype)
    weights = (mm(params['pos_w']), mm(cq_w_f), mm(params['rmem_w']),
               mm(rproj_flat), mm(params['wconcat_w']), mm(cross_flat),
               mm(params['memupd_w']))

    inputs = (context.astype(jnp.float32), question.astype(jnp.float32),
              know_kd.astype(jnp.float32)) + weights

    # ---------- generation-aware VMEM budget (per-block working set, capped below physical) ----------
    def _nbytes(shape, dtype):
        return int(math.prod(shape)) * jnp.dtype(dtype).itemsize

    act_bytes = 2 * (_nbytes((b_blk, S, d), jnp.float32)
                     + _nbytes((b_blk, 2 * d), jnp.float32)
                     + _nbytes((b_blk, K, d), jnp.float32))
    out_bytes = 2 * _nbytes((n_mem, b_blk, d), jnp.float32)
    weight_bytes = 2 * sum(_nbytes(w.shape, w.dtype) for w in weights)   # conservative 2-buf
    working = act_bytes + out_bytes + weight_bytes
    try:
        phys = int(pltpu.get_tpu_info().vmem_capacity_bytes)             # 128 MiB v5e/v6e, 64 MiB/TC v7x
    except Exception:
        phys = 64 * 1024 * 1024
    cap = int(phys * 0.85)                    # leave headroom for Mosaic internal scratch/spills
    vmem_limit = int(min(cap, max(32 * 1024 * 1024, 2 * working + 8 * 1024 * 1024)))

    kernel = functools.partial(mac_kernel, approx_recip=approx_recip,
                               unroll_steps=unroll_steps)

    act_specs = [
        pl.BlockSpec((b_blk, S, d), lambda b: (b, 0, 0)),              # context
        pl.BlockSpec((b_blk, 2 * d), lambda b: (b, 0)),                # question
        pl.BlockSpec((b_blk, K, d), lambda b: (b, 0, 0)),              # knowledge (B,K,d)
    ]

    def _weight_spec(shape, single_buffer):
        idx = lambda *_: (0,) * len(shape)                             # grid-invariant
        if single_buffer:
            return pl.BlockSpec(shape, idx, pipeline_mode=pl.Buffered(1))
        return pl.BlockSpec(shape, idx)

    def _launch(single_buffer):
        in_specs = act_specs + [_weight_spec(w.shape, single_buffer) for w in weights]
        return pl.pallas_call(
            kernel,
            out_shape=jax.ShapeDtypeStruct((n_mem, B, d), jnp.float32),
            grid=(nb,),
            in_specs=in_specs,
            out_specs=pl.BlockSpec((n_mem, b_blk, d), lambda b: (0, b, 0)),
            compiler_params=pltpu.CompilerParams(
                dimension_semantics=("parallel",),       # batch blocks -> v7x megacore
                vmem_limit_bytes=vmem_limit),
        )(*inputs)

    if single_buffer_weights and _HAS_BUFFERED:
        try:
            mem_final = _launch(True)
        except Exception:
            mem_final = _launch(False)                   # fallback: default double-buffering
    else:
        mem_final = _launch(False)

    return [mem_final[i] for i in range(n_mem)]


# ---------------- deterministic parameter init (xavier_uniform, biases=0) ----------------
def _xavier(key, fan_in, fan_out, shape):
    bound = (6.0 / (fan_in + fan_out)) ** 0.5
    return jax.random.uniform(key, shape, jnp.float32, -bound, bound)


def init_params(key, dim, max_step, n_mem):
    d = dim
    ks = jax.random.split(key, 9)
    return dict(
        pos_w=_xavier(ks[0], 2 * d, d, (max_step, 2 * d, d)),
        cq_w=_xavier(ks[1], 2 * d, d, (2 * d, d)),
        attn_c_w=_xavier(ks[2], d, 1, (1, d)),
        rmem_w=_xavier(ks[3], d, d, (n_mem, d, d)),
        rconcat_w=_xavier(ks[4], 2 * d, d, (n_mem, 2 * d, d)),
        rattn_w=_xavier(ks[5], d, 1, (n_mem, 1, d)),
        wconcat_w=_xavier(ks[6], 2 * d, d, (n_mem, 2 * d, d)),
        cross_w=_xavier(ks[7], d, n_mem * d, (n_mem, n_mem, d, d)),
        memupd_w=_xavier(ks[8], d, d, (n_mem, d, d)),
    )


# ---------------- pure-JAX reference (eval-mode PyTorch semantics) ----------------
def mac_ref(context, question, knowledge, params, max_step, n_mem):
    B, S, d = context.shape
    control = jnp.zeros((B, d), jnp.float32)
    memory = [jnp.zeros((B, d), jnp.float32) for _ in range(n_mem)]
    know = knowledge  # (B, d, K)
    for s in range(max_step):
        pa = question @ params['pos_w'][s]
        cq = jnp.concatenate([control, pa], 1) @ params['cq_w']
        cp = cq[:, None, :] * context
        logit = jnp.sum(cp * params['attn_c_w'][0][None, None, :], -1, keepdims=True)
        attn = jax.nn.softmax(logit, axis=1)
        control = jnp.sum(attn * context, axis=1)
        reads = []
        for i in range(n_mem):
            m = memory[i] @ params['rmem_w'][i]
            mk = m[:, :, None] * know                              # (B, d, K)
            cat = jnp.concatenate([mk, know], axis=1)              # (B, 2d, K)
            proj = jnp.einsum('bck,cd->bkd', cat, params['rconcat_w'][i])
            a = proj * control[:, None, :]
            l = jnp.sum(a * params['rattn_w'][i, 0][None, None, :], -1)
            ra = jax.nn.softmax(l, axis=1)
            reads.append(jnp.sum(ra[:, None, :] * know, axis=2))
        indep = [jnp.concatenate([reads[i], memory[i]], 1) @ params['wconcat_w'][i]
                 for i in range(n_mem)]
        indep_stack = jnp.stack(indep, 0)
        new_mem = []
        for i in range(n_mem):
            logits = jnp.stack([control @ params['cross_w'][i, j] for j in range(n_mem)], 0)
            cross = jax.nn.softmax(logits, axis=0)
            combined = jnp.sum(indep_stack * cross, 0)
            new_mem.append(combined @ params['memupd_w'][i])
        memory = new_mem
    return memory


if __name__ == "__main__":
    B, dim, S, K = 2, 32, 8, 16
    max_step, n_mem = 4, 3

    key = jax.random.PRNGKey(0)
    kp, kc, kq, kk = jax.random.split(key, 4)
    params = init_params(kp, dim, max_step, n_mem)

    context = jax.random.normal(kc, (B, S, dim), jnp.float32)
    question = jax.random.normal(kq, (B, 2 * dim), jnp.float32)
    knowledge = jax.random.normal(kk, (B, dim, K), jnp.float32)

    ref = mac_ref(context, question, knowledge, params, max_step, n_mem)

    # exact path (f32 MXU inputs, exact reciprocal)
    out = mac_unit_forward(context, question, knowledge, params, max_step=max_step)
    out = jax.block_until_ready(out)
    for o, r in zip(out, ref):
        assert o.shape == (B, dim)
        assert jnp.allclose(o, r, atol=1e-3, rtol=1e-3), float(jnp.max(jnp.abs(o - r)))

    # fast path (bf16 MXU weights + approx reciprocal) — loose check
    out_fast = mac_unit_forward(context, question, knowledge, params, max_step=max_step,
                                use_bf16_matmul=True, approx_recip=True)
    out_fast = jax.block_until_ready(out_fast)
    for o, r in zip(out_fast, ref):
        assert jnp.allclose(o, r, atol=1e-1, rtol=1e-1), float(jnp.max(jnp.abs(o - r)))

    print("KERNEL_OK")
</pallas_src>

<mosaic_0001>
module attributes {stable_mosaic.version = 11 : i64} {
  func.func @mac_kernel(%arg0: i32, %arg1: memref<2x8x32xf32, #tpu.memory_space<vmem>>, %arg2: memref<2x64xf32, #tpu.memory_space<vmem>>, %arg3: memref<2x16x32xf32, #tpu.memory_space<vmem>>, %arg4: memref<4x64x32xf32, #tpu.memory_space<vmem>>, %arg5: memref<64x32xf32, #tpu.memory_space<vmem>>, %arg6: memref<3x32x32xf32, #tpu.memory_space<vmem>>, %arg7: memref<32x192xf32, #tpu.memory_space<vmem>>, %arg8: memref<3x64x32xf32, #tpu.memory_space<vmem>>, %arg9: memref<32x288xf32, #tpu.memory_space<vmem>>, %arg10: memref<3x32x32xf32, #tpu.memory_space<vmem>>, %arg11: memref<3x2x32xf32, #tpu.memory_space<vmem>>) attributes {dimension_semantics = [#tpu.dimension_semantics<parallel>], iteration_bounds = array<i64: 1>, scalar_prefetch = 0 : i64, scratch_operands = 0 : i64, tpu.core_type = #tpu.core_type<tc>, window_params = [{transform_indices = @transform_0, window_bounds = array<i64: 2, 8, 32>}, {transform_indices = @transform_1, window_bounds = array<i64: 2, 64>}, {transform_indices = @transform_2, window_bounds = array<i64: 2, 16, 32>}, {pipeline_mode = #tpu.pipeline_mode<synchronous>, transform_indices = @transform_3, window_bounds = array<i64: 4, 64, 32>}, {pipeline_mode = #tpu.pipeline_mode<synchronous>, transform_indices = @transform_4, window_bounds = array<i64: 64, 32>}, {pipeline_mode = #tpu.pipeline_mode<synchronous>, transform_indices = @transform_5, window_bounds = array<i64: 3, 32, 32>}, {pipeline_mode = #tpu.pipeline_mode<synchronous>, transform_indices = @transform_6, window_bounds = array<i64: 32, 192>}, {pipeline_mode = #tpu.pipeline_mode<synchronous>, transform_indices = @transform_7, window_bounds = array<i64: 3, 64, 32>}, {pipeline_mode = #tpu.pipeline_mode<synchronous>, transform_indices = @transform_8, window_bounds = array<i64: 32, 288>}, {pipeline_mode = #tpu.pipeline_mode<synchronous>, transform_indices = @transform_9, window_bounds = array<i64: 3, 32, 32>}, {transform_indices = @transform_10, window_bounds = array<i64: 3, 2, 32>}]} {
    %cst = arith.constant 0.000000e+00 : f32
    %0 = vector.broadcast %cst : f32 to vector<2x32xf32>
    %cst_0 = arith.constant 0.000000e+00 : f32
    %1 = vector.broadcast %cst_0 : f32 to vector<2x32xf32>
    %cst_1 = arith.constant 0.000000e+00 : f32
    %2 = vector.broadcast %cst_1 : f32 to vector<2x32xf32>
    %cst_2 = arith.constant 0.000000e+00 : f32
    %3 = vector.broadcast %cst_2 : f32 to vector<2x32xf32>
    %c0_i32 = arith.constant 0 : i32
    %c4_i32 = arith.constant 4 : i32
    %4 = arith.addi %c0_i32, %c4_i32 : i32
    %c1_i32 = arith.constant 1 : i32
    %5:4 = scf.for %arg12 = %c0_i32 to %4 step %c1_i32 iter_args(%arg13 = %0, %arg14 = %1, %arg15 = %2, %arg16 = %3) -> (vector<2x32xf32>, vector<2x32xf32>, vector<2x32xf32>, vector<2x32xf32>)  : i32 {
      %c0_10 = arith.constant 0 : index
      %c0_11 = arith.constant 0 : index
      %c0_12 = arith.constant 0 : index
      %15 = vector.load %arg1[%c0_10, %c0_11, %c0_12] : memref<2x8x32xf32, #tpu.memory_space<vmem>>, vector<2x8x32xf32>
      %c0_13 = arith.constant 0 : index
      %c0_14 = arith.constant 0 : index
      %c0_15 = arith.constant 0 : index
      %16 = vector.load %arg3[%c0_13, %c0_14, %c0_15] : memref<2x16x32xf32, #tpu.memory_space<vmem>>, vector<2x16x32xf32>
      %c0_16 = arith.constant 0 : index
      %c0_17 = arith.constant 0 : index
      %17 = vector.load %arg2[%c0_16, %c0_17] : memref<2x64xf32, #tpu.memory_space<vmem>>, vector<2x64xf32>
      %18 = arith.index_cast %arg12 : i32 to index
      %c0_18 = arith.constant 0 : index
      %c0_19 = arith.constant 0 : index
      %19 = vector.load %arg4[%18, %c0_18, %c0_19] : memref<4x64x32xf32, #tpu.memory_space<vmem>>, vector<1x64x32xf32>
      %20 = vector.shape_cast %19 : vector<1x64x32xf32> to vector<64x32xf32>
      %cst_20 = arith.constant dense<0.000000e+00> : vector<2x32xf32>
      %21 = tpu.matmul %17, %20, %cst_20 {dimension_numbers = #tpu.dot_dimension_numbers<[1], [0], [0], [1], [0, 0, 1, 1], [], []>} : vector<2x64xf32>, vector<64x32xf32>, vector<2x32xf32> -> vector<2x32xf32>
      %c0_21 = arith.constant 0 : index
      %c0_22 = arith.constant 0 : index
      %22 = vector.load %arg5[%c0_21, %c0_22] : memref<64x32xf32, #tpu.memory_space<vmem>>, vector<32x32xf32>
      %cst_23 = arith.constant dense<0.000000e+00> : vector<2x32xf32>
      %23 = tpu.matmul %arg13, %22, %cst_23 {dimension_numbers = #tpu.dot_dimension_numbers<[1], [0], [0], [1], [0, 0, 1, 1], [], []>} : vector<2x32xf32>, vector<32x32xf32>, vector<2x32xf32> -> vector<2x32xf32>
      %c32 = arith.constant 32 : index
      %c0_24 = arith.constant 0 : index
      %24 = vector.load %arg5[%c32, %c0_24] : memref<64x32xf32, #tpu.memory_space<vmem>>, vector<32x32xf32>
      %cst_25 = arith.constant dense<0.000000e+00> : vector<2x32xf32>
      %25 = tpu.matmul %21, %24, %cst_25 {dimension_numbers = #tpu.dot_dimension_numbers<[1], [0], [0], [1], [0, 0, 1, 1], [], []>} : vector<2x32xf32>, vector<32x32xf32>, vector<2x32xf32> -> vector<2x32xf32>
      %26 = arith.addf %23, %25 : vector<2x32xf32>
      %27 = vector.shape_cast %26 : vector<2x32xf32> to vector<2x1x32xf32>
      "tpu.trace_start"() <{level = 10 : i32, message = "bqd,bsd->bqs"}> : () -> ()
      %cst_26 = arith.constant dense<0.000000e+00> : vector<2x1x8xf32>
      %28 = tpu.matmul %27, %15, %cst_26 {dimension_numbers = #tpu.dot_dimension_numbers<[2], [2], [1], [1], [0, 0, 0, 1, 1, 1], [0], [0]>} : vector<2x1x32xf32>, vector<2x8x32xf32>, vector<2x1x8xf32> -> vector<2x1x8xf32>
      "tpu.trace_stop"() : () -> ()
      %cst_27 = arith.constant dense<0xFF800000> : vector<2x1xf32>
      %29 = vector.multi_reduction <maximumf>, %28, %cst_27 [2] : vector<2x1x8xf32> to vector<2x1xf32>
      %30 = vector.shape_cast %29 : vector<2x1xf32> to vector<2x1x1xf32>
      %31 = vector.broadcast %30 : vector<2x1x1xf32> to vector<2x1x8xf32>
      %32 = arith.subf %28, %31 : vector<2x1x8xf32>
      %33 = math.exp %32 : vector<2x1x8xf32>
      %cst_28 = arith.constant dense<0.000000e+00> : vector<2x1xf32>
      %34 = vector.multi_reduction <add>, %33, %cst_28 [2] : vector<2x1x8xf32> to vector<2x1xf32>
      %35 = vector.shape_cast %34 : vector<2x1xf32> to vector<2x1x1xf32>
      %36 = tpu.reciprocal %35 : vector<2x1x1xf32> -> vector<2x1x1xf32>
      %37 = vector.broadcast %36 : vector<2x1x1xf32> to vector<2x1x8xf32>
      %38 = arith.mulf %33, %37 : vector<2x1x8xf32>
      "tpu.trace_start"() <{level = 10 : i32, message = "bqs,bsd->bqd"}> : () -> ()
      %cst_29 = arith.constant dense<0.000000e+00> : vector<2x1x32xf32>
      %39 = tpu.matmul %38, %15, %cst_29 {dimension_numbers = #tpu.dot_dimension_numbers<[2], [1], [1], [2], [0, 0, 0, 1, 1, 2], [0], [0]>} : vector<2x1x8xf32>, vector<2x8x32xf32>, vector<2x1x32xf32> -> vector<2x1x32xf32>
      "tpu.trace_stop"() : () -> ()
      %40 = vector.shape_cast %39 : vector<2x1x32xf32> to vector<2x32xf32>
      %c0_30 = arith.constant 0 : index
      %c0_31 = arith.constant 0 : index
      %41 = vector.load %arg7[%c0_30, %c0_31] : memref<32x192xf32, #tpu.memory_space<vmem>>, vector<32x192xf32>
      %cst_32 = arith.constant dense<0.000000e+00> : vector<2x192xf32>
      %42 = tpu.matmul %40, %41, %cst_32 {dimension_numbers = #tpu.dot_dimension_numbers<[1], [0], [0], [1], [0, 0, 1, 1], [], []>} : vector<2x32xf32>, vector<32x192xf32>, vector<2x192xf32> -> vector<2x192xf32>
      %c0_33 = arith.constant 0 : index
      %c0_34 = arith.constant 0 : index
      %c0_35 = arith.constant 0 : index
      %43 = vector.load %arg6[%c0_33, %c0_34, %c0_35] : memref<3x32x32xf32, #tpu.memory_space<vmem>>, vector<1x32x32xf32>
      %44 = vector.shape_cast %43 : vector<1x32x32xf32> to vector<32x32xf32>
      %cst_36 = arith.constant dense<0.000000e+00> : vector<2x32xf32>
      %45 = tpu.matmul %arg14, %44, %cst_36 {dimension_numbers = #tpu.dot_dimension_numbers<[1], [0], [0], [1], [0, 0, 1, 1], [], []>} : vector<2x32xf32>, vector<32x32xf32>, vector<2x32xf32> -> vector<2x32xf32>
      %46 = vector.extract_strided_slice %42 {offsets = [0, 0], sizes = [2, 32], strides = [1, 1]} : vector<2x192xf32> to vector<2x32xf32>
      %47 = vector.extract_strided_slice %42 {offsets = [0, 32], sizes = [2, 32], strides = [1, 1]} : vector<2x192xf32> to vector<2x32xf32>
      %48 = arith.mulf %45, %46 : vector<2x32xf32>
      %49 = arith.addf %48, %47 : vector<2x32xf32>
      %50 = vector.shape_cast %49 : vector<2x32xf32> to vector<2x1x32xf32>
      "tpu.trace_start"() <{level = 10 : i32, message = "bqd,bkd->bqk"}> : () -> ()
      %cst_37 = arith.constant dense<0.000000e+00> : vector<2x1x16xf32>
      %51 = tpu.matmul %50, %16, %cst_37 {dimension_numbers = #tpu.dot_dimension_numbers<[2], [2], [1], [1], [0, 0, 0, 1, 1, 1], [0], [0]>} : vector<2x1x32xf32>, vector<2x16x32xf32>, vector<2x1x16xf32> -> vector<2x1x16xf32>
      "tpu.trace_stop"() : () -> ()
      %cst_38 = arith.constant dense<0xFF800000> : vector<2x1xf32>
      %52 = vector.multi_reduction <maximumf>, %51, %cst_38 [2] : vector<2x1x16xf32> to vector<2x1xf32>
      %53 = vector.shape_cast %52 : vector<2x1xf32> to vector<2x1x1xf32>
      %54 = vector.broadcast %53 : vector<2x1x1xf32> to vector<2x1x16xf32>
      %55 = arith.subf %51, %54 : vector<2x1x16xf32>
      %56 = math.exp %55 : vector<2x1x16xf32>
      %cst_39 = arith.constant dense<0.000000e+00> : vector<2x1xf32>
      %57 = vector.multi_reduction <add>, %56, %cst_39 [2] : vector<2x1x16xf32> to vector<2x1xf32>
      %58 = vector.shape_cast %57 : vector<2x1xf32> to vector<2x1x1xf32>
      %59 = tpu.reciprocal %58 : vector<2x1x1xf32> -> vector<2x1x1xf32>
      %60 = vector.broadcast %59 : vector<2x1x1xf32> to vector<2x1x16xf32>
      %61 = arith.mulf %56, %60 : vector<2x1x16xf32>
      "tpu.trace_start"() <{level = 10 : i32, message = "bqk,bkd->bqd"}> : () -> ()
      %cst_40 = arith.constant dense<0.000000e+00> : vector<2x1x32xf32>
      %62 = tpu.matmul %61, %16, %cst_40 {dimension_numbers = #tpu.dot_dimension_numbers<[2], [1], [1], [2], [0, 0, 0, 1, 1, 2], [0], [0]>} : vector<2x1x16xf32>, vector<2x16x32xf32>, vector<2x1x32xf32> -> vector<2x1x32xf32>
      "tpu.trace_stop"() : () -> ()
      %63 = vector.shape_cast %62 : vector<2x1x32xf32> to vector<2x32xf32>
      %c1_41 = arith.constant 1 : index
      %c0_42 = arith.constant 0 : index
      %c0_43 = arith.constant 0 : index
      %64 = vector.load %arg6[%c1_41, %c0_42, %c0_43] : memref<3x32x32xf32, #tpu.memory_space<vmem>>, vector<1x32x32xf32>
      %65 = vector.shape_cast %64 : vector<1x32x32xf32> to vector<32x32xf32>
      %cst_44 = arith.constant dense<0.000000e+00> : vector<2x32xf32>
      %66 = tpu.matmul %arg15, %65, %cst_44 {dimension_numbers = #tpu.dot_dimension_numbers<[1], [0], [0], [1], [0, 0, 1, 1], [], []>} : vector<2x32xf32>, vector<32x32xf32>, vector<2x32xf32> -> vector<2x32xf32>
      %67 = vector.extract_strided_slice %42 {offsets = [0, 64], sizes = [2, 32], strides = [1, 1]} : vector<2x192xf32> to vector<2x32xf32>
      %68 = vector.extract_strided_slice %42 {offsets = [0, 96], sizes = [2, 32], strides = [1, 1]} : vector<2x192xf32> to vector<2x32xf32>
      %69 = arith.mulf %66, %67 : vector<2x32xf32>
      %70 = arith.addf %69, %68 : vector<2x32xf32>
      %71 = vector.shape_cast %70 : vector<2x32xf32> to vector<2x1x32xf32>
      "tpu.trace_start"() <{level = 10 : i32, message = "bqd,bkd->bqk"}> : () -> ()
      %cst_45 = arith.constant dense<0.000000e+00> : vector<2x1x16xf32>
      %72 = tpu.matmul %71, %16, %cst_45 {dimension_numbers = #tpu.dot_dimension_numbers<[2], [2], [1], [1], [0, 0, 0, 1, 1, 1], [0], [0]>} : vector<2x1x32xf32>, vector<2x16x32xf32>, vector<2x1x16xf32> -> vector<2x1x16xf32>
      "tpu.trace_stop"() : () -> ()
      %cst_46 = arith.constant dense<0xFF800000> : vector<2x1xf32>
      %73 = vector.multi_reduction <maximumf>, %72, %cst_46 [2] : vector<2x1x16xf32> to vector<2x1xf32>
      %74 = vector.shape_cast %73 : vector<2x1xf32> to vector<2x1x1xf32>
      %75 = vector.broadcast %74 : vector<2x1x1xf32> to vector<2x1x16xf32>
      %76 = arith.subf %72, %75 : vector<2x1x16xf32>
      %77 = math.exp %76 : vector<2x1x16xf32>
      %cst_47 = arith.constant dense<0.000000e+00> : vector<2x1xf32>
      %78 = vector.multi_reduction <add>, %77, %cst_47 [2] : vector<2x1x16xf32> to vector<2x1xf32>
      %79 = vector.shape_cast %78 : vector<2x1xf32> to vector<2x1x1xf32>
      %80 = tpu.reciprocal %79 : vector<2x1x1xf32> -> vector<2x1x1xf32>
      %81 = vector.broadcast %80 : vector<2x1x1xf32> to vector<2x1x16xf32>
      %82 = arith.mulf %77, %81 : vector<2x1x16xf32>
      "tpu.trace_start"() <{level = 10 : i32, message = "bqk,bkd->bqd"}> : () -> ()
      %cst_48 = arith.constant dense<0.000000e+00> : vector<2x1x32xf32>
      %83 = tpu.matmul %82, %16, %cst_48 {dimension_numbers = #tpu.dot_dimension_numbers<[2], [1], [1], [2], [0, 0, 0, 1, 1, 2], [0], [0]>} : vector<2x1x16xf32>, vector<2x16x32xf32>, vector<2x1x32xf32> -> vector<2x1x32xf32>
      "tpu.trace_stop"() : () -> ()
      %84 = vector.shape_cast %83 : vector<2x1x32xf32> to vector<2x32xf32>
      %c2_49 = arith.constant 2 : index
      %c0_50 = arith.constant 0 : index
      %c0_51 = arith.constant 0 : index
      %85 = vector.load %arg6[%c2_49, %c0_50, %c0_51] : memref<3x32x32xf32, #tpu.memory_space<vmem>>, vector<1x32x32xf32>
      %86 = vector.shape_cast %85 : vector<1x32x32xf32> to vector<32x32xf32>
      %cst_52 = arith.constant dense<0.000000e+00> : vector<2x32xf32>
      %87 = tpu.matmul %arg16, %86, %cst_52 {dimension_numbers = #tpu.dot_dimension_numbers<[1], [0], [0], [1], [0, 0, 1, 1], [], []>} : vector<2x32xf32>, vector<32x32xf32>, vector<2x32xf32> -> vector<2x32xf32>
      %88 = vector.extract_strided_slice %42 {offsets = [0, 128], sizes = [2, 32], strides = [1, 1]} : vector<2x192xf32> to vector<2x32xf32>
      %89 = vector.extract_strided_slice %42 {offsets = [0, 160], sizes = [2, 32], strides = [1, 1]} : vector<2x192xf32> to vector<2x32xf32>
      %90 = arith.mulf %87, %88 : vector<2x32xf32>
      %91 = arith.addf %90, %89 : vector<2x32xf32>
      %92 = vector.shape_cast %91 : vector<2x32xf32> to vector<2x1x32xf32>
      "tpu.trace_start"() <{level = 10 : i32, message = "bqd,bkd->bqk"}> : () -> ()
      %cst_53 = arith.constant dense<0.000000e+00> : vector<2x1x16xf32>
      %93 = tpu.matmul %92, %16, %cst_53 {dimension_numbers = #tpu.dot_dimension_numbers<[2], [2], [1], [1], [0, 0, 0, 1, 1, 1], [0], [0]>} : vector<2x1x32xf32>, vector<2x16x32xf32>, vector<2x1x16xf32> -> vector<2x1x16xf32>
      "tpu.trace_stop"() : () -> ()
      %cst_54 = arith.constant dense<0xFF800000> : vector<2x1xf32>
      %94 = vector.multi_reduction <maximumf>, %93, %cst_54 [2] : vector<2x1x16xf32> to vector<2x1xf32>
      %95 = vector.shape_cast %94 : vector<2x1xf32> to vector<2x1x1xf32>
      %96 = vector.broadcast %95 : vector<2x1x1xf32> to vector<2x1x16xf32>
      %97 = arith.subf %93, %96 : vector<2x1x16xf32>
      %98 = math.exp %97 : vector<2x1x16xf32>
      %cst_55 = arith.constant dense<0.000000e+00> : vector<2x1xf32>
      %99 = vector.multi_reduction <add>, %98, %cst_55 [2] : vector<2x1x16xf32> to vector<2x1xf32>
      %100 = vector.shape_cast %99 : vector<2x1xf32> to vector<2x1x1xf32>
      %101 = tpu.reciprocal %100 : vector<2x1x1xf32> -> vector<2x1x1xf32>
      %102 = vector.broadcast %101 : vector<2x1x1xf32> to vector<2x1x16xf32>
      %103 = arith.mulf %98, %102 : vector<2x1x16xf32>
      "tpu.trace_start"() <{level = 10 : i32, message = "bqk,bkd->bqd"}> : () -> ()
      %cst_56 = arith.constant dense<0.000000e+00> : vector<2x1x32xf32>
      %104 = tpu.matmul %103, %16, %cst_56 {dimension_numbers = #tpu.dot_dimension_numbers<[2], [1], [1], [2], [0, 0, 0, 1, 1, 2], [0], [0]>} : vector<2x1x16xf32>, vector<2x16x32xf32>, vector<2x1x32xf32> -> vector<2x1x32xf32>
      "tpu.trace_stop"() : () -> ()
      %105 = vector.shape_cast %104 : vector<2x1x32xf32> to vector<2x32xf32>
      %c0_57 = arith.constant 0 : index
      %c0_58 = arith.constant 0 : index
      %c0_59 = arith.constant 0 : index
      %106 = vector.load %arg8[%c0_57, %c0_58, %c0_59] : memref<3x64x32xf32, #tpu.memory_space<vmem>>, vector<1x32x32xf32>
      %107 = vector.shape_cast %106 : vector<1x32x32xf32> to vector<32x32xf32>
      %cst_60 = arith.constant dense<0.000000e+00> : vector<2x32xf32>
      %108 = tpu.matmul %63, %107, %cst_60 {dimension_numbers = #tpu.dot_dimension_numbers<[1], [0], [0], [1], [0, 0, 1, 1], [], []>} : vector<2x32xf32>, vector<32x32xf32>, vector<2x32xf32> -> vector<2x32xf32>
      %c0_61 = arith.constant 0 : index
      %c32_62 = arith.constant 32 : index
      %c0_63 = arith.constant 0 : index
      %109 = vector.load %arg8[%c0_61, %c32_62, %c0_63] : memref<3x64x32xf32, #tpu.memory_space<vmem>>, vector<1x32x32xf32>
      %110 = vector.shape_cast %109 : vector<1x32x32xf32> to vector<32x32xf32>
      %cst_64 = arith.constant dense<0.000000e+00> : vector<2x32xf32>
      %111 = tpu.matmul %arg14, %110, %cst_64 {dimension_numbers = #tpu.dot_dimension_numbers<[1], [0], [0], [1], [0, 0, 1, 1], [], []>} : vector<2x32xf32>, vector<32x32xf32>, vector<2x32xf32> -> vector<2x32xf32>
      %112 = arith.addf %108, %111 : vector<2x32xf32>
      %c1_65 = arith.constant 1 : index
      %c0_66 = arith.constant 0 : index
      %c0_67 = arith.constant 0 : index
      %113 = vector.load %arg8[%c1_65, %c0_66, %c0_67] : memref<3x64x32xf32, #tpu.memory_space<vmem>>, vector<1x32x32xf32>
      %114 = vector.shape_cast %113 : vector<1x32x32xf32> to vector<32x32xf32>
      %cst_68 = arith.constant dense<0.000000e+00> : vector<2x32xf32>
      %115 = tpu.matmul %84, %114, %cst_68 {dimension_numbers = #tpu.dot_dimension_numbers<[1], [0], [0], [1], [0, 0, 1, 1], [], []>} : vector<2x32xf32>, vector<32x32xf32>, vector<2x32xf32> -> vector<2x32xf32>
      %c1_69 = arith.constant 1 : index
      %c32_70 = arith.constant 32 : index
      %c0_71 = arith.constant 0 : index
      %116 = vector.load %arg8[%c1_69, %c32_70, %c0_71] : memref<3x64x32xf32, #tpu.memory_space<vmem>>, vector<1x32x32xf32>
      %117 = vector.shape_cast %116 : vector<1x32x32xf32> to vector<32x32xf32>
      %cst_72 = arith.constant dense<0.000000e+00> : vector<2x32xf32>
      %118 = tpu.matmul %arg15, %117, %cst_72 {dimension_numbers = #tpu.dot_dimension_numbers<[1], [0], [0], [1], [0, 0, 1, 1], [], []>} : vector<2x32xf32>, vector<32x32xf32>, vector<2x32xf32> -> vector<2x32xf32>
      %119 = arith.addf %115, %118 : vector<2x32xf32>
      %c2_73 = arith.constant 2 : index
      %c0_74 = arith.constant 0 : index
      %c0_75 = arith.constant 0 : index
      %120 = vector.load %arg8[%c2_73, %c0_74, %c0_75] : memref<3x64x32xf32, #tpu.memory_space<vmem>>, vector<1x32x32xf32>
      %121 = vector.shape_cast %120 : vector<1x32x32xf32> to vector<32x32xf32>
      %cst_76 = arith.constant dense<0.000000e+00> : vector<2x32xf32>
      %122 = tpu.matmul %105, %121, %cst_76 {dimension_numbers = #tpu.dot_dimension_numbers<[1], [0], [0], [1], [0, 0, 1, 1], [], []>} : vector<2x32xf32>, vector<32x32xf32>, vector<2x32xf32> -> vector<2x32xf32>
      %c2_77 = arith.constant 2 : index
      %c32_78 = arith.constant 32 : index
      %c0_79 = arith.constant 0 : index
      %123 = vector.load %arg8[%c2_77, %c32_78, %c0_79] : memref<3x64x32xf32, #tpu.memory_space<vmem>>, vector<1x32x32xf32>
      %124 = vector.shape_cast %123 : vector<1x32x32xf32> to vector<32x32xf32>
      %cst_80 = arith.constant dense<0.000000e+00> : vector<2x32xf32>
      %125 = tpu.matmul %arg16, %124, %cst_80 {dimension_numbers = #tpu.dot_dimension_numbers<[1], [0], [0], [1], [0, 0, 1, 1], [], []>} : vector<2x32xf32>, vector<32x32xf32>, vector<2x32xf32> -> vector<2x32xf32>
      %126 = arith.addf %122, %125 : vector<2x32xf32>
      %c0_81 = arith.constant 0 : index
      %c0_82 = arith.constant 0 : index
      %127 = vector.load %arg9[%c0_81, %c0_82] : memref<32x288xf32, #tpu.memory_space<vmem>>, vector<32x288xf32>
      %cst_83 = arith.constant dense<0.000000e+00> : vector<2x288xf32>
      %128 = tpu.matmul %40, %127, %cst_83 {dimension_numbers = #tpu.dot_dimension_numbers<[1], [0], [0], [1], [0, 0, 1, 1], [], []>} : vector<2x32xf32>, vector<32x288xf32>, vector<2x288xf32> -> vector<2x288xf32>
      %129 = vector.extract_strided_slice %128 {offsets = [0, 0], sizes = [2, 32], strides = [1, 1]} : vector<2x288xf32> to vector<2x32xf32>
      %130 = vector.extract_strided_slice %128 {offsets = [0, 32], sizes = [2, 32], strides = [1, 1]} : vector<2x288xf32> to vector<2x32xf32>
      %131 = vector.extract_strided_slice %128 {offsets = [0, 64], sizes = [2, 32], strides = [1, 1]} : vector<2x288xf32> to vector<2x32xf32>
      %132 = arith.maximumf %129, %130 : vector<2x32xf32>
      %133 = arith.maximumf %132, %131 : vector<2x32xf32>
      %134 = arith.subf %129, %133 : vector<2x32xf32>
      %135 = math.exp %134 : vector<2x32xf32>
      %136 = arith.subf %130, %133 : vector<2x32xf32>
      %137 = math.exp %136 : vector<2x32xf32>
      %138 = arith.subf %131, %133 : vector<2x32xf32>
      %139 = math.exp %138 : vector<2x32xf32>
      %140 = arith.addf %135, %137 : vector<2x32xf32>
      %141 = arith.addf %140, %139 : vector<2x32xf32>
      %142 = tpu.reciprocal %141 : vector<2x32xf32> -> vector<2x32xf32>
      %143 = arith.mulf %135, %142 : vector<2x32xf32>
      %144 = arith.mulf %143, %112 : vector<2x32xf32>
      %145 = arith.mulf %137, %142 : vector<2x32xf32>
      %146 = arith.mulf %145, %119 : vector<2x32xf32>
      %147 = arith.addf %144, %146 : vector<2x32xf32>
      %148 = arith.mulf %139, %142 : vector<2x32xf32>
      %149 = arith.mulf %148, %126 : vector<2x32xf32>
      %150 = arith.addf %147, %149 : vector<2x32xf32>
      %c0_84 = arith.constant 0 : index
      %c0_85 = arith.constant 0 : index
      %c0_86 = arith.constant 0 : index
      %151 = vector.load %arg10[%c0_84, %c0_85, %c0_86] : memref<3x32x32xf32, #tpu.memory_space<vmem>>, vector<1x32x32xf32>
      %152 = vector.shape_cast %151 : vector<1x32x32xf32> to vector<32x32xf32>
      %cst_87 = arith.constant dense<0.000000e+00> : vector<2x32xf32>
      %153 = tpu.matmul %150, %152, %cst_87 {dimension_numbers = #tpu.dot_dimension_numbers<[1], [0], [0], [1], [0, 0, 1, 1], [], []>} : vector<2x32xf32>, vector<32x32xf32>, vector<2x32xf32> -> vector<2x32xf32>
      %154 = vector.extract_strided_slice %128 {offsets = [0, 96], sizes = [2, 32], strides = [1, 1]} : vector<2x288xf32> to vector<2x32xf32>
      %155 = vector.extract_strided_slice %128 {offsets = [0, 128], sizes = [2, 32], strides = [1, 1]} : vector<2x288xf32> to vector<2x32xf32>
      %156 = vector.extract_strided_slice %128 {offsets = [0, 160], sizes = [2, 32], strides = [1, 1]} : vector<2x288xf32> to vector<2x32xf32>
      %157 = arith.maximumf %154, %155 : vector<2x32xf32>
      %158 = arith.maximumf %157, %156 : vector<2x32xf32>
      %159 = arith.subf %154, %158 : vector<2x32xf32>
      %160 = math.exp %159 : vector<2x32xf32>
      %161 = arith.subf %155, %158 : vector<2x32xf32>
      %162 = math.exp %161 : vector<2x32xf32>
      %163 = arith.subf %156, %158 : vector<2x32xf32>
      %164 = math.exp %163 : vector<2x32xf32>
      %165 = arith.addf %160, %162 : vector<2x32xf32>
      %166 = arith.addf %165, %164 : vector<2x32xf32>
      %167 = tpu.reciprocal %166 : vector<2x32xf32> -> vector<2x32xf32>
      %168 = arith.mulf %160, %167 : vector<2x32xf32>
      %169 = arith.mulf %168, %112 : vector<2x32xf32>
      %170 = arith.mulf %162, %167 : vector<2x32xf32>
      %171 = arith.mulf %170, %119 : vector<2x32xf32>
      %172 = arith.addf %169, %171 : vector<2x32xf32>
      %173 = arith.mulf %164, %167 : vector<2x32xf32>
      %174 = arith.mulf %173, %126 : vector<2x32xf32>
      %175 = arith.addf %172, %174 : vector<2x32xf32>
      %c1_88 = arith.constant 1 : index
      %c0_89 = arith.constant 0 : index
      %c0_90 = arith.constant 0 : index
      %176 = vector.load %arg10[%c1_88, %c0_89, %c0_90] : memref<3x32x32xf32, #tpu.memory_space<vmem>>, vector<1x32x32xf32>
      %177 = vector.shape_cast %176 : vector<1x32x32xf32> to vector<32x32xf32>
      %cst_91 = arith.constant dense<0.000000e+00> : vector<2x32xf32>
      %178 = tpu.matmul %175, %177, %cst_91 {dimension_numbers = #tpu.dot_dimension_numbers<[1], [0], [0], [1], [0, 0, 1, 1], [], []>} : vector<2x32xf32>, vector<32x32xf32>, vector<2x32xf32> -> vector<2x32xf32>
      %179 = vector.extract_strided_slice %128 {offsets = [0, 192], sizes = [2, 32], strides = [1, 1]} : vector<2x288xf32> to vector<2x32xf32>
      %180 = vector.extract_strided_slice %128 {offsets = [0, 224], sizes = [2, 32], strides = [1, 1]} : vector<2x288xf32> to vector<2x32xf32>
      %181 = vector.extract_strided_slice %128 {offsets = [0, 256], sizes = [2, 32], strides = [1, 1]} : vector<2x288xf32> to vector<2x32xf32>
      %182 = arith.maximumf %179, %180 : vector<2x32xf32>
      %183 = arith.maximumf %182, %181 : vector<2x32xf32>
      %184 = arith.subf %179, %183 : vector<2x32xf32>
      %185 = math.exp %184 : vector<2x32xf32>
      %186 = arith.subf %180, %183 : vector<2x32xf32>
      %187 = math.exp %186 : vector<2x32xf32>
      %188 = arith.subf %181, %183 : vector<2x32xf32>
      %189 = math.exp %188 : vector<2x32xf32>
      %190 = arith.addf %185, %187 : vector<2x32xf32>
      %191 = arith.addf %190, %189 : vector<2x32xf32>
      %192 = tpu.reciprocal %191 : vector<2x32xf32> -> vector<2x32xf32>
      %193 = arith.mulf %185, %192 : vector<2x32xf32>
      %194 = arith.mulf %193, %112 : vector<2x32xf32>
      %195 = arith.mulf %187, %192 : vector<2x32xf32>
      %196 = arith.mulf %195, %119 : vector<2x32xf32>
      %197 = arith.addf %194, %196 : vector<2x32xf32>
      %198 = arith.mulf %189, %192 : vector<2x32xf32>
      %199 = arith.mulf %198, %126 : vector<2x32xf32>
      %200 = arith.addf %197, %199 : vector<2x32xf32>
      %c2_92 = arith.constant 2 : index
      %c0_93 = arith.constant 0 : index
      %c0_94 = arith.constant 0 : index
      %201 = vector.load %arg10[%c2_92, %c0_93, %c0_94] : memref<3x32x32xf32, #tpu.memory_space<vmem>>, vector<1x32x32xf32>
      %202 = vector.shape_cast %201 : vector<1x32x32xf32> to vector<32x32xf32>
      %cst_95 = arith.constant dense<0.000000e+00> : vector<2x32xf32>
      %203 = tpu.matmul %200, %202, %cst_95 {dimension_numbers = #tpu.dot_dimension_numbers<[1], [0], [0], [1], [0, 0, 1, 1], [], []>} : vector<2x32xf32>, vector<32x32xf32>, vector<2x32xf32> -> vector<2x32xf32>
      scf.yield %40, %153, %178, %203 : vector<2x32xf32>, vector<2x32xf32>, vector<2x32xf32>, vector<2x32xf32>
    }
    %c4_i32_3 = arith.constant 4 : i32
    %c0 = arith.constant 0 : index
    %c0_4 = arith.constant 0 : index
    %c0_5 = arith.constant 0 : index
    %6 = vector.load %arg11[%c0, %c0_4, %c0_5] : memref<3x2x32xf32, #tpu.memory_space<vmem>>, vector<1x2x32xf32>
    %7 = vector.shape_cast %6 : vector<1x2x32xf32> to vector<2x32xf32>
    %8 = vector.shape_cast %5#1 : vector<2x32xf32> to vector<1x2x32xf32>
    tpu.vector_store %arg11[%c0, %c0_4, %c0_5], %8 {strides = array<i32>} : memref<3x2x32xf32, #tpu.memory_space<vmem>>, vector<1x2x32xf32>,
    %c1 = arith.constant 1 : index
    %c0_6 = arith.constant 0 : index
    %c0_7 = arith.constant 0 : index
    %9 = vector.load %arg11[%c1, %c0_6, %c0_7] : memref<3x2x32xf32, #tpu.memory_space<vmem>>, vector<1x2x32xf32>
    %10 = vector.shape_cast %9 : vector<1x2x32xf32> to vector<2x32xf32>
    %11 = vector.shape_cast %5#2 : vector<2x32xf32> to vector<1x2x32xf32>
    tpu.vector_store %arg11[%c1, %c0_6, %c0_7], %11 {strides = array<i32>} : memref<3x2x32xf32, #tpu.memory_space<vmem>>, vector<1x2x32xf32>,
    %c2 = arith.constant 2 : index
    %c0_8 = arith.constant 0 : index
    %c0_9 = arith.constant 0 : index
    %12 = vector.load %arg11[%c2, %c0_8, %c0_9] : memref<3x2x32xf32, #tpu.memory_space<vmem>>, vector<1x2x32xf32>
    %13 = vector.shape_cast %12 : vector<1x2x32xf32> to vector<2x32xf32>
    %14 = vector.shape_cast %5#3 : vector<2x32xf32> to vector<1x2x32xf32>
    tpu.vector_store %arg11[%c2, %c0_8, %c0_9], %14 {strides = array<i32>} : memref<3x2x32xf32, #tpu.memory_space<vmem>>, vector<1x2x32xf32>,
    return
  }
  func.func @transform_0(%arg0: i32) -> (i32, i32, i32) {
    %c0_i32 = arith.constant 0 : i32
    %c0_i32_0 = arith.constant 0 : i32
    %c0_i32_1 = arith.constant 0 : i32
    return %arg0, %c0_i32, %c0_i32_0 : i32, i32, i32
  }
  func.func @transform_1(%arg0: i32) -> (i32, i32) {
    %c0_i32 = arith.constant 0 : i32
    %c0_i32_0 = arith.constant 0 : i32
    return %arg0, %c0_i32 : i32, i32
  }
  func.func @transform_2(%arg0: i32) -> (i32, i32, i32) {
    %c0_i32 = arith.constant 0 : i32
    %c0_i32_0 = arith.constant 0 : i32
    %c0_i32_1 = arith.constant 0 : i32
    return %arg0, %c0_i32, %c0_i32_0 : i32, i32, i32
  }
  func.func @transform_3(%arg0: i32) -> (i32, i32, i32) {
    %c0_i32 = arith.constant 0 : i32
    %c0_i32_0 = arith.constant 0 : i32
    %c0_i32_1 = arith.constant 0 : i32
    %c0_i32_2 = arith.constant 0 : i32
    return %c0_i32, %c0_i32_0, %c0_i32_1 : i32, i32, i32
  }
  func.func @transform_4(%arg0: i32) -> (i32, i32) {
    %c0_i32 = arith.constant 0 : i32
    %c0_i32_0 = arith.constant 0 : i32
    %c0_i32_1 = arith.constant 0 : i32
    return %c0_i32, %c0_i32_0 : i32, i32
  }
  func.func @transform_5(%arg0: i32) -> (i32, i32, i32) {
    %c0_i32 = arith.constant 0 : i32
    %c0_i32_0 = arith.constant 0 : i32
    %c0_i32_1 = arith.constant 0 : i32
    %c0_i32_2 = arith.constant 0 : i32
    return %c0_i32, %c0_i32_0, %c0_i32_1 : i32, i32, i32
  }
  func.func @transform_6(%arg0: i32) -> (i32, i32) {
    %c0_i32 = arith.constant 0 : i32
    %c0_i32_0 = arith.constant 0 : i32
    %c0_i32_1 = arith.constant 0 : i32
    return %c0_i32, %c0_i32_0 : i32, i32
  }
  func.func @transform_7(%arg0: i32) -> (i32, i32, i32) {
    %c0_i32 = arith.constant 0 : i32
    %c0_i32_0 = arith.constant 0 : i32
    %c0_i32_1 = arith.constant 0 : i32
    %c0_i32_2 = arith.constant 0 : i32
    return %c0_i32, %c0_i32_0, %c0_i32_1 : i32, i32, i32
  }
  func.func @transform_8(%arg0: i32) -> (i32, i32) {
    %c0_i32 = arith.constant 0 : i32
    %c0_i32_0 = arith.constant 0 : i32
    %c0_i32_1 = arith.constant 0 : i32
    return %c0_i32, %c0_i32_0 : i32, i32
  }
  func.func @transform_9(%arg0: i32) -> (i32, i32, i32) {
    %c0_i32 = arith.constant 0 : i32
    %c0_i32_0 = arith.constant 0 : i32
    %c0_i32_1 = arith.constant 0 : i32
    %c0_i32_2 = arith.constant 0 : i32
    return %c0_i32, %c0_i32_0, %c0_i32_1 : i32, i32, i32
  }
  func.func @transform_10(%arg0: i32) -> (i32, i32, i32) {
    %c0_i32 = arith.constant 0 : i32
    %c0_i32_0 = arith.constant 0 : i32
    %c0_i32_1 = arith.constant 0 : i32
    return %c0_i32, %arg0, %c0_i32_0 : i32, i32, i32
  }
}

module attributes {stable_mosaic.version = 11 : i64} {
  func.func @mac_kernel(%arg0: i32, %arg1: memref<2x8x32xf32, #tpu.memory_space<vmem>>, %arg2: memref<2x64xf32, #tpu.memory_space<vmem>>, %arg3: memref<2x16x32xf32, #tpu.memory_space<vmem>>, %arg4: memref<4x64x32xf32, #tpu.memory_space<vmem>>, %arg5: memref<64x32xf32, #tpu.memory_space<vmem>>, %arg6: memref<3x32x32xf32, #tpu.memory_space<vmem>>, %arg7: memref<32x192xf32, #tpu.memory_space<vmem>>, %arg8: memref<3x64x32xf32, #tpu.memory_space<vmem>>, %arg9: memref<32x288xf32, #tpu.memory_space<vmem>>, %arg10: memref<3x32x32xf32, #tpu.memory_space<vmem>>, %arg11: memref<3x2x32xf32, #tpu.memory_space<vmem>>) attributes {dimension_semantics = [#tpu.dimension_semantics<parallel>], iteration_bounds = array<i64: 1>, scalar_prefetch = 0 : i64, scratch_operands = 0 : i64, tpu.core_type = #tpu.core_type<tc>, window_params = [{transform_indices = @transform_0, window_bounds = array<i64: 2, 8, 32>}, {transform_indices = @transform_1, window_bounds = array<i64: 2, 64>}, {transform_indices = @transform_2, window_bounds = array<i64: 2, 16, 32>}, {pipeline_mode = #tpu.pipeline_mode<synchronous>, transform_indices = @transform_3, window_bounds = array<i64: 4, 64, 32>}, {pipeline_mode = #tpu.pipeline_mode<synchronous>, transform_indices = @transform_4, window_bounds = array<i64: 64, 32>}, {pipeline_mode = #tpu.pipeline_mode<synchronous>, transform_indices = @transform_5, window_bounds = array<i64: 3, 32, 32>}, {pipeline_mode = #tpu.pipeline_mode<synchronous>, transform_indices = @transform_6, window_bounds = array<i64: 32, 192>}, {pipeline_mode = #tpu.pipeline_mode<synchronous>, transform_indices = @transform_7, window_bounds = array<i64: 3, 64, 32>}, {pipeline_mode = #tpu.pipeline_mode<synchronous>, transform_indices = @transform_8, window_bounds = array<i64: 32, 288>}, {pipeline_mode = #tpu.pipeline_mode<synchronous>, transform_indices = @transform_9, window_bounds = array<i64: 3, 32, 32>}, {transform_indices = @transform_10, window_bounds = array<i64: 3, 2, 32>}]} {
    %cst = arith.constant 0.000000e+00 : f32
    %0 = vector.broadcast %cst : f32 to vector<2x32xf32>
    %cst_0 = arith.constant 0.000000e+00 : f32
    %1 = vector.broadcast %cst_0 : f32 to vector<2x32xf32>
    %cst_1 = arith.constant 0.000000e+00 : f32
    %2 = vector.broadcast %cst_1 : f32 to vector<2x32xf32>
    %cst_2 = arith.constant 0.000000e+00 : f32
    %3 = vector.broadcast %cst_2 : f32 to vector<2x32xf32>
    %c0_i32 = arith.constant 0 : i32
    %c4_i32 = arith.constant 4 : i32
    %4 = arith.addi %c0_i32, %c4_i32 : i32
    %c1_i32 = arith.constant 1 : i32
    %5:4 = scf.for %arg12 = %c0_i32 to %4 step %c1_i32 iter_args(%arg13 = %0, %arg14 = %1, %arg15 = %2, %arg16 = %3) -> (vector<2x32xf32>, vector<2x32xf32>, vector<2x32xf32>, vector<2x32xf32>)  : i32 {
      %c0_10 = arith.constant 0 : index
      %c0_11 = arith.constant 0 : index
      %c0_12 = arith.constant 0 : index
      %15 = vector.load %arg1[%c0_10, %c0_11, %c0_12] : memref<2x8x32xf32, #tpu.memory_space<vmem>>, vector<2x8x32xf32>
      %c0_13 = arith.constant 0 : index
      %c0_14 = arith.constant 0 : index
      %c0_15 = arith.constant 0 : index
      %16 = vector.load %arg3[%c0_13, %c0_14, %c0_15] : memref<2x16x32xf32, #tpu.memory_space<vmem>>, vector<2x16x32xf32>
      %c0_16 = arith.constant 0 : index
      %c0_17 = arith.constant 0 : index
      %17 = vector.load %arg2[%c0_16, %c0_17] : memref<2x64xf32, #tpu.memory_space<vmem>>, vector<2x64xf32>
      %18 = arith.index_cast %arg12 : i32 to index
      %c0_18 = arith.constant 0 : index
      %c0_19 = arith.constant 0 : index
      %19 = vector.load %arg4[%18, %c0_18, %c0_19] : memref<4x64x32xf32, #tpu.memory_space<vmem>>, vector<1x64x32xf32>
      %20 = vector.shape_cast %19 : vector<1x64x32xf32> to vector<64x32xf32>
      %cst_20 = arith.constant dense<0.000000e+00> : vector<2x32xf32>
      %21 = tpu.matmul %17, %20, %cst_20 {dimension_numbers = #tpu.dot_dimension_numbers<[1], [0], [0], [1], [0, 0, 1, 1], [], []>} : vector<2x64xf32>, vector<64x32xf32>, vector<2x32xf32> -> vector<2x32xf32>
      %c0_21 = arith.constant 0 : index
      %c0_22 = arith.constant 0 : index
      %22 = vector.load %arg5[%c0_21, %c0_22] : memref<64x32xf32, #tpu.memory_space<vmem>>, vector<32x32xf32>
      %cst_23 = arith.constant dense<0.000000e+00> : vector<2x32xf32>
      %23 = tpu.matmul %arg13, %22, %cst_23 {dimension_numbers = #tpu.dot_dimension_numbers<[1], [0], [0], [1], [0, 0, 1, 1], [], []>} : vector<2x32xf32>, vector<32x32xf32>, vector<2x32xf32> -> vector<2x32xf32>
      %c32 = arith.constant 32 : index
      %c0_24 = arith.constant 0 : index
      %24 = vector.load %arg5[%c32, %c0_24] : memref<64x32xf32, #tpu.memory_space<vmem>>, vector<32x32xf32>
      %cst_25 = arith.constant dense<0.000000e+00> : vector<2x32xf32>
      %25 = tpu.matmul %21, %24, %cst_25 {dimension_numbers = #tpu.dot_dimension_numbers<[1], [0], [0], [1], [0, 0, 1, 1], [], []>} : vector<2x32xf32>, vector<32x32xf32>, vector<2x32xf32> -> vector<2x32xf32>
      %26 = arith.addf %23, %25 : vector<2x32xf32>
      %27 = vector.shape_cast %26 : vector<2x32xf32> to vector<2x1x32xf32>
      "tpu.trace_start"() <{level = 10 : i32, message = "bqd,bsd->bqs"}> : () -> ()
      %cst_26 = arith.constant dense<0.000000e+00> : vector<2x1x8xf32>
      %28 = tpu.matmul %27, %15, %cst_26 {dimension_numbers = #tpu.dot_dimension_numbers<[2], [2], [1], [1], [0, 0, 0, 1, 1, 1], [0], [0]>} : vector<2x1x32xf32>, vector<2x8x32xf32>, vector<2x1x8xf32> -> vector<2x1x8xf32>
      "tpu.trace_stop"() : () -> ()
      %cst_27 = arith.constant dense<0xFF800000> : vector<2x1xf32>
      %29 = vector.multi_reduction <maximumf>, %28, %cst_27 [2] : vector<2x1x8xf32> to vector<2x1xf32>
      %30 = vector.shape_cast %29 : vector<2x1xf32> to vector<2x1x1xf32>
      %31 = vector.broadcast %30 : vector<2x1x1xf32> to vector<2x1x8xf32>
      %32 = arith.subf %28, %31 : vector<2x1x8xf32>
      %33 = math.exp %32 : vector<2x1x8xf32>
      %cst_28 = arith.constant dense<0.000000e+00> : vector<2x1xf32>
      %34 = vector.multi_reduction <add>, %33, %cst_28 [2] : vector<2x1x8xf32> to vector<2x1xf32>
      %35 = vector.shape_cast %34 : vector<2x1xf32> to vector<2x1x1xf32>
      %36 = tpu.reciprocal %35 : vector<2x1x1xf32> -> vector<2x1x1xf32>
      %37 = vector.broadcast %36 : vector<2x1x1xf32> to vector<2x1x8xf32>
      %38 = arith.mulf %33, %37 : vector<2x1x8xf32>
      "tpu.trace_start"() <{level = 10 : i32, message = "bqs,bsd->bqd"}> : () -> ()
      %cst_29 = arith.constant dense<0.000000e+00> : vector<2x1x32xf32>
      %39 = tpu.matmul %38, %15, %cst_29 {dimension_numbers = #tpu.dot_dimension_numbers<[2], [1], [1], [2], [0, 0, 0, 1, 1, 2], [0], [0]>} : vector<2x1x8xf32>, vector<2x8x32xf32>, vector<2x1x32xf32> -> vector<2x1x32xf32>
      "tpu.trace_stop"() : () -> ()
      %40 = vector.shape_cast %39 : vector<2x1x32xf32> to vector<2x32xf32>
      %c0_30 = arith.constant 0 : index
      %c0_31 = arith.constant 0 : index
      %41 = vector.load %arg7[%c0_30, %c0_31] : memref<32x192xf32, #tpu.memory_space<vmem>>, vector<32x192xf32>
      %cst_32 = arith.constant dense<0.000000e+00> : vector<2x192xf32>
      %42 = tpu.matmul %40, %41, %cst_32 {dimension_numbers = #tpu.dot_dimension_numbers<[1], [0], [0], [1], [0, 0, 1, 1], [], []>} : vector<2x32xf32>, vector<32x192xf32>, vector<2x192xf32> -> vector<2x192xf32>
      %c0_33 = arith.constant 0 : index
      %c0_34 = arith.constant 0 : index
      %c0_35 = arith.constant 0 : index
      %43 = vector.load %arg6[%c0_33, %c0_34, %c0_35] : memref<3x32x32xf32, #tpu.memory_space<vmem>>, vector<1x32x32xf32>
      %44 = vector.shape_cast %43 : vector<1x32x32xf32> to vector<32x32xf32>
      %cst_36 = arith.constant dense<0.000000e+00> : vector<2x32xf32>
      %45 = tpu.matmul %arg14, %44, %cst_36 {dimension_numbers = #tpu.dot_dimension_numbers<[1], [0], [0], [1], [0, 0, 1, 1], [], []>} : vector<2x32xf32>, vector<32x32xf32>, vector<2x32xf32> -> vector<2x32xf32>
      %46 = vector.extract_strided_slice %42 {offsets = [0, 0], sizes = [2, 32], strides = [1, 1]} : vector<2x192xf32> to vector<2x32xf32>
      %47 = vector.extract_strided_slice %42 {offsets = [0, 32], sizes = [2, 32], strides = [1, 1]} : vector<2x192xf32> to vector<2x32xf32>
      %48 = arith.mulf %45, %46 : vector<2x32xf32>
      %49 = arith.addf %48, %47 : vector<2x32xf32>
      %50 = vector.shape_cast %49 : vector<2x32xf32> to vector<2x1x32xf32>
      "tpu.trace_start"() <{level = 10 : i32, message = "bqd,bkd->bqk"}> : () -> ()
      %cst_37 = arith.constant dense<0.000000e+00> : vector<2x1x16xf32>
      %51 = tpu.matmul %50, %16, %cst_37 {dimension_numbers = #tpu.dot_dimension_numbers<[2], [2], [1], [1], [0, 0, 0, 1, 1, 1], [0], [0]>} : vector<2x1x32xf32>, vector<2x16x32xf32>, vector<2x1x16xf32> -> vector<2x1x16xf32>
      "tpu.trace_stop"() : () -> ()
      %cst_38 = arith.constant dense<0xFF800000> : vector<2x1xf32>
      %52 = vector.multi_reduction <maximumf>, %51, %cst_38 [2] : vector<2x1x16xf32> to vector<2x1xf32>
      %53 = vector.shape_cast %52 : vector<2x1xf32> to vector<2x1x1xf32>
      %54 = vector.broadcast %53 : vector<2x1x1xf32> to vector<2x1x16xf32>
      %55 = arith.subf %51, %54 : vector<2x1x16xf32>
      %56 = math.exp %55 : vector<2x1x16xf32>
      %cst_39 = arith.constant dense<0.000000e+00> : vector<2x1xf32>
      %57 = vector.multi_reduction <add>, %56, %cst_39 [2] : vector<2x1x16xf32> to vector<2x1xf32>
      %58 = vector.shape_cast %57 : vector<2x1xf32> to vector<2x1x1xf32>
      %59 = tpu.reciprocal %58 : vector<2x1x1xf32> -> vector<2x1x1xf32>
      %60 = vector.broadcast %59 : vector<2x1x1xf32> to vector<2x1x16xf32>
      %61 = arith.mulf %56, %60 : vector<2x1x16xf32>
      "tpu.trace_start"() <{level = 10 : i32, message = "bqk,bkd->bqd"}> : () -> ()
      %cst_40 = arith.constant dense<0.000000e+00> : vector<2x1x32xf32>
      %62 = tpu.matmul %61, %16, %cst_40 {dimension_numbers = #tpu.dot_dimension_numbers<[2], [1], [1], [2], [0, 0, 0, 1, 1, 2], [0], [0]>} : vector<2x1x16xf32>, vector<2x16x32xf32>, vector<2x1x32xf32> -> vector<2x1x32xf32>
      "tpu.trace_stop"() : () -> ()
      %63 = vector.shape_cast %62 : vector<2x1x32xf32> to vector<2x32xf32>
      %c1_41 = arith.constant 1 : index
      %c0_42 = arith.constant 0 : index
      %c0_43 = arith.constant 0 : index
      %64 = vector.load %arg6[%c1_41, %c0_42, %c0_43] : memref<3x32x32xf32, #tpu.memory_space<vmem>>, vector<1x32x32xf32>
      %65 = vector.shape_cast %64 : vector<1x32x32xf32> to vector<32x32xf32>
      %cst_44 = arith.constant dense<0.000000e+00> : vector<2x32xf32>
      %66 = tpu.matmul %arg15, %65, %cst_44 {dimension_numbers = #tpu.dot_dimension_numbers<[1], [0], [0], [1], [0, 0, 1, 1], [], []>} : vector<2x32xf32>, vector<32x32xf32>, vector<2x32xf32> -> vector<2x32xf32>
      %67 = vector.extract_strided_slice %42 {offsets = [0, 64], sizes = [2, 32], strides = [1, 1]} : vector<2x192xf32> to vector<2x32xf32>
      %68 = vector.extract_strided_slice %42 {offsets = [0, 96], sizes = [2, 32], strides = [1, 1]} : vector<2x192xf32> to vector<2x32xf32>
      %69 = arith.mulf %66, %67 : vector<2x32xf32>
      %70 = arith.addf %69, %68 : vector<2x32xf32>
      %71 = vector.shape_cast %70 : vector<2x32xf32> to vector<2x1x32xf32>
      "tpu.trace_start"() <{level = 10 : i32, message = "bqd,bkd->bqk"}> : () -> ()
      %cst_45 = arith.constant dense<0.000000e+00> : vector<2x1x16xf32>
      %72 = tpu.matmul %71, %16, %cst_45 {dimension_numbers = #tpu.dot_dimension_numbers<[2], [2], [1], [1], [0, 0, 0, 1, 1, 1], [0], [0]>} : vector<2x1x32xf32>, vector<2x16x32xf32>, vector<2x1x16xf32> -> vector<2x1x16xf32>
      "tpu.trace_stop"() : () -> ()
      %cst_46 = arith.constant dense<0xFF800000> : vector<2x1xf32>
      %73 = vector.multi_reduction <maximumf>, %72, %cst_46 [2] : vector<2x1x16xf32> to vector<2x1xf32>
      %74 = vector.shape_cast %73 : vector<2x1xf32> to vector<2x1x1xf32>
      %75 = vector.broadcast %74 : vector<2x1x1xf32> to vector<2x1x16xf32>
      %76 = arith.subf %72, %75 : vector<2x1x16xf32>
      %77 = math.exp %76 : vector<2x1x16xf32>
      %cst_47 = arith.constant dense<0.000000e+00> : vector<2x1xf32>
      %78 = vector.multi_reduction <add>, %77, %cst_47 [2] : vector<2x1x16xf32> to vector<2x1xf32>
      %79 = vector.shape_cast %78 : vector<2x1xf32> to vector<2x1x1xf32>
      %80 = tpu.reciprocal %79 : vector<2x1x1xf32> -> vector<2x1x1xf32>
      %81 = vector.broadcast %80 : vector<2x1x1xf32> to vector<2x1x16xf32>
      %82 = arith.mulf %77, %81 : vector<2x1x16xf32>
      "tpu.trace_start"() <{level = 10 : i32, message = "bqk,bkd->bqd"}> : () -> ()
      %cst_48 = arith.constant dense<0.000000e+00> : vector<2x1x32xf32>
      %83 = tpu.matmul %82, %16, %cst_48 {dimension_numbers = #tpu.dot_dimension_numbers<[2], [1], [1], [2], [0, 0, 0, 1, 1, 2], [0], [0]>} : vector<2x1x16xf32>, vector<2x16x32xf32>, vector<2x1x32xf32> -> vector<2x1x32xf32>
      "tpu.trace_stop"() : () -> ()
      %84 = vector.shape_cast %83 : vector<2x1x32xf32> to vector<2x32xf32>
      %c2_49 = arith.constant 2 : index
      %c0_50 = arith.constant 0 : index
      %c0_51 = arith.constant 0 : index
      %85 = vector.load %arg6[%c2_49, %c0_50, %c0_51] : memref<3x32x32xf32, #tpu.memory_space<vmem>>, vector<1x32x32xf32>
      %86 = vector.shape_cast %85 : vector<1x32x32xf32> to vector<32x32xf32>
      %cst_52 = arith.constant dense<0.000000e+00> : vector<2x32xf32>
      %87 = tpu.matmul %arg16, %86, %cst_52 {dimension_numbers = #tpu.dot_dimension_numbers<[1], [0], [0], [1], [0, 0, 1, 1], [], []>} : vector<2x32xf32>, vector<32x32xf32>, vector<2x32xf32> -> vector<2x32xf32>
      %88 = vector.extract_strided_slice %42 {offsets = [0, 128], sizes = [2, 32], strides = [1, 1]} : vector<2x192xf32> to vector<2x32xf32>
      %89 = vector.extract_strided_slice %42 {offsets = [0, 160], sizes = [2, 32], strides = [1, 1]} : vector<2x192xf32> to vector<2x32xf32>
      %90 = arith.mulf %87, %88 : vector<2x32xf32>
      %91 = arith.addf %90, %89 : vector<2x32xf32>
      %92 = vector.shape_cast %91 : vector<2x32xf32> to vector<2x1x32xf32>
      "tpu.trace_start"() <{level = 10 : i32, message = "bqd,bkd->bqk"}> : () -> ()
      %cst_53 = arith.constant dense<0.000000e+00> : vector<2x1x16xf32>
      %93 = tpu.matmul %92, %16, %cst_53 {dimension_numbers = #tpu.dot_dimension_numbers<[2], [2], [1], [1], [0, 0, 0, 1, 1, 1], [0], [0]>} : vector<2x1x32xf32>, vector<2x16x32xf32>, vector<2x1x16xf32> -> vector<2x1x16xf32>
      "tpu.trace_stop"() : () -> ()
      %cst_54 = arith.constant dense<0xFF800000> : vector<2x1xf32>
      %94 = vector.multi_reduction <maximumf>, %93, %cst_54 [2] : vector<2x1x16xf32> to vector<2x1xf32>
      %95 = vector.shape_cast %94 : vector<2x1xf32> to vector<2x1x1xf32>
      %96 = vector.broadcast %95 : vector<2x1x1xf32> to vector<2x1x16xf32>
      %97 = arith.subf %93, %96 : vector<2x1x16xf32>
      %98 = math.exp %97 : vector<2x1x16xf32>
      %cst_55 = arith.constant dense<0.000000e+00> : vector<2x1xf32>
      %99 = vector.multi_reduction <add>, %98, %cst_55 [2] : vector<2x1x16xf32> to vector<2x1xf32>
      %100 = vector.shape_cast %99 : vector<2x1xf32> to vector<2x1x1xf32>
      %101 = tpu.reciprocal %100 : vector<2x1x1xf32> -> vector<2x1x1xf32>
      %102 = vector.broadcast %101 : vector<2x1x1xf32> to vector<2x1x16xf32>
      %103 = arith.mulf %98, %102 : vector<2x1x16xf32>
      "tpu.trace_start"() <{level = 10 : i32, message = "bqk,bkd->bqd"}> : () -> ()
      %cst_56 = arith.constant dense<0.000000e+00> : vector<2x1x32xf32>
      %104 = tpu.matmul %103, %16, %cst_56 {dimension_numbers = #tpu.dot_dimension_numbers<[2], [1], [1], [2], [0, 0, 0, 1, 1, 2], [0], [0]>} : vector<2x1x16xf32>, vector<2x16x32xf32>, vector<2x1x32xf32> -> vector<2x1x32xf32>
      "tpu.trace_stop"() : () -> ()
      %105 = vector.shape_cast %104 : vector<2x1x32xf32> to vector<2x32xf32>
      %c0_57 = arith.constant 0 : index
      %c0_58 = arith.constant 0 : index
      %c0_59 = arith.constant 0 : index
      %106 = vector.load %arg8[%c0_57, %c0_58, %c0_59] : memref<3x64x32xf32, #tpu.memory_space<vmem>>, vector<1x32x32xf32>
      %107 = vector.shape_cast %106 : vector<1x32x32xf32> to vector<32x32xf32>
      %cst_60 = arith.constant dense<0.000000e+00> : vector<2x32xf32>
      %108 = tpu.matmul %63, %107, %cst_60 {dimension_numbers = #tpu.dot_dimension_numbers<[1], [0], [0], [1], [0, 0, 1, 1], [], []>} : vector<2x32xf32>, vector<32x32xf32>, vector<2x32xf32> -> vector<2x32xf32>
      %c0_61 = arith.constant 0 : index
      %c32_62 = arith.constant 32 : index
      %c0_63 = arith.constant 0 : index
      %109 = vector.load %arg8[%c0_61, %c32_62, %c0_63] : memref<3x64x32xf32, #tpu.memory_space<vmem>>, vector<1x32x32xf32>
      %110 = vector.shape_cast %109 : vector<1x32x32xf32> to vector<32x32xf32>
      %cst_64 = arith.constant dense<0.000000e+00> : vector<2x32xf32>
      %111 = tpu.matmul %arg14, %110, %cst_64 {dimension_numbers = #tpu.dot_dimension_numbers<[1], [0], [0], [1], [0, 0, 1, 1], [], []>} : vector<2x32xf32>, vector<32x32xf32>, vector<2x32xf32> -> vector<2x32xf32>
      %112 = arith.addf %108, %111 : vector<2x32xf32>
      %c1_65 = arith.constant 1 : index
      %c0_66 = arith.constant 0 : index
      %c0_67 = arith.constant 0 : index
      %113 = vector.load %arg8[%c1_65, %c0_66, %c0_67] : memref<3x64x32xf32, #tpu.memory_space<vmem>>, vector<1x32x32xf32>
      %114 = vector.shape_cast %113 : vector<1x32x32xf32> to vector<32x32xf32>
      %cst_68 = arith.constant dense<0.000000e+00> : vector<2x32xf32>
      %115 = tpu.matmul %84, %114, %cst_68 {dimension_numbers = #tpu.dot_dimension_numbers<[1], [0], [0], [1], [0, 0, 1, 1], [], []>} : vector<2x32xf32>, vector<32x32xf32>, vector<2x32xf32> -> vector<2x32xf32>
      %c1_69 = arith.constant 1 : index
      %c32_70 = arith.constant 32 : index
      %c0_71 = arith.constant 0 : index
      %116 = vector.load %arg8[%c1_69, %c32_70, %c0_71] : memref<3x64x32xf32, #tpu.memory_space<vmem>>, vector<1x32x32xf32>
      %117 = vector.shape_cast %116 : vector<1x32x32xf32> to vector<32x32xf32>
      %cst_72 = arith.constant dense<0.000000e+00> : vector<2x32xf32>
      %118 = tpu.matmul %arg15, %117, %cst_72 {dimension_numbers = #tpu.dot_dimension_numbers<[1], [0], [0], [1], [0, 0, 1, 1], [], []>} : vector<2x32xf32>, vector<32x32xf32>, vector<2x32xf32> -> vector<2x32xf32>
      %119 = arith.addf %115, %118 : vector<2x32xf32>
      %c2_73 = arith.constant 2 : index
      %c0_74 = arith.constant 0 : index
      %c0_75 = arith.constant 0 : index
      %120 = vector.load %arg8[%c2_73, %c0_74, %c0_75] : memref<3x64x32xf32, #tpu.memory_space<vmem>>, vector<1x32x32xf32>
      %121 = vector.shape_cast %120 : vector<1x32x32xf32> to vector<32x32xf32>
      %cst_76 = arith.constant dense<0.000000e+00> : vector<2x32xf32>
      %122 = tpu.matmul %105, %121, %cst_76 {dimension_numbers = #tpu.dot_dimension_numbers<[1], [0], [0], [1], [0, 0, 1, 1], [], []>} : vector<2x32xf32>, vector<32x32xf32>, vector<2x32xf32> -> vector<2x32xf32>
      %c2_77 = arith.constant 2 : index
      %c32_78 = arith.constant 32 : index
      %c0_79 = arith.constant 0 : index
      %123 = vector.load %arg8[%c2_77, %c32_78, %c0_79] : memref<3x64x32xf32, #tpu.memory_space<vmem>>, vector<1x32x32xf32>
      %124 = vector.shape_cast %123 : vector<1x32x32xf32> to vector<32x32xf32>
      %cst_80 = arith.constant dense<0.000000e+00> : vector<2x32xf32>
      %125 = tpu.matmul %arg16, %124, %cst_80 {dimension_numbers = #tpu.dot_dimension_numbers<[1], [0], [0], [1], [0, 0, 1, 1], [], []>} : vector<2x32xf32>, vector<32x32xf32>, vector<2x32xf32> -> vector<2x32xf32>
      %126 = arith.addf %122, %125 : vector<2x32xf32>
      %c0_81 = arith.constant 0 : index
      %c0_82 = arith.constant 0 : index
      %127 = vector.load %arg9[%c0_81, %c0_82] : memref<32x288xf32, #tpu.memory_space<vmem>>, vector<32x288xf32>
      %cst_83 = arith.constant dense<0.000000e+00> : vector<2x288xf32>
      %128 = tpu.matmul %40, %127, %cst_83 {dimension_numbers = #tpu.dot_dimension_numbers<[1], [0], [0], [1], [0, 0, 1, 1], [], []>} : vector<2x32xf32>, vector<32x288xf32>, vector<2x288xf32> -> vector<2x288xf32>
      %129 = vector.extract_strided_slice %128 {offsets = [0, 0], sizes = [2, 32], strides = [1, 1]} : vector<2x288xf32> to vector<2x32xf32>
      %130 = vector.extract_strided_slice %128 {offsets = [0, 32], sizes = [2, 32], strides = [1, 1]} : vector<2x288xf32> to vector<2x32xf32>
      %131 = vector.extract_strided_slice %128 {offsets = [0, 64], sizes = [2, 32], strides = [1, 1]} : vector<2x288xf32> to vector<2x32xf32>
      %132 = arith.maximumf %129, %130 : vector<2x32xf32>
      %133 = arith.maximumf %132, %131 : vector<2x32xf32>
      %134 = arith.subf %129, %133 : vector<2x32xf32>
      %135 = math.exp %134 : vector<2x32xf32>
      %136 = arith.subf %130, %133 : vector<2x32xf32>
      %137 = math.exp %136 : vector<2x32xf32>
      %138 = arith.subf %131, %133 : vector<2x32xf32>
      %139 = math.exp %138 : vector<2x32xf32>
      %140 = arith.addf %135, %137 : vector<2x32xf32>
      %141 = arith.addf %140, %139 : vector<2x32xf32>
      %142 = tpu.reciprocal %141 : vector<2x32xf32> -> vector<2x32xf32>
      %143 = arith.mulf %135, %142 : vector<2x32xf32>
      %144 = arith.mulf %143, %112 : vector<2x32xf32>
      %145 = arith.mulf %137, %142 : vector<2x32xf32>
      %146 = arith.mulf %145, %119 : vector<2x32xf32>
      %147 = arith.addf %144, %146 : vector<2x32xf32>
      %148 = arith.mulf %139, %142 : vector<2x32xf32>
      %149 = arith.mulf %148, %126 : vector<2x32xf32>
      %150 = arith.addf %147, %149 : vector<2x32xf32>
      %c0_84 = arith.constant 0 : index
      %c0_85 = arith.constant 0 : index
      %c0_86 = arith.constant 0 : index
      %151 = vector.load %arg10[%c0_84, %c0_85, %c0_86] : memref<3x32x32xf32, #tpu.memory_space<vmem>>, vector<1x32x32xf32>
      %152 = vector.shape_cast %151 : vector<1x32x32xf32> to vector<32x32xf32>
      %cst_87 = arith.constant dense<0.000000e+00> : vector<2x32xf32>
      %153 = tpu.matmul %150, %152, %cst_87 {dimension_numbers = #tpu.dot_dimension_numbers<[1], [0], [0], [1], [0, 0, 1, 1], [], []>} : vector<2x32xf32>, vector<32x32xf32>, vector<2x32xf32> -> vector<2x32xf32>
      %154 = vector.extract_strided_slice %128 {offsets = [0, 96], sizes = [2, 32], strides = [1, 1]} : vector<2x288xf32> to vector<2x32xf32>
      %155 = vector.extract_strided_slice %128 {offsets = [0, 128], sizes = [2, 32], strides = [1, 1]} : vector<2x288xf32> to vector<2x32xf32>
      %156 = vector.extract_strided_slice %128 {offsets = [0, 160], sizes = [2, 32], strides = [1, 1]} : vector<2x288xf32> to vector<2x32xf32>
      %157 = arith.maximumf %154, %155 : vector<2x32xf32>
      %158 = arith.maximumf %157, %156 : vector<2x32xf32>
      %159 = arith.subf %154, %158 : vector<2x32xf32>
      %160 = math.exp %159 : vector<2x32xf32>
      %161 = arith.subf %155, %158 : vector<2x32xf32>
      %162 = math.exp %161 : vector<2x32xf32>
      %163 = arith.subf %156, %158 : vector<2x32xf32>
      %164 = math.exp %163 : vector<2x32xf32>
      %165 = arith.addf %160, %162 : vector<2x32xf32>
      %166 = arith.addf %165, %164 : vector<2x32xf32>
      %167 = tpu.reciprocal %166 : vector<2x32xf32> -> vector<2x32xf32>
      %168 = arith.mulf %160, %167 : vector<2x32xf32>
      %169 = arith.mulf %168, %112 : vector<2x32xf32>
      %170 = arith.mulf %162, %167 : vector<2x32xf32>
      %171 = arith.mulf %170, %119 : vector<2x32xf32>
      %172 = arith.addf %169, %171 : vector<2x32xf32>
      %173 = arith.mulf %164, %167 : vector<2x32xf32>
      %174 = arith.mulf %173, %126 : vector<2x32xf32>
      %175 = arith.addf %172, %174 : vector<2x32xf32>
      %c1_88 = arith.constant 1 : index
      %c0_89 = arith.constant 0 : index
      %c0_90 = arith.constant 0 : index
      %176 = vector.load %arg10[%c1_88, %c0_89, %c0_90] : memref<3x32x32xf32, #tpu.memory_space<vmem>>, vector<1x32x32xf32>
      %177 = vector.shape_cast %176 : vector<1x32x32xf32> to vector<32x32xf32>
      %cst_91 = arith.constant dense<0.000000e+00> : vector<2x32xf32>
      %178 = tpu.matmul %175, %177, %cst_91 {dimension_numbers = #tpu.dot_dimension_numbers<[1], [0], [0], [1], [0, 0, 1, 1], [], []>} : vector<2x32xf32>, vector<32x32xf32>, vector<2x32xf32> -> vector<2x32xf32>
      %179 = vector.extract_strided_slice %128 {offsets = [0, 192], sizes = [2, 32], strides = [1, 1]} : vector<2x288xf32> to vector<2x32xf32>
      %180 = vector.extract_strided_slice %128 {offsets = [0, 224], sizes = [2, 32], strides = [1, 1]} : vector<2x288xf32> to vector<2x32xf32>
      %181 = vector.extract_strided_slice %128 {offsets = [0, 256], sizes = [2, 32], strides = [1, 1]} : vector<2x288xf32> to vector<2x32xf32>
      %182 = arith.maximumf %179, %180 : vector<2x32xf32>
      %183 = arith.maximumf %182, %181 : vector<2x32xf32>
      %184 = arith.subf %179, %183 : vector<2x32xf32>
      %185 = math.exp %184 : vector<2x32xf32>
      %186 = arith.subf %180, %183 : vector<2x32xf32>
      %187 = math.exp %186 : vector<2x32xf32>
      %188 = arith.subf %181, %183 : vector<2x32xf32>
      %189 = math.exp %188 : vector<2x32xf32>
      %190 = arith.addf %185, %187 : vector<2x32xf32>
      %191 = arith.addf %190, %189 : vector<2x32xf32>
      %192 = tpu.reciprocal %191 : vector<2x32xf32> -> vector<2x32xf32>
      %193 = arith.mulf %185, %192 : vector<2x32xf32>
      %194 = arith.mulf %193, %112 : vector<2x32xf32>
      %195 = arith.mulf %187, %192 : vector<2x32xf32>
      %196 = arith.mulf %195, %119 : vector<2x32xf32>
      %197 = arith.addf %194, %196 : vector<2x32xf32>
      %198 = arith.mulf %189, %192 : vector<2x32xf32>
      %199 = arith.mulf %198, %126 : vector<2x32xf32>
      %200 = arith.addf %197, %199 : vector<2x32xf32>
      %c2_92 = arith.constant 2 : index
      %c0_93 = arith.constant 0 : index
      %c0_94 = arith.constant 0 : index
      %201 = vector.load %arg10[%c2_92, %c0_93, %c0_94] : memref<3x32x32xf32, #tpu.memory_space<vmem>>, vector<1x32x32xf32>
      %202 = vector.shape_cast %201 : vector<1x32x32xf32> to vector<32x32xf32>
      %cst_95 = arith.constant dense<0.000000e+00> : vector<2x32xf32>
      %203 = tpu.matmul %200, %202, %cst_95 {dimension_numbers = #tpu.dot_dimension_numbers<[1], [0], [0], [1], [0, 0, 1, 1], [], []>} : vector<2x32xf32>, vector<32x32xf32>, vector<2x32xf32> -> vector<2x32xf32>
      scf.yield %40, %153, %178, %203 : vector<2x32xf32>, vector<2x32xf32>, vector<2x32xf32>, vector<2x32xf32>
    }
    %c4_i32_3 = arith.constant 4 : i32
    %c0 = arith.constant 0 : index
    %c0_4 = arith.constant 0 : index
    %c0_5 = arith.constant 0 : index
    %6 = vector.load %arg11[%c0, %c0_4, %c0_5] : memref<3x2x32xf32, #tpu.memory_space<vmem>>, vector<1x2x32xf32>
    %7 = vector.shape_cast %6 : vector<1x2x32xf32> to vector<2x32xf32>
    %8 = vector.shape_cast %5#1 : vector<2x32xf32> to vector<1x2x32xf32>
    tpu.vector_store %arg11[%c0, %c0_4, %c0_5], %8 {strides = array<i32>} : memref<3x2x32xf32, #tpu.memory_space<vmem>>, vector<1x2x32xf32>,
    %c1 = arith.constant 1 : index
    %c0_6 = arith.constant 0 : index
    %c0_7 = arith.constant 0 : index
    %9 = vector.load %arg11[%c1, %c0_6, %c0_7] : memref<3x2x32xf32, #tpu.memory_space<vmem>>, vector<1x2x32xf32>
    %10 = vector.shape_cast %9 : vector<1x2x32xf32> to vector<2x32xf32>
    %11 = vector.shape_cast %5#2 : vector<2x32xf32> to vector<1x2x32xf32>
    tpu.vector_store %arg11[%c1, %c0_6, %c0_7], %11 {strides = array<i32>} : memref<3x2x32xf32, #tpu.memory_space<vmem>>, vector<1x2x32xf32>,
    %c2 = arith.constant 2 : index
    %c0_8 = arith.constant 0 : index
    %c0_9 = arith.constant 0 : index
    %12 = vector.load %arg11[%c2, %c0_8, %c0_9] : memref<3x2x32xf32, #tpu.memory_space<vmem>>, vector<1x2x32xf32>
    %13 = vector.shape_cast %12 : vector<1x2x32xf32> to vector<2x32xf32>
    %14 = vector.shape_cast %5#3 : vector<2x32xf32> to vector<1x2x32xf32>
    tpu.vector_store %arg11[%c2, %c0_8, %c0_9], %14 {strides = array<i32>} : memref<3x2x32xf32, #tpu.memory_space<vmem>>, vector<1x2x32xf32>,
    return
  }
  func.func @transform_0(%arg0: i32) -> (i32, i32, i32) {
    %c0_i32 = arith.constant 0 : i32
    %c0_i32_0 = arith.constant 0 : i32
    %c0_i32_1 = arith.constant 0 : i32
    return %arg0, %c0_i32, %c0_i32_0 : i32, i32, i32
  }
  func.func @transform_1(%arg0: i32) -> (i32, i32) {
    %c0_i32 = arith.constant 0 : i32
    %c0_i32_0 = arith.constant 0 : i32
    return %arg0, %c0_i32 : i32, i32
  }
  func.func @transform_2(%arg0: i32) -> (i32, i32, i32) {
    %c0_i32 = arith.constant 0 : i32
    %c0_i32_0 = arith.constant 0 : i32
    %c0_i32_1 = arith.constant 0 : i32
    return %arg0, %c0_i32, %c0_i32_0 : i32, i32, i32
  }
  func.func @transform_3(%arg0: i32) -> (i32, i32, i32) {
    %c0_i32 = arith.constant 0 : i32
    %c0_i32_0 = arith.constant 0 : i32
    %c0_i32_1 = arith.constant 0 : i32
    %c0_i32_2 = arith.constant 0 : i32
    return %c0_i32, %c0_i32_0, %c0_i32_1 : i32, i32, i32
  }
  func.func @transform_4(%arg0: i32) -> (i32, i32) {
    %c0_i32 = arith.constant 0 : i32
    %c0_i32_0 = arith.constant 0 : i32
    %c0_i32_1 = arith.constant 0 : i32
    return %c0_i32, %c0_i32_0 : i32, i32
  }
  func.func @transform_5(%arg0: i32) -> (i32, i32, i32) {
    %c0_i32 = arith.constant 0 : i32
    %c0_i32_0 = arith.constant 0 : i32
    %c0_i32_1 = arith.constant 0 : i32
    %c0_i32_2 = arith.constant 0 : i32
    return %c0_i32, %c0_i32_0, %c0_i32_1 : i32, i32, i32
  }
  func.func @transform_6(%arg0: i32) -> (i32, i32) {
    %c0_i32 = arith.constant 0 : i32
    %c0_i32_0 = arith.constant 0 : i32
    %c0_i32_1 = arith.constant 0 : i32
    return %c0_i32, %c0_i32_0 : i32, i32
  }
  func.func @transform_7(%arg0: i32) -> (i32, i32, i32) {
    %c0_i32 = arith.constant 0 : i32
    %c0_i32_0 = arith.constant 0 : i32
    %c0_i32_1 = arith.constant 0 : i32
    %c0_i32_2 = arith.constant 0 : i32
    return %c0_i32, %c0_i32_0, %c0_i32_1 : i32, i32, i32
  }
  func.func @transform_8(%arg0: i32) -> (i32, i32) {
    %c0_i32 = arith.constant 0 : i32
    %c0_i32_0 = arith.constant 0 : i32
    %c0_i32_1 = arith.constant 0 : i32
    return %c0_i32, %c0_i32_0 : i32, i32
  }
  func.func @transform_9(%arg0: i32) -> (i32, i32, i32) {
    %c0_i32 = arith.constant 0 : i32
    %c0_i32_0 = arith.constant 0 : i32
    %c0_i32_1 = arith.constant 0 : i32
    %c0_i32_2 = arith.constant 0 : i32
    return %c0_i32, %c0_i32_0, %c0_i32_1 : i32, i32, i32
  }
  func.func @transform_10(%arg0: i32) -> (i32, i32, i32) {
    %c0_i32 = arith.constant 0 : i32
    %c0_i32_0 = arith.constant 0 : i32
    %c0_i32_1 = arith.constant 0 : i32
    return %c0_i32, %arg0, %c0_i32_0 : i32, i32, i32
  }
}

</mosaic_0001>

<bundles_post_ra>
// kernel: tpu_custom_call.1
= control target key start
LH: loop header
LB: loop body
LE: loop exit
PB: predicated region body
PF: predicated region fallthrough
CT: control target
= control target key end

     0   :  { %15 = vsyncpa [#allocation3], 0  ;;  %v1817_v0 = vmov 0.0   ;;  %v1819_v1 = vmov 0.0   ;;  %v1821_v2 = vmov 0.0   ;;  %v1823_v3 = vmov 0.0   ;;  %s2361_s0 = inlined_call_operand.vmem [shape: f32[2,8,32], index: 0, kind: input, shape index: {}]   ;;  %s2362_s1 = inlined_call_operand.vmem [shape: f32[2,64], index: 1, kind: input, shape index: {}]   ;;  %s2363_s2 = inlined_call_operand.vmem [shape: f32[2,16,32], index: 2, kind: input, shape index: {}]   ;;  %s2364_s3 = inlined_call_operand.vmem [shape: f32[4,64,32], index: 3, kind: input, shape index: {}]   ;;  %s2365_s4 = inlined_call_operand.vmem [shape: f32[64,32], index: 4, kind: input, shape index: {}]   ;;  %s2366_s5 = inlined_call_operand.vmem [shape: f32[3,32,32], index: 5, kind: input, shape index: {}]   ;;  %s2367_s6 = inlined_call_operand.vmem [shape: f32[32,192], index: 6, kind: input, shape index: {}]   ;;  %s2368_s7 = inlined_call_operand.vmem [shape: f32[3,64,32], index: 7, kind: input, shape index: {}]   ;;  %s2369_s8 = inlined_call_operand.vmem [shape: f32[32,288], index: 8, kind: input, shape index: {}]   ;;  %s2370_s9 = inlined_call_operand.vmem [shape: f32[3,32,32], index: 9, kind: input, shape index: {}]   ;;  %s2371_s10 = inlined_call_operand.hbm [shape: f32[3,2,32], index: 10, kind: output, shape index: {}]  }
   0x1   :  { %v1825_v4 = vmov 0.0   ;;  %s1827_s13 = smov 0  }
   0x2 LB: > { %v91_v5 = vld [vmem:[%s2365_s4 + $0x18] sm:$0xff]  ;;  %v90_v6 = vld [vmem:[%s2365_s4 + $0x10] sm:$0xff]  ;;  %s1489_s20 = sshll.u32 %s1754_s13, 6  ;;  %v89_v8 = vld [vmem:[%s2365_s4 + $0x8] sm:$0xff]  ;;  %v122_v9 = vrot.slane %v1746_v3, 7  ;;  %vm123_vm0 = vcmask 1041409   ;;  %s1754_s13 = sphi %s1827_s13, %s41_s13   ;;  %v1750_v4 = vphi %v1825_v4, %v1934_v4   ;;  %v1746_v3 = vphi %v1823_v3, %v1931_v3   ;;  %v1742_v2 = vphi %v1821_v2, %v2374_v2   ;;  %v1738_v1 = vphi %v1819_v1, %v2373_v1   ;;  %v1734_v0 = vphi %v1817_v0, %v2372_v0  }
   0x3   : > { %139 = vmatpush.msra.mxu2 %v91_v5  ;;  %v95_v7 = vld [vmem:[%s2365_s4 + $0x38] sm:$0xff]  ;;  %v94_v10 = vld [vmem:[%s2365_s4 + $0x30] sm:$0xff]  ;;  %s55_s27 = scalar_lea.vmem %s2364_s3, %s1489_s20  ;;  %v93_v11 = vld [vmem:[%s2365_s4 + $0x28] sm:$0xff]  ;;  %vm96_vm1 = vcmask 261120   ;;  %vm64_vm2 = vcmask 523264   ;;  %vm199_vm3 = vcmask 57344  }
   0x4   : > { %112 = vmatpush.msra.mxu1 %v95_v7  ;;  %v63_v12 = vld [vmem:[%s55_s27 + $0x38] sm:$0xff]  ;;  %v62_v13 = vld [vmem:[%s55_s27 + $0x30] sm:$0xff]  ;;  %v88_v14 = vld [vmem:[%s2365_s4] sm:$0xff]  ;;  %v124_v15 = vsel %vm123_vm0, %v122_v9, %v1750_v4  ;;  %vm248_vm8 = vcmask 64512   ;;  %s1756_s12 = smov 32   ;;  %s1757_s14 = smov 96  }
   0x5   : > { %140 = vmatpush.msra.mxu2 %v90_v6  ;;  %76 = vmatpush.msra.mxu0 %v63_v12  ;;  %v61_v16 = vld [vmem:[%s55_s27 + $0x28] sm:$0xff]  ;;  %v60_v17 = vld [vmem:[%s55_s27 + $0x20] sm:$0xff]  ;;  %v59_v18 = vld [vmem:[%s55_s27 + $0x18] sm:$0xff]  ;;  %s1758_s15 = smov 64   ;;  %vm440_vm13 = vcmask 122880   ;;  %s41_s13 = sadd.s32 1, %s1754_s13  }
   0x6   : > { %113 = vmatpush.msra.mxu1 %v94_v10  ;;  %v58_v19 = vld [vmem:[%s55_s27 + $0x10] sm:$0xff]  ;;  %v57_v20 = vld [vmem:[%s55_s27 + $0x8] sm:$0xff]  ;;  %v56_v21 = vld [vmem:[%s55_s27] sm:$0xff]  ;;  %p38_p0 = scmp.ge.s32.totalorder %s41_s13, 4  }
   0x7   : > { %141 = vmatpush.msra.mxu2 %v89_v8  ;;  %77 = vmatpush.msra.mxu0 %v62_v13  ;;  %v53_v22 = vld [vmem:[%s2362_s1] sm:$0x3]  ;;  %v48_v26 = vld [vmem:[%s2361_s0 + $0x8] sm:$0xff]  ;;  %v301_v45 = vld [vmem:[%s2367_s6 + $0x30] sm:$0xff]  ;;  %s1455_s16 = sshll.u32 (%p38_p0), %s2371_s10, 4  ;;  %s1760_s18 = smov (%p38_p0), 32   ;;  %s1456_s16 = int_to_ptr.hbm [resolvable:$true] %s1455_s16 }
   0x8   : > { %114 = vmatpush.msra.mxu1 %v93_v11  ;;  %v92_v23 = vld [vmem:[%s2365_s4 + $0x20] sm:$0xff]  ;;  %v302_v46 = vld [vmem:[%s2367_s6 + $0x38] sm:$0xff]  ;;  %v300_v48 = vld [vmem:[%s2367_s6 + $0x28] sm:$0xff]  ;;  %s1761_s19 = smov (%p38_p0), 2  }
   0x9   : > { %142 = vmatpush.msra.mxu2 %v88_v14  ;;  %78 = vmatpush.msra.mxu0 %v61_v16  ;;  %v47_v25 = vld [vmem:[%s2361_s0] sm:$0xff]  ;;  %v297_v12 = vld [vmem:[%s2367_s6 + $0x10] sm:$0xff]  ;;  %v298_v13 = vld [vmem:[%s2367_s6 + $0x18] sm:$0xff] }
   0xa   : > { %1492 = vmatmul.msk.f32.vlgmr.msra.gmra.mxu2 %vm96_vm1, %v124_v15  ;;  %115 = vmatpush.msra.mxu1 %v92_v23  ;;  %v299_v47 = vld [vmem:[%s2367_s6 + $0x20] sm:$0xff]  ;;  %v296_v15 = vld [vmem:[%s2367_s6 + $0x8] sm:$0xff]  ;;  %v352_v16 = vld [vmem:[%s2366_s5 + $0x18] sm:$0xff] }
   0xb   : > { %79 = vmatpush.msra.mxu0 %v60_v17  ;;  %1493 = vmatpush.xpose.msk.msra.mxu3 %vm96_vm1, %v47_v25  ;;  %v295_v14 = vld [vmem:[%s2367_s6] sm:$0xff]  ;;  %v351_v17 = vld [vmem:[%s2366_s5 + $0x10] sm:$0xff]  ;;  %v1952_v23 = vld [vmem:[%s2363_s2 + $0x18] sm:$0xff] }
   0xc   : > { %267 = vmatpush.msrb.mxu1 %v47_v25  ;;  %290 = vmatpush.msrb.mxu2 %v48_v26 }
   0xd   : > { %80 = vmatpush.msra.mxu0 %v59_v18  ;;  %v350_v18 = vld [vmem:[%s2366_s5 + $0x8] sm:$0xff] }
   0xf   : > { %81 = vmatpush.msra.mxu0 %v58_v19  ;;  %1495 = vmatpush.xpose.msk.msrb.mxu3 %vm96_vm1, %v48_v26  ;;  %v349_v19 = vld [vmem:[%s2366_s5] sm:$0xff]  ;;  %v1976_v26 = vld [vmem:[%s2363_s2 + $0x10] sm:$0xff] }
  0x11   : > { %82 = vmatpush.msra.mxu0 %v57_v20 }
  0x13   : > { %83 = vmatpush.msra.mxu0 %v56_v21 }
  0x14   : > { %1490 = vmatmul.msk.f32.vlgmr.msra.gmra.mxu0 %vm64_vm2, %v53_v22  ;;  %v1947_v22 = vld [vmem:[%s2363_s2 + $0x8] sm:$0xff] }
  0x15   : > { %341 = vmatpush.msrb.mxu0 %v302_v46  ;;  %1502 = vmatpush.xpose.msk.msra.mxu2 %vm96_vm1, %v1947_v22 }
  0x17   : > { %342 = vmatpush.msrb.mxu0 %v300_v48 }
  0x19   : > { %343 = vmatpush.msrb.mxu0 %v298_v13 }
  0x1b   : > { %344 = vmatpush.msrb.mxu0 %v296_v15 }
  0x1d   : > { %507 = vmatpush.msra.mxu0 %v1947_v22 }
  0x8d   : > { %v144_v27 = vpop.f32.mrf.mxu2 }
  0x91   : > { %v85_v24 = vpop.f32.mrf.mxu0 }
  0x92   : > { %1491 = vmatmul.msk.f32.vlgmr.msra.gmra.mxu1 %vm96_vm1, %v85_v24  ;;  %v1961_v24 = vld [vmem:[%s2363_s2] sm:$0xff] }
  0x93   : > { %368 = vmatpush.msra.mxu1 %v352_v16  ;;  %508 = vmatpush.msra.mxu0 %v1961_v24 }
  0x94   : > { %1503 = vmatpush.xpose.msk.msra.mxu2 %vm96_vm1, %v1961_v24 }
  0x95   : > { %369 = vmatpush.msra.mxu1 %v351_v17 }
  0x97   : > { %370 = vmatpush.msra.mxu1 %v350_v18 }
  0x99   : > { %371 = vmatpush.msra.mxu1 %v349_v19 }
 0x10f   : > { %v117_v28 = vpop.f32.mrf.mxu1 }
 0x110   : > { %v145_v29 = vadd.f32 %v144_v27, %v117_v28  ;;  %v1513_v27 = vld [vmem:[%s2366_s5 + $0x38] sm:$0xff]  ;;  %v1512_v28 = vld [vmem:[%s2366_s5 + $0x30] sm:$0xff] }
 0x112   : > { %1494 = vmatmul.msk.f32.vlgmr.msra.gmra.mxu3 %vm96_vm1, %v145_v29  ;;  %v148_v30 = vrot.slane %v145_v29, 1  ;;  %v1511_v29 = vld [vmem:[%s2366_s5 + $0x28] sm:$0xff] }
 0x113   : > { %321 = vmatpush.msra.mxu3 %v301_v45 }
 0x115   : > { %322 = vmatpush.msra.mxu3 %v299_v47 }
 0x117   : > { %323 = vmatpush.msra.mxu3 %v297_v12 }
 0x119   : > { %324 = vmatpush.msra.mxu3 %v295_v14 }
 0x11a   : > { %1496 = vmatmul.msk.f32.vlgmr.msrb.gmra.mxu3 %vm96_vm1, %v148_v30  ;;  %v1510_v30 = vld [vmem:[%s2366_s5 + $0x20] sm:$0xff] }
 0x11b   : > { %1505 = vmatpush.xpose.msk.msrb.mxu3 %vm96_vm1, %v1952_v23 }
 0x11f   : > { %1506 = vmatpush.xpose.msk.msrb.mxu3 %vm96_vm1, %v1976_v26 }
 0x195   : > { %v171_v31 = vpop.f32.mrf.mxu3 }
 0x196   : > { %v200_v34 = vsel %vm199_vm3, %v171_v31, -inf }
 0x19d   : > { %v196_v32 = vpop.f32.mrf.mxu3 }
 0x19e   : > { %v203_v33 = vsel %vm199_vm3, %v196_v32, -inf }
 0x19f   : > { %204 = vmax.xlane.f32.xlu0 %v203_v33 }
 0x1a7   : > { %201 = vmax.xlane.f32.xlu0 %v200_v34 }
 0x212   : > { %v205_v35 = vpop.xlane.xlu0 %204 }
 0x213   : > { %v207_v36 = vsub.f32 %v196_v32, %v205_v35 }
 0x215   : > { %v210_v37 = vmul.f32 1.442695, %v207_v36  ;;  %v1526_v36 = vld [vmem:[%s2366_s5 + $0x58] sm:$0xff] }
 0x217   : > { %1626 = vpow2.f32 %v210_v37  ;;  %v1525_v37 = vld [vmem:[%s2366_s5 + $0x50] sm:$0xff] }
 0x21a   : > { %v202_v38 = vpop.xlane.xlu0 %201 }
 0x21b   : > { %v206_v39 = vsub.f32 %v171_v31, %v202_v38  ;;  %v1524_v38 = vld [vmem:[%s2366_s5 + $0x48] sm:$0xff] }
 0x21d   : > { %v1627_v40 = vpop.eup %1626  ;;  %v208_v41 = vmul.f32 1.442695, %v206_v39  ;;  %v1523_v39 = vld [vmem:[%s2366_s5 + $0x40] sm:$0xff] }
 0x21e   : > { %v215_v42 = vsel %vm199_vm3, %v1627_v40, 0.0 }
 0x21f   : > { %1628 = vpow2.f32 %v208_v41  ;;  %216 = vadd.xlane.f32.xlu1 %v215_v42 }
 0x225   : > { %v1629_v43 = vpop.eup %1628 }
 0x226   : > { %v212_v44 = vsel %vm199_vm3, %v1629_v43, 0.0 }
 0x227   : > { %213 = vadd.xlane.f32.xlu1 %v212_v44 }
 0x292   : > { %v217_v49 = vpop.xlane.xlu1 %216 }
 0x293   : > { %1630 = vrcp.f32 %v217_v49  ;;  %v243_v54 = vand.u32 2147483648, %v217_v49  ;;  %v241_v56 = vand.u32 2147483647, %v217_v49  ;;  %vm237_vm5 = vweird.f32 %v217_v49 }
 0x295   : > { %v244_v59 = vor.u32 1.1754944e-38, %v243_v54  ;;  %vm242_vm7 = vcmp.eq.f32.partialorder %v241_v56, 8.507059e+37 }
 0x299   : > { %v1631_v50 = vpop.eup %1630 }
 0x29a   : > { %v233_v51 = vmul.f32 %v1631_v50, %v217_v49  ;;  %v214_v52 = vpop.xlane.xlu1 %213  ;;  %vm238_vm4 = vweird.f32 %v1631_v50 }
 0x29b   : > { %1632 = vrcp.f32 %v214_v52  ;;  %vm239_vm6 = vmor %vm237_vm5, %vm238_vm4  ;;  %v229_v4 = vand.u32 2147483648, %v214_v52  ;;  %v227_v6 = vand.u32 2147483647, %v214_v52  ;;  %vm223_vm10 = vweird.f32 %v214_v52 }
 0x29c   : > { %v234_v53 = vsub.f32 1.0, %v233_v51  ;;  %vm489_vm4 = vcmask 130048  }
 0x29d   : > { %v230_v8 = vor.u32 1.1754944e-38, %v229_v4  ;;  %vm228_vm12 = vcmp.eq.f32.partialorder %v227_v6, 8.507059e+37 }
 0x29e   : > { %v235_v55 = vmul.f32 %v1631_v50, %v234_v53 }
 0x2a0   : > { %v236_v57 = vadd.f32 %v1631_v50, %v235_v55 }
 0x2a1   : > { %v1633_v58 = vpop.eup %1632 }
 0x2a2   : > { %v219_v60 = vmul.f32 %v1633_v58, %v214_v52  ;;  %v240_v61 = vsel %vm239_vm6, %v1631_v50, %v236_v57  ;;  %vm224_vm9 = vweird.f32 %v1633_v58 }
 0x2a3   : > { %v245_v62 = vsel %vm242_vm7, %v244_v59, %v240_v61  ;;  %vm225_vm11 = vmor %vm223_vm10, %vm224_vm9 }
 0x2a4   : > { %v220_v63 = vsub.f32 1.0, %v219_v60  ;;  %v247_v3 = vmul.f32 %v1627_v40, %v245_v62 }
 0x2a6   : > { %v221_v5 = vmul.f32 %v1633_v58, %v220_v63  ;;  %1498 = vmatmul.msk.f32.vlgmr.msrb.gmra.mxu2 %vm248_vm8, %v247_v3 }
 0x2a7   : > { %556 = vmatpush.msrb.mxu2 %v1513_v27 }
 0x2a8   : > { %v222_v7 = vadd.f32 %v1633_v58, %v221_v5 }
 0x2a9   : > { %557 = vmatpush.msrb.mxu2 %v1512_v28 }
 0x2aa   : > { %v226_v9 = vsel %vm225_vm11, %v1633_v58, %v222_v7 }
 0x2ab   : > { %v231_v10 = vsel %vm228_vm12, %v230_v8, %v226_v9  ;;  %558 = vmatpush.msrb.mxu2 %v1511_v29 }
 0x2ac   : > { %v246_v11 = vmul.f32 %v1629_v43, %v231_v10 }
 0x2ad   : > { %559 = vmatpush.msrb.mxu2 %v1510_v30 }
 0x2ae   : > { %1497 = vmatmul.msk.f32.vlgmr.msrb.gmra.mxu1 %vm248_vm8, %v246_v11 }
 0x2af   : > { %530 = vmatpush.msrb.mxu1 %v1952_v23 }
 0x2b1   : > { %531 = vmatpush.msrb.mxu1 %v1976_v26 }
 0x2b6   : > { %1501 = vmatmul.msk.f32.vlgmr.msra.gmra.mxu1 %vm96_vm1, %v1742_v2 }
 0x2b7   : > { %683 = vmatpush.msra.mxu1 %v1947_v22 }
 0x2b9   : > { %684 = vmatpush.msra.mxu1 %v1961_v24 }
 0x329   : > { %v1931_v3 = vpop.f32.mrf.mxu2  }
 0x32a   : > { %v305_v20 = vrot.slane %v1931_v3, 7 }
 0x32b   : > { %v1934_v4 = vpop.f32.mrf.mxu1  }
 0x32c   : > { %v1938_v21 = vsel %vm123_vm0, %v305_v20, %v1934_v4 }
 0x32d   : > { %1499 = vmatmul.msk.f32.vlgmr.msra.gmra.mxu3 %vm96_vm1, %v1938_v21  ;;  %1500 = vmatmul.msk.f32.vlgmr.msrb.gmra.mxu0 %vm96_vm1, %v1938_v21 }
 0x32e   : > { %1518 = vmatpush.xpose.msk.msrb.mxu0 %vm96_vm1, %v1952_v23  ;;  %1515 = vmatpush.xpose.msk.msra.mxu3 %vm96_vm1, %v1947_v22 }
 0x332   : > { %1519 = vmatpush.xpose.msk.msrb.mxu0 %vm96_vm1, %v1976_v26  ;;  %1516 = vmatpush.xpose.msk.msra.mxu3 %vm96_vm1, %v1961_v24 }
 0x333   : > { %v373_v31 = vpop.f32.mrf.mxu1 }
 0x3b0   : > { %v326_v25 = vpop.f32.mrf.mxu3 }
 0x3b1   : > { %568 = vrot.lane.b32.xlu0 %v326_v25, %s1756_s12  ;;  %378 = vrot.lane.b32.xlu2 %v326_v25, %s1757_s14  ;;  %v376_v32 = vmul.f32 %v373_v31, %v326_v25 }
 0x3b9   : > { %564 = vrot.lane.b32.xlu2 %v326_v25, %s1758_s15 }
 0x40b   : > { %v379_v33 = vpop.permute.xlu2 %378 }
 0x40c   : > { %v381_v34 = vadd.f32 %v379_v33, %v376_v32 }
 0x40e   : > { %v383_v35 = vrot.slane %v381_v34, 1  ;;  %1504 = vmatmul.msk.f32.vlgmr.msra.gmra.mxu2 %vm96_vm1, %v381_v34 }
 0x40f   : > { %706 = vmatpush.msra.mxu2 %v1952_v23 }
 0x410   : > { %1507 = vmatmul.msk.f32.vlgmr.msrb.gmra.mxu3 %vm96_vm1, %v383_v35 }
 0x411   : > { %707 = vmatpush.msra.mxu2 %v1976_v26  ;;  %732 = vmatpush.msrb.mxu3 %v1526_v36  ;;  %v346_v36 = vpop.f32.mrf.mxu0 }
 0x413   : > { %733 = vmatpush.msrb.mxu3 %v1525_v37  ;;  %v565_v43 = vpop.permute.xlu2 %564  ;;  %v892_v37 = vld [vmem:[%s2368_s7 + $0x30] sm:$0xff] }
 0x415   : > { %734 = vmatpush.msrb.mxu3 %v1524_v38  ;;  %v891_v38 = vld [vmem:[%s2368_s7 + $0x28] sm:$0xff] }
 0x416   : > { %1514 = vmatmul.msk.f32.vlgmr.msrb.gmra.mxu2 %vm96_vm1, %v1738_v1 }
 0x417   : > { %857 = vmatpush.msrb.mxu2 %v1947_v22  ;;  %735 = vmatpush.msrb.mxu3 %v1523_v39 }
 0x419   : > { %858 = vmatpush.msrb.mxu2 %v1961_v24 }
 0x423   : > { %v569_v47 = vpop.permute.xlu0 %568 }
 0x491   : > { %v409_v40 = vpop.f32.mrf.mxu2 }
 0x492   : > { %v441_v41 = vsel %vm440_vm13, %v409_v40, -inf }
 0x493   : > { %442 = vmax.xlane.f32.xlu1 %v441_v41  ;;  %v437_v42 = vpop.f32.mrf.mxu3 }
 0x494   : > { %v444_v46 = vsel %vm440_vm13, %v437_v42, -inf }
 0x499   : > { %v561_v44 = vpop.f32.mrf.mxu2 }
 0x49a   : > { %v567_v45 = vmul.f32 %v565_v43, %v561_v44 }
 0x49b   : > { %445 = vmax.xlane.f32.xlu1 %v444_v46 }
 0x49c   : > { %v2023_v48 = vadd.f32 %v569_v47, %v567_v45 }
 0x49e   : > { %1517 = vmatmul.msk.f32.vlgmr.msra.gmra.mxu3 %vm96_vm1, %v2023_v48  ;;  %v573_v33 = vrot.slane %v2023_v48, 1 }
 0x49f   : > { %880 = vmatpush.msra.mxu3 %v1952_v23 }
 0x4a1   : > { %881 = vmatpush.msra.mxu3 %v1976_v26 }
 0x4a6   : > { %1527 = vmatmul.msk.f32.vlgmr.msrb.gmra.mxu3 %vm96_vm1, %v1734_v0 }
 0x506   : > { %v443_v49 = vpop.xlane.xlu1 %442 }
 0x507   : > { %v447_v50 = vsub.f32 %v409_v40, %v443_v49 }
 0x509   : > { %v449_v51 = vmul.f32 1.442695, %v447_v50 }
 0x50b   : > { %1634 = vpow2.f32 %v449_v51 }
 0x50e   : > { %v446_v52 = vpop.xlane.xlu1 %445 }
 0x50f   : > { %v448_v53 = vsub.f32 %v437_v42, %v446_v52 }
 0x511   : > { %v1635_v54 = vpop.eup %1634  ;;  %v451_v55 = vmul.f32 1.442695, %v448_v53  ;;  %v889_v53 = vld [vmem:[%s2368_s7 + $0x18] sm:$0xff] }
 0x512   : > { %v453_v56 = vsel %vm440_vm13, %v1635_v54, 0.0 }
 0x513   : > { %1636 = vpow2.f32 %v451_v55  ;;  %454 = vadd.xlane.f32.xlu2 %v453_v56  ;;  %v888_v55 = vld [vmem:[%s2368_s7 + $0x10] sm:$0xff]  ;;  %v887_v56 = vld [vmem:[%s2368_s7 + $0x8] sm:$0xff] }
 0x519   : > { %v1637_v57 = vpop.eup %1636 }
 0x51a   : > { %v456_v58 = vsel %vm440_vm13, %v1637_v57, 0.0 }
 0x51b   : > { %457 = vadd.xlane.f32.xlu0 %v456_v58 }
 0x521   : > { %v593_v59 = vpop.f32.mrf.mxu3 }
 0x522   : > { %v618_v60 = vsel %vm440_vm13, %v593_v59, -inf }
 0x523   : > { %619 = vmax.xlane.f32.xlu1 %v618_v60 }
 0x586   : > { %v455_v61 = vpop.xlane.xlu2 %454 }
 0x587   : > { %1638 = vrcp.f32 %v455_v61  ;;  %v470_v7 = vand.u32 2147483648, %v455_v61  ;;  %v468_v9 = vand.u32 2147483647, %v455_v61  ;;  %vm464_vm15 = vweird.f32 %v455_v61 }
 0x589   : > { %v471_v12 = vor.u32 1.1754944e-38, %v470_v7  ;;  %vm469_vm3 = vcmp.eq.f32.partialorder %v468_v9, 8.507059e+37  ;;  %v1552_v7 = vld [vmem:[%s2368_s7 + $0xa0] sm:$0xff]  ;;  %v1061_v9 = vld [vmem:[%s2369_s8 + $0x58] sm:$0xff] }
 0x58d   : > { %v1639_v62 = vpop.eup %1638 }
 0x58e   : > { %v460_v63 = vmul.f32 %v1639_v62, %v455_v61  ;;  %v458_v5 = vpop.xlane.xlu0 %457  ;;  %vm465_vm14 = vweird.f32 %v1639_v62  ;;  %v1555_v61 = vld [vmem:[%s2368_s7 + $0xb8] sm:$0xff] }
 0x58f   : > { %1640 = vrcp.f32 %v458_v5  ;;  %vm466_vm2 = vmor %vm464_vm15, %vm465_vm14  ;;  %v484_v20 = vand.u32 2147483648, %v458_v5  ;;  %v482_v28 = vand.u32 2147483647, %v458_v5  ;;  %vm478_vm6 = vweird.f32 %v458_v5 }
 0x590   : > { %v461_v6 = vsub.f32 1.0, %v460_v63  ;;  %v1554_v63 = vld [vmem:[%s2368_s7 + $0xb0] sm:$0xff] }
 0x591   : > { %v485_v30 = vor.u32 1.1754944e-38, %v484_v20  ;;  %vm483_vm8 = vcmp.eq.f32.partialorder %v482_v28, 8.507059e+37 }
 0x592   : > { %v462_v8 = vmul.f32 %v1639_v62, %v461_v6  ;;  %v1553_v6 = vld [vmem:[%s2368_s7 + $0xa8] sm:$0xff] }
 0x594   : > { %v463_v10 = vadd.f32 %v1639_v62, %v462_v8 }
 0x595   : > { %v1641_v11 = vpop.eup %1640 }
 0x596   : > { %v467_v13 = vsel %vm466_vm2, %v1639_v62, %v463_v10  ;;  %v474_v14 = vmul.f32 %v1641_v11, %v458_v5  ;;  %v620_v15 = vpop.xlane.xlu1 %619  ;;  %vm479_vm5 = vweird.f32 %v1641_v11  ;;  %v1058_v10 = vld [vmem:[%s2369_s8 + $0x40] sm:$0xff] }
 0x597   : > { %v472_v16 = vsel %vm469_vm3, %v471_v12, %v467_v13  ;;  %v624_v17 = vsub.f32 %v593_v59, %v620_v15  ;;  %vm480_vm7 = vmor %vm478_vm6, %vm479_vm5  ;;  %v886_v59 = vld [vmem:[%s2368_s7] sm:$0xff]  ;;  %v1055_v12 = vld [vmem:[%s2369_s8 + $0x28] sm:$0xff] }
 0x598   : > { %v475_v18 = vsub.f32 1.0, %v474_v14  ;;  %v487_v19 = vmul.f32 %v1635_v54, %v472_v16  ;;  %v737_v54 = vpop.f32.mrf.mxu3  ;;  %v1052_v13 = vld [vmem:[%s2369_s8 + $0x10] sm:$0xff] }
 0x599   : > { %v626_v25 = vmul.f32 1.442695, %v624_v17 }
 0x59a   : > { %v476_v27 = vmul.f32 %v1641_v11, %v475_v18  ;;  %1508 = vmatmul.msk.f32.vlgmr.msra.gmra.mxu0 %vm489_vm4, %v487_v19 }
 0x59b   : > { %1642 = vpow2.f32 %v626_v25  ;;  %1528 = vmatpush.xpose.msk.msra.mxu0 %vm96_vm1, %v1947_v22 }
 0x59c   : > { %v477_v29 = vadd.f32 %v1641_v11, %v476_v27 }
 0x59e   : > { %v481_v31 = vsel %vm480_vm7, %v1641_v11, %v477_v29 }
 0x59f   : > { %v486_v32 = vsel %vm483_vm8, %v485_v30, %v481_v31  ;;  %1529 = vmatpush.xpose.msk.msra.mxu0 %vm96_vm1, %v1961_v24  ;;  %v893_v24 = vld [vmem:[%s2368_s7 + $0x38] sm:$0xff] }
 0x5a0   : > { %v488_v34 = vmul.f32 %v1637_v57, %v486_v32  ;;  %v740_v57 = vmul.f32 %v737_v54, %v346_v36 }
 0x5a1   : > { %v1643_v35 = vpop.eup %1642 }
 0x5a2   : > { %1509 = vmatmul.msk.f32.vlgmr.msrb.gmra.mxu1 %vm489_vm4, %v488_v34  ;;  %1520 = vmatmul.msk.f32.vlgmr.msrb.gmra.mxu0 %vm96_vm1, %v573_v33  ;;  %v630_v22 = vsel %vm440_vm13, %v1643_v35, 0.0 }
 0x5a3   : > { %631 = vadd.xlane.f32.xlu1 %v630_v22  ;;  %1531 = vmatpush.xpose.msk.msrb.mxu1 %vm96_vm1, %v1952_v23  ;;  %v890_v23 = vld [vmem:[%s2368_s7 + $0x20] sm:$0xff] }
 0x5a4   : > { %906 = vmatpush.msrb.mxu0 %v893_v24 }
 0x5a6   : > { %907 = vmatpush.msrb.mxu0 %v892_v37 }
 0x5a7   : > { %1532 = vmatpush.xpose.msk.msrb.mxu1 %vm96_vm1, %v1976_v26 }
 0x5a8   : > { %908 = vmatpush.msrb.mxu0 %v891_v38 }
 0x5aa   : > { %909 = vmatpush.msrb.mxu0 %v890_v23 }
 0x5bc   : > { %742 = vrot.lane.b32.xlu1 %v346_v36, %s1757_s14 }
 0x616   : > { %v632_v26 = vpop.xlane.xlu1 %631 }
 0x617   : > { %1644 = vrcp.f32 %v632_v26  ;;  %v510_v39 = vpop.f32.mrf.mxu0  ;;  %v647_v45 = vand.u32 2147483648, %v632_v26  ;;  %v645_v47 = vand.u32 2147483647, %v632_v26  ;;  %vm641_vm10 = vweird.f32 %v632_v26 }
 0x619   : > { %v648_v49 = vor.u32 1.1754944e-38, %v647_v45  ;;  %vm646_vm12 = vcmp.eq.f32.partialorder %v645_v47, 8.507059e+37  ;;  %v1545_v45 = vld [vmem:[%s2368_s7 + $0x78] sm:$0xff]  ;;  %v1544_v47 = vld [vmem:[%s2368_s7 + $0x70] sm:$0xff] }
 0x61d   : > { %v1645_v40 = vpop.eup %1644 }
 0x61e   : > { %v637_v41 = vmul.f32 %v1645_v40, %v632_v26  ;;  %vm642_vm9 = vweird.f32 %v1645_v40 }
 0x61f   : > { %v615_v42 = vpop.f32.mrf.mxu0  ;;  %vm643_vm11 = vmor %vm641_vm10, %vm642_vm9  ;;  %v533_v5 = vpop.f32.mrf.mxu1 }
 0x620   : > { %v638_v43 = vsub.f32 1.0, %v637_v41  ;;  %v621_v44 = vsel %vm440_vm13, %v615_v42, -inf  ;;  %v916_v8 = vrot.slane %v533_v5, 7 }
 0x621   : > { %622 = vmax.xlane.f32.xlu2 %v621_v44 }
 0x622   : > { %v639_v46 = vmul.f32 %v1645_v40, %v638_v43  ;;  %v917_v11 = vsel %vm123_vm0, %v916_v8, %v510_v39 }
 0x624   : > { %v640_v48 = vadd.f32 %v1645_v40, %v639_v46  ;;  %v1541_v46 = vld [vmem:[%s2368_s7 + $0x58] sm:$0xff] }
 0x625   : > { %987 = vmatpush.msrb.mxu3 %v1541_v46 }
 0x626   : > { %v644_v50 = vsel %vm643_vm11, %v1645_v40, %v640_v48  ;;  %v1540_v48 = vld [vmem:[%s2368_s7 + $0x50] sm:$0xff] }
 0x627   : > { %v649_v51 = vsel %vm646_vm12, %v648_v49, %v644_v50  ;;  %v1543_v49 = vld [vmem:[%s2368_s7 + $0x68] sm:$0xff]  ;;  %988 = vmatpush.msrb.mxu3 %v1540_v48 }
 0x628   : > { %v664_v52 = vmul.f32 %v1643_v35, %v649_v51  ;;  %v1539_v50 = vld [vmem:[%s2368_s7 + $0x48] sm:$0xff]  ;;  %v1542_v51 = vld [vmem:[%s2368_s7 + $0x60] sm:$0xff] }
 0x629   : > { %989 = vmatpush.msrb.mxu3 %v1539_v50 }
 0x62a   : > { %1521 = vmatmul.msk.f32.vlgmr.msra.gmra.mxu1 %vm489_vm4, %v664_v52  ;;  %v1538_v52 = vld [vmem:[%s2368_s7 + $0x40] sm:$0xff] }
 0x62b   : > { %932 = vmatpush.msra.mxu1 %v889_v53  ;;  %990 = vmatpush.msrb.mxu3 %v1538_v52 }
 0x62d   : > { %933 = vmatpush.msra.mxu1 %v888_v55  ;;  %v1551_v55 = vld [vmem:[%s2368_s7 + $0x98] sm:$0xff] }
 0x62e   : > { %v743_v58 = vpop.permute.xlu1 %742 }
 0x62f   : > { %v745_v60 = vadd.f32 %v743_v58, %v740_v57  ;;  %934 = vmatpush.msra.mxu1 %v887_v56 }
 0x631   : > { %v747_v62 = vrot.slane %v745_v60, 1  ;;  %1530 = vmatmul.msk.f32.vlgmr.msra.gmra.mxu0 %vm96_vm1, %v745_v60  ;;  %935 = vmatpush.msra.mxu1 %v886_v59 }
 0x632   : > { %1016 = vmatpush.msra.mxu0 %v1555_v61 }
 0x633   : > { %1533 = vmatmul.msk.f32.vlgmr.msrb.gmra.mxu1 %vm96_vm1, %v747_v62 }
 0x634   : > { %1017 = vmatpush.msra.mxu0 %v1554_v63  ;;  %1042 = vmatpush.msrb.mxu1 %v1551_v55 }
 0x636   : > { %1018 = vmatpush.msra.mxu0 %v1553_v6 }
 0x638   : > { %1019 = vmatpush.msra.mxu0 %v1552_v7 }
 0x639   : > { %1536 = vmatmul.msk.f32.vlgmr.msrb.gmra.mxu0 %vm96_vm1, %v1742_v2 }
 0x63a   : > { %1114 = vmatpush.msrb.mxu0 %v1061_v9 }
 0x63b   : > { %1537 = vmatmul.msk.f32.vlgmr.msra.gmra.mxu1 %vm96_vm1, %v917_v11 }
 0x63c   : > { %1115 = vmatpush.msrb.mxu0 %v1058_v10 }
 0x63e   : > { %1116 = vmatpush.msrb.mxu0 %v1055_v12 }
 0x640   : > { %1117 = vmatpush.msrb.mxu0 %v1052_v13 }
 0x641   : > { %1556 = vmatmul.msk.f32.vlgmr.msra.gmra.mxu0 %vm96_vm1, %v1734_v0 }
 0x649   : > { %1560 = vmatmul.msk.f32.vlgmr.msrb.gmra.mxu0 %vm96_vm1, %v1938_v21 }
 0x694   : > { %v623_v2 = vpop.xlane.xlu2 %622 }
 0x695   : > { %v625_v14 = vsub.f32 %v615_v42, %v623_v2 }
 0x697   : > { %v628_v15 = vmul.f32 1.442695, %v625_v14 }
 0x699   : > { %1646 = vpow2.f32 %v628_v15 }
 0x69f   : > { %v1647_v16 = vpop.eup %1646 }
 0x6a0   : > { %v633_v17 = vsel %vm440_vm13, %v1647_v16, 0.0 }
 0x6a1   : > { %634 = vadd.xlane.f32.xlu2 %v633_v17 }
 0x6a7   : > { %v2109_v18 = vpop.f32.mrf.mxu1 }
 0x6ae   : > { %v767_v19 = vpop.f32.mrf.mxu0 }
 0x6af   : > { %v792_v20 = vsel %vm440_vm13, %v767_v19, -inf }
 0x6b0   : > { %793 = vmax.xlane.f32.xlu2 %v792_v20  ;;  %v789_v25 = vpop.f32.mrf.mxu1  ;;  %v1060_v20 = vld [vmem:[%s2369_s8 + $0x50] sm:$0xff] }
 0x6b1   : > { %v795_v0 = vsel %vm440_vm13, %v789_v25, -inf }
 0x6b2   : > { %796 = vmax.xlane.f32.xlu1 %v795_v0 }
 0x714   : > { %v635_v27 = vpop.xlane.xlu2 %634 }
 0x715   : > { %1648 = vrcp.f32 %v635_v27  ;;  %v661_v31 = vand.u32 2147483648, %v635_v27  ;;  %v659_v33 = vand.u32 2147483647, %v635_v27  ;;  %vm655_vm15 = vweird.f32 %v635_v27 }
 0x717   : > { %v662_v35 = vor.u32 1.1754944e-38, %v661_v31  ;;  %vm660_vm3 = vcmp.eq.f32.partialorder %v659_v33, 8.507059e+37 }
 0x71b   : > { %v1649_v28 = vpop.eup %1648 }
 0x71c   : > { %v651_v29 = vmul.f32 %v1649_v28, %v635_v27  ;;  %vm656_vm14 = vweird.f32 %v1649_v28  ;;  %v1057_v27 = vld [vmem:[%s2369_s8 + $0x38] sm:$0xff] }
 0x71d   : > { %vm657_vm2 = vmor %vm655_vm15, %vm656_vm14 }
 0x71e   : > { %v652_v30 = vsub.f32 1.0, %v651_v29  ;;  %v1054_v29 = vld [vmem:[%s2369_s8 + $0x20] sm:$0xff] }
 0x720   : > { %v653_v32 = vmul.f32 %v1649_v28, %v652_v30  ;;  %v1050_v30 = vld [vmem:[%s2369_s8] sm:$0xff] }
 0x722   : > { %v654_v34 = vadd.f32 %v1649_v28, %v653_v32  ;;  %v1051_v32 = vld [vmem:[%s2369_s8 + $0x8] sm:$0xff] }
 0x723   : > { %v794_v22 = vpop.xlane.xlu2 %793 }
 0x724   : > { %v658_v36 = vsel %vm657_vm2, %v1649_v28, %v654_v34  ;;  %v798_v24 = vsub.f32 %v767_v19, %v794_v22  ;;  %v1053_v28 = vld [vmem:[%s2369_s8 + $0x18] sm:$0xff]  ;;  %v1550_v34 = vld [vmem:[%s2368_s7 + $0x90] sm:$0xff] }
 0x725   : > { %v663_v37 = vsel %vm660_vm3, %v662_v35, %v658_v36  ;;  %v797_v38 = vpop.xlane.xlu1 %796  ;;  %1043 = vmatpush.msrb.mxu1 %v1550_v34 }
 0x726   : > { %v800_v23 = vmul.f32 1.442695, %v798_v24  ;;  %v799_v26 = vsub.f32 %v789_v25, %v797_v38  ;;  %v665_v39 = vmul.f32 %v1647_v16, %v663_v37  ;;  %v1059_v16 = vld [vmem:[%s2369_s8 + $0x48] sm:$0xff]  ;;  %v1056_v25 = vld [vmem:[%s2369_s8 + $0x30] sm:$0xff]  ;;  %v2188_v24 = vpop.f32.mrf.mxu0 }
 0x728   : > { %1650 = vpow2.f32 %v800_v23  ;;  %v802_v40 = vmul.f32 1.442695, %v799_v26  ;;  %1522 = vmatmul.msk.f32.vlgmr.msra.gmra.mxu2 %vm489_vm4, %v665_v39 }
 0x729   : > { %961 = vmatpush.msra.mxu2 %v1545_v45 }
 0x72a   : > { %1652 = vpow2.f32 %v802_v40 }
 0x72b   : > { %962 = vmatpush.msra.mxu2 %v1544_v47 }
 0x72d   : > { %963 = vmatpush.msra.mxu2 %v1543_v49 }
 0x72e   : > { %v1651_v41 = vpop.eup %1650  ;;  %v2193_v26 = vpop.f32.mrf.mxu0 }
 0x72f   : > { %v804_v42 = vsel %vm440_vm13, %v1651_v41, 0.0  ;;  %964 = vmatpush.msra.mxu2 %v1542_v51 }
 0x730   : > { %v1653_v43 = vpop.eup %1652  ;;  %805 = vadd.xlane.f32.xlu2 %v804_v42 }
 0x731   : > { %v807_v44 = vsel %vm440_vm13, %v1653_v43, 0.0 }
 0x732   : > { %808 = vadd.xlane.f32.xlu0 %v807_v44 }
 0x7a3   : > { %v806_v53 = vpop.xlane.xlu2 %805 }
 0x7a4   : > { %1654 = vrcp.f32 %v806_v53  ;;  %v821_v61 = vand.u32 2147483648, %v806_v53  ;;  %v819_v63 = vand.u32 2147483647, %v806_v53  ;;  %vm815_vm5 = vweird.f32 %v806_v53 }
 0x7a5   : > { %v809_v54 = vpop.xlane.xlu0 %808 }
 0x7a6   : > { %1656 = vrcp.f32 %v809_v54  ;;  %v835_v6 = vand.u32 2147483648, %v809_v54  ;;  %v833_v9 = vand.u32 2147483647, %v809_v54  ;;  %v822_v10 = vor.u32 1.1754944e-38, %v821_v61 }
 0x7a7   : > { %vm820_vm8 = vcmp.eq.f32.partialorder %v819_v63, 8.507059e+37  ;;  %vm829_vm9 = vweird.f32 %v809_v54 }
 0x7a8   : > { %v836_v2 = vor.u32 1.1754944e-38, %v835_v6  ;;  %vm834_vm11 = vcmp.eq.f32.partialorder %v833_v9, 8.507059e+37 }
 0x7aa   : > { %v1655_v56 = vpop.eup %1654 }
 0x7ab   : > { %v811_v57 = vmul.f32 %v1655_v56, %v806_v53  ;;  %vm816_vm13 = vweird.f32 %v1655_v56  ;;  %v709_v0 = vpop.f32.mrf.mxu2 }
 0x7ac   : > { %v1657_v58 = vpop.eup %1656  ;;  %vm817_vm7 = vmor %vm815_vm5, %vm816_vm13  ;;  %v971_v31 = vrot.slane %v709_v0, 7 }
 0x7ad   : > { %v812_v59 = vsub.f32 1.0, %v811_v57  ;;  %v825_v60 = vmul.f32 %v1657_v58, %v809_v54  ;;  %vm830_vm6 = vweird.f32 %v1657_v58 }
 0x7ae   : > { %vm831_vm10 = vmor %vm829_vm9, %vm830_vm6  ;;  %v972_v33 = vsel %vm123_vm0, %v971_v31, %v2109_v18  ;;  %v1548_v18 = vld [vmem:[%s2368_s7 + $0x80] sm:$0xff] }
 0x7af   : > { %v813_v62 = vmul.f32 %v1655_v56, %v812_v59  ;;  %v826_v5 = vsub.f32 1.0, %v825_v60 }
 0x7b1   : > { %v814_v7 = vadd.f32 %v1655_v56, %v813_v62  ;;  %v827_v8 = vmul.f32 %v1657_v58, %v826_v5 }
 0x7b3   : > { %v818_v11 = vsel %vm817_vm7, %v1655_v56, %v814_v7  ;;  %v828_v12 = vadd.f32 %v1657_v58, %v827_v8 }
 0x7b4   : > { %v823_v13 = vsel %vm820_vm8, %v822_v10, %v818_v11 }
 0x7b5   : > { %v832_v14 = vsel %vm831_vm10, %v1657_v58, %v828_v12  ;;  %v838_v15 = vmul.f32 %v1651_v41, %v823_v13  ;;  %v1119_v41 = vpop.f32.mrf.mxu0 }
 0x7b6   : > { %v837_v17 = vsel %vm834_vm11, %v836_v2, %v832_v14 }
 0x7b7   : > { %1534 = vmatmul.msk.f32.vlgmr.msrb.gmra.mxu2 %vm489_vm4, %v838_v15  ;;  %v839_v19 = vmul.f32 %v1653_v43, %v837_v17 }
 0x7b8   : > { %1074 = vmatpush.msrb.mxu2 %v1059_v16 }
 0x7b9   : > { %1535 = vmatmul.msk.f32.vlgmr.msra.gmra.mxu3 %vm489_vm4, %v839_v19 }
 0x7ba   : > { %1094 = vmatpush.msra.mxu3 %v1060_v20  ;;  %1075 = vmatpush.msrb.mxu2 %v1056_v25 }
 0x7bc   : > { %1095 = vmatpush.msra.mxu3 %v1057_v27  ;;  %1076 = vmatpush.msrb.mxu2 %v1053_v28 }
 0x7be   : > { %1096 = vmatpush.msra.mxu3 %v1054_v29  ;;  %1077 = vmatpush.msrb.mxu2 %v1050_v30 }
 0x7bf   : > { %1546 = vmatmul.msk.f32.vlgmr.msra.gmra.mxu2 %vm96_vm1, %v1738_v1  ;;  %v1549_v1 = vld [vmem:[%s2368_s7 + $0x88] sm:$0xff] }
 0x7c0   : > { %1097 = vmatpush.msra.mxu3 %v1051_v32  ;;  %1044 = vmatpush.msrb.mxu1 %v1549_v1 }
 0x7c1   : > { %1547 = vmatmul.msk.f32.vlgmr.msrb.gmra.mxu3 %vm96_vm1, %v972_v33 }
 0x7c2   : > { %1045 = vmatpush.msrb.mxu1 %v1548_v18 }
 0x7c7   : > { %1558 = vmatmul.msk.f32.vlgmr.msrb.gmra.mxu2 %vm96_vm1, %v1938_v21 }
 0x7c9   : > { %1559 = vmatmul.msk.f32.vlgmr.msra.gmra.mxu3 %vm96_vm1, %v1938_v21 }
 0x83a   : > { %v860_v35 = vpop.f32.mrf.mxu2 }
 0x83c   : > { %v883_v22 = vpop.f32.mrf.mxu3 }
 0x83d   : > { %v1026_v36 = vrot.slane %v883_v22, 7 }
 0x83f   : > { %v1027_v21 = vsel %vm123_vm0, %v1026_v36, %v860_v35  ;;  %v937_v35 = vpop.f32.mrf.mxu1 }
 0x840   : > { %1557 = vmatmul.msk.f32.vlgmr.msrb.gmra.mxu1 %vm96_vm1, %v1027_v21 }
 0x842   : > { %v966_v37 = vpop.f32.mrf.mxu2 }
 0x844   : > { %v992_v38 = vpop.f32.mrf.mxu3 }
 0x845   : > { %v2191_v23 = vadd.f32 %v992_v38, %v966_v37 }
 0x84a   : > { %v2195_v39 = vpop.f32.mrf.mxu2 }
 0x84b   : > { %1123 = vrot.lane.b32.xlu1 %v2195_v39, %s1757_s14 }
 0x84c   : > { %v2199_v40 = vpop.f32.mrf.mxu3 }
 0x84d   : > { %1234 = vrot.lane.b32.xlu2 %v2199_v40, %s1758_s15  ;;  %1230 = vrot.lane.b32.xlu0 %v2199_v40, %s1757_s14 }
 0x855   : > { %1340 = vrot.lane.b32.xlu0 %v1119_v41, %s1758_s15 }
 0x8a7   : > { %v1235_v44 = vpop.permute.xlu2 %1234 }
 0x8bd   : > { %v1124_v52 = vpop.permute.xlu1 %1123 }
 0x8be   : > { %v1126_v54 = vmax.f32 %v2195_v39, %v1124_v52 }
 0x8bf   : > { %v1231_v42 = vpop.permute.xlu0 %1230 }
 0x8c0   : > { %v1233_v43 = vmax.f32 %v2195_v39, %v1231_v42  ;;  %v1338_v46 = vmax.f32 %v2199_v40, %v1231_v42 }
 0x8c2   : > { %v1237_v45 = vmax.f32 %v1233_v43, %v1235_v44 }
 0x8c4   : > { %1242 = vrot.lane.b32.xlu2 %v1237_v45, %s1756_s12  ;;  %v1238_v2 = vsub.f32 %v2195_v39, %v1237_v45 }
 0x8c6   : > { %v1239_v14 = vmul.f32 1.442695, %v1238_v2 }
 0x8c7   : > { %v1341_v47 = vpop.permute.xlu0 %1340 }
 0x8c8   : > { %v1343_v48 = vmax.f32 %v1338_v46, %v1341_v47 }
 0x8ca   : > { %1348 = vrot.lane.b32.xlu0 %v1343_v48, %s1756_s12  ;;  %v1344_v29 = vsub.f32 %v2199_v40, %v1343_v48 }
 0x8cc   : > { %1248 = vrot.lane.b32.xlu2 %v1237_v45, %s1758_s15  ;;  %v1345_v31 = vmul.f32 1.442695, %v1344_v29  ;;  %v1047_v45 = vpop.f32.mrf.mxu1 }
 0x8cd   : > { %v2257_v46 = vadd.f32 %v1047_v45, %v2193_v26 }
 0x8d2   : > { %1354 = vrot.lane.b32.xlu0 %v1343_v48, %s1758_s15 }
 0x8d4   : > { %1127 = vrot.lane.b32.xlu2 %v2195_v39, %s1758_s15 }
 0x91e   : > { %v1243_v49 = vpop.permute.xlu2 %1242 }
 0x91f   : > { %v1245_v51 = vsub.f32 %v2199_v40, %v1243_v49 }
 0x921   : > { %v1246_v55 = vmul.f32 1.442695, %v1245_v51 }
 0x923   : > { %1658 = vpow2.f32 %v1246_v55 }
 0x926   : > { %v1249_v50 = vpop.permute.xlu2 %1248 }
 0x927   : > { %v1251_v53 = vsub.f32 %v2199_v40, %v1249_v50  ;;  %v2264_v50 = vadd.f32 %v937_v35, %v2188_v24 }
 0x929   : > { %v1252_v56 = vmul.f32 1.442695, %v1251_v53  ;;  %v2223_v59 = vpop.eup %1658 }
 0x92b   : > { %1660 = vpow2.f32 %v1252_v56 }
 0x92e   : > { %v1128_v57 = vpop.permute.xlu2 %1127 }
 0x92f   : > { %v2217_v58 = vmax.f32 %v1126_v54, %v1128_v57 }
 0x931   : > { %1141 = vrot.lane.b32.xlu2 %v2217_v58, %s1758_s15  ;;  %1135 = vrot.lane.b32.xlu0 %v2217_v58, %s1756_s12  ;;  %v2225_v60 = vpop.eup %1660  ;;  %v1131_v24 = vsub.f32 %v2195_v39, %v2217_v58 }
 0x939   : > { %1260 = vrot.lane.b32.xlu2 %v2225_v60, %s1758_s15  ;;  %1255 = vrot.lane.b32.xlu0 %v2223_v59, %s1757_s14 }
 0x93c   : > { %v1349_v61 = vpop.permute.xlu0 %1348 }
 0x93d   : > { %v1351_v62 = vsub.f32 %v2199_v40, %v1349_v61  ;;  %v1132_v61 = vmul.f32 1.442695, %v1131_v24  ;;  %v1204_v24 = vld [vmem:[%s2370_s9 + $0x10] sm:$0xff] }
 0x93f   : > { %v1352_v63 = vmul.f32 1.442695, %v1351_v62 }
 0x941   : > { %1662 = vpow2.f32 %v1352_v63 }
 0x944   : > { %v1355_v5 = vpop.permute.xlu0 %1354 }
 0x945   : > { %v1357_v6 = vsub.f32 %v1119_v41, %v1355_v5 }
 0x947   : > { %v2232_v7 = vpop.eup %1662  ;;  %v1358_v8 = vmul.f32 1.442695, %v1357_v6 }
 0x948   : > { %1361 = vrot.lane.b32.xlu1 %v2232_v7, %s1757_s14 }
 0x949   : > { %1664 = vpow2.f32 %v1358_v8 }
 0x94f   : > { %v2236_v9 = vpop.eup %1664 }
 0x950   : > { %1366 = vrot.lane.b32.xlu0 %v2236_v9, %s1758_s15 }
 0x98b   : > { %v1142_v10 = vpop.permute.xlu2 %1141 }
 0x98c   : > { %v1144_v11 = vsub.f32 %v2195_v39, %v1142_v10 }
 0x98e   : > { %v1145_v12 = vmul.f32 1.442695, %v1144_v11 }
 0x990   : > { %1666 = vpow2.f32 %v1145_v12 }
 0x991   : > { %1668 = vpow2.f32 %v1239_v14 }
 0x993   : > { %v1261_v0 = vpop.permute.xlu2 %1260 }
 0x996   : > { %v2241_v13 = vpop.eup %1666 }
 0x997   : > { %1153 = vrot.lane.b32.xlu2 %v2241_v13, %s1758_s15  ;;  %v1669_v19 = vpop.eup %1668 }
 0x9a3   : > { %v1136_v15 = vpop.permute.xlu0 %1135 }
 0x9a4   : > { %v1138_v16 = vsub.f32 %v2195_v39, %v1136_v15 }
 0x9a6   : > { %v1139_v17 = vmul.f32 1.442695, %v1138_v16 }
 0x9a8   : > { %1670 = vpow2.f32 %v1139_v17 }
 0x9ab   : > { %v1256_v20 = vpop.permute.xlu0 %1255 }
 0x9ac   : > { %v1258_v25 = vadd.f32 %v1669_v19, %v1256_v20 }
 0x9ae   : > { %v2247_v27 = vpop.eup %1670  ;;  %v1263_v28 = vadd.f32 %v1261_v0, %v1258_v25 }
 0x9af   : > { %1148 = vrot.lane.b32.xlu1 %v2247_v27, %s1757_s14 }
 0x9b0   : > { %1672 = vrcp.f32 %v1263_v28  ;;  %v1275_v34 = vand.u32 2147483648, %v1263_v28  ;;  %v1273_v18 = vand.u32 2147483647, %v1263_v28  ;;  %vm1269_vm4 = vweird.f32 %v1263_v28 }
 0x9b1   : > { %1674 = vpow2.f32 %v1345_v31 }
 0x9b2   : > { %v1276_v21 = vor.u32 1.1754944e-38, %v1275_v34  ;;  %vm1274_vm14 = vcmp.eq.f32.partialorder %v1273_v18, 8.507059e+37 }
 0x9b6   : > { %v1673_v30 = vpop.eup %1672 }
 0x9b7   : > { %v1265_v32 = vmul.f32 %v1673_v30, %v1263_v28  ;;  %vm1270_vm0 = vweird.f32 %v1673_v30  ;;  %v1675_v38 = vpop.eup %1674 }
 0x9b8   : > { %vm1271_vm12 = vmor %vm1269_vm4, %vm1270_vm0 }
 0x9b9   : > { %v1266_v33 = vsub.f32 1.0, %v1265_v32 }
 0x9ba   : > { %v1362_v36 = vpop.permute.xlu1 %1361 }
 0x9bb   : > { %v1267_v1 = vmul.f32 %v1673_v30, %v1266_v33  ;;  %v1364_v40 = vadd.f32 %v1675_v38, %v1362_v36 }
 0x9bd   : > { %v1268_v22 = vadd.f32 %v1673_v30, %v1267_v1 }
 0x9bf   : > { %v1272_v37 = vsel %vm1271_vm12, %v1673_v30, %v1268_v22 }
 0x9c0   : > { %v1277_v41 = vsel %vm1274_vm14, %v1276_v21, %v1272_v37 }
 0x9c1   : > { %1295 = vrot.lane.b32.xlu2 %v1277_v41, %s1758_s15  ;;  %1285 = vrot.lane.b32.xlu0 %v1277_v41, %s1756_s12  ;;  %v2254_v42 = vmul.f32 %v1669_v19, %v1277_v41 }
 0x9c2   : > { %v1367_v43 = vpop.permute.xlu0 %1366 }
 0x9c3   : > { %v1369_v44 = vadd.f32 %v1367_v43, %v1364_v40  ;;  %v1565_v43 = vld [vmem:[%s2370_s9 + $0x38] sm:$0xff] }
 0x9c4   : > { %1330 = vmatpush.msra.mxu2 %v1565_v43 }
 0x9c5   : > { %1676 = vrcp.f32 %v1369_v44  ;;  %v1381_v51 = vand.u32 2147483648, %v1369_v44  ;;  %v1379_v53 = vand.u32 2147483647, %v1369_v44  ;;  %vm1375_vm2 = vweird.f32 %v1369_v44 }
 0x9c6   : > { %1678 = vpow2.f32 %v1132_v61  ;;  %v1203_v61 = vld [vmem:[%s2370_s9 + $0x8] sm:$0xff] }
 0x9c7   : > { %v1382_v54 = vor.u32 1.1754944e-38, %v1381_v51  ;;  %vm1380_vm13 = vcmp.eq.f32.partialorder %v1379_v53, 8.507059e+37 }
 0x9c9   : > { %1299 = vrot.lane.b32.xlu2 %v2257_v46, %s1756_s12  ;;  %1394 = vrot.lane.b32.xlu0 %v2191_v23, %s1757_s14 }
 0x9cb   : > { %v1677_v47 = vpop.eup %1676 }
 0x9cc   : > { %v1371_v48 = vmul.f32 %v1677_v47, %v1369_v44  ;;  %vm1376_vm15 = vweird.f32 %v1677_v47  ;;  %v1679_v62 = vpop.eup %1678  ;;  %v1564_v44 = vld [vmem:[%s2370_s9 + $0x30] sm:$0xff] }
 0x9cd   : > { %vm1377_vm3 = vmor %vm1375_vm2, %vm1376_vm15  ;;  %1331 = vmatpush.msra.mxu2 %v1564_v44 }
 0x9ce   : > { %v1372_v49 = vsub.f32 1.0, %v1371_v48 }
 0x9d0   : > { %v1373_v52 = vmul.f32 %v1677_v47, %v1372_v49 }
 0x9d1   : > { %1280 = vrot.lane.b32.xlu0 %v2264_v50, %s1757_s14 }
 0x9d2   : > { %v1374_v26 = vadd.f32 %v1677_v47, %v1373_v52 }
 0x9d4   : > { %v1378_v55 = vsel %vm1377_vm3, %v1677_v47, %v1374_v26 }
 0x9d5   : > { %v1383_v56 = vsel %vm1380_vm13, %v1382_v54, %v1378_v55  ;;  %v1570_v54 = vld [vmem:[%s2370_s9 + $0x58] sm:$0xff]  ;;  %v1569_v55 = vld [vmem:[%s2370_s9 + $0x50] sm:$0xff] }
 0x9d6   : > { %1390 = vrot.lane.b32.xlu1 %v1383_v56, %s1756_s12  ;;  %v2269_v57 = vmul.f32 %v1675_v38, %v1383_v56  ;;  %1435 = vmatpush.msrb.mxu3 %v1570_v54 }
 0x9d8   : > { %1436 = vmatpush.msrb.mxu3 %v1569_v55 }
 0x9de   : > { %1403 = vrot.lane.b32.xlu1 %v1383_v56, %s1758_s15  ;;  %v1568_v56 = vld [vmem:[%s2370_s9 + $0x48] sm:$0xff] }
 0x9df   : > { %1437 = vmatpush.msrb.mxu3 %v1568_v56 }
 0x9e6   : > { %1385 = vrot.lane.b32.xlu1 %v2264_v50, %s1758_s15 }
 0x9f1   : > { %v1154_v6 = vpop.permute.xlu2 %1153 }
 0xa1b   : > { %v1296_v14 = vpop.permute.xlu2 %1295 }
 0xa1c   : > { %v1298_v30 = vmul.f32 %v2225_v60, %v1296_v14 }
 0xa21   : > { %v1149_v63 = vpop.permute.xlu1 %1148 }
 0xa22   : > { %v1151_v5 = vadd.f32 %v1679_v62, %v1149_v63 }
 0xa23   : > { %v1300_v29 = vpop.permute.xlu2 %1299 }
 0xa24   : > { %v1156_v8 = vadd.f32 %v1154_v6, %v1151_v5  ;;  %v1302_v31 = vmul.f32 %v1300_v29, %v1298_v30  ;;  %v1202_v5 = vld [vmem:[%s2370_s9] sm:$0xff] }
 0xa26   : > { %1680 = vrcp.f32 %v1156_v8  ;;  %v1168_v2 = vand.u32 2147483648, %v1156_v8  ;;  %v1166_v16 = vand.u32 2147483647, %v1156_v8  ;;  %vm1162_vm6 = vweird.f32 %v1156_v8 }
 0xa28   : > { %v1169_v58 = vor.u32 1.1754944e-38, %v1168_v2  ;;  %vm1167_vm8 = vcmp.eq.f32.partialorder %v1166_v16, 8.507059e+37 }
 0xa2c   : > { %v1681_v10 = vpop.eup %1680 }
 0xa2d   : > { %v1158_v11 = vmul.f32 %v1681_v10, %v1156_v8  ;;  %vm1163_vm5 = vweird.f32 %v1681_v10 }
 0xa2e   : > { %vm1164_vm7 = vmor %vm1162_vm6, %vm1163_vm5 }
 0xa2f   : > { %v1159_v12 = vsub.f32 1.0, %v1158_v11 }
 0xa31   : > { %v1160_v15 = vmul.f32 %v1681_v10, %v1159_v12 }
 0xa33   : > { %v1286_v17 = vpop.permute.xlu0 %1285  ;;  %v1161_v19 = vadd.f32 %v1681_v10, %v1160_v15 }
 0xa34   : > { %v1288_v39 = vmul.f32 %v2223_v59, %v1286_v17 }
 0xa35   : > { %v1165_v20 = vsel %vm1164_vm7, %v1681_v10, %v1161_v19 }
 0xa36   : > { %v1289_v25 = vmul.f32 %v1288_v39, %v2191_v23  ;;  %v1170_v0 = vsel %vm1167_vm8, %v1169_v58, %v1165_v20 }
 0xa37   : > { %1174 = vrot.lane.b32.xlu1 %v1170_v0, %s1756_s12  ;;  %v2279_v28 = vmul.f32 %v1679_v62, %v1170_v0 }
 0xa38   : > { %1291 = vrot.lane.b32.xlu2 %v1289_v25, %s1757_s14 }
 0xa39   : > { %v1172_v8 = vmul.f32 %v2279_v28, %v2264_v50 }
 0xa3b   : > { %v1395_v33 = vpop.permute.xlu0 %1394 }
 0xa3f   : > { %1179 = vrot.lane.b32.xlu1 %v2191_v23, %s1756_s12 }
 0xa40   : > { %1304 = vrot.lane.b32.xlu2 %v1302_v31, %s1758_s15 }
 0xa43   : > { %v1281_v35 = vpop.permute.xlu0 %1280 }
 0xa44   : > { %v1283_v22 = vmul.f32 %v1281_v35, %v2254_v42  ;;  %v1563_v42 = vld [vmem:[%s2370_s9 + $0x28] sm:$0xff] }
 0xa45   : > { %1332 = vmatpush.msra.mxu2 %v1563_v42 }
 0xa48   : > { %1188 = vrot.lane.b32.xlu2 %v1170_v0, %s1758_s15  ;;  %v1391_v59 = vpop.permute.xlu1 %1390 }
 0xa49   : > { %v1393_v32 = vmul.f32 %v2232_v7, %v1391_v59 }
 0xa4b   : > { %v1397_v34 = vmul.f32 %v1395_v33, %v1393_v32 }
 0xa4d   : > { %1399 = vrot.lane.b32.xlu0 %v1397_v34, %s1757_s14 }
 0xa50   : > { %v1404_v1 = vpop.permute.xlu1 %1403 }
 0xa51   : > { %v1406_v18 = vmul.f32 %v2236_v9, %v1404_v1 }
 0xa53   : > { %v1407_v60 = vmul.f32 %v1406_v18, %v2257_v46 }
 0xa55   : > { %1409 = vrot.lane.b32.xlu0 %v1407_v60, %s1758_s15 }
 0xa58   : > { %v1386_v37 = vpop.permute.xlu1 %1385 }
 0xa5d   : > { %1193 = vrot.lane.b32.xlu0 %v2257_v46, %s1758_s15  ;;  %v1388_v46 = vmul.f32 %v1386_v37, %v2269_v57  ;;  %v1205_v57 = vld [vmem:[%s2370_s9 + $0x18] sm:$0xff] }
 0xa5e   : > { %1221 = vmatpush.msra.mxu1 %v1205_v57 }
 0xa60   : > { %1222 = vmatpush.msra.mxu1 %v1204_v24 }
 0xa62   : > { %1223 = vmatpush.msra.mxu1 %v1203_v61 }
 0xa64   : > { %1224 = vmatpush.msra.mxu1 %v1202_v5 }
 0xa92   : > { %v1292_v23 = vpop.permute.xlu2 %1291 }
 0xa93   : > { %v1294_v36 = vadd.f32 %v1292_v23, %v1283_v22 }
 0xa9a   : > { %v1305_v7 = vpop.permute.xlu2 %1304 }
 0xa9b   : > { %v1307_v21 = vadd.f32 %v1305_v7, %v1294_v36 }
 0xa9d   : > { %1314 = vrot.lane.b32.xlu1 %v1307_v21, %s1756_s12 }
 0xaa2   : > { %v1189_v51 = vpop.permute.xlu2 %1188 }
 0xaa3   : > { %v1191_v52 = vmul.f32 %v2241_v13, %v1189_v51  ;;  %v1567_v13 = vld [vmem:[%s2370_s9 + $0x40] sm:$0xff] }
 0xaa4   : > { %1438 = vmatpush.msrb.mxu3 %v1567_v13 }
 0xaa9   : > { %v1175_v38 = vpop.permute.xlu1 %1174 }
 0xaaa   : > { %v1177_v9 = vmul.f32 %v2247_v27, %v1175_v38  ;;  %v1562_v27 = vld [vmem:[%s2370_s9 + $0x20] sm:$0xff] }
 0xaab   : > { %1333 = vmatpush.msra.mxu2 %v1562_v27 }
 0xab1   : > { %v1180_v41 = vpop.permute.xlu1 %1179 }
 0xab2   : > { %v1182_v40 = vmul.f32 %v1180_v41, %v1177_v9 }
 0xab4   : > { %1184 = vrot.lane.b32.xlu0 %v1182_v40, %s1757_s14  ;;  %s1759_s14 = smov (%p38_p0), [#allocation2]  }
 0xab5   :  { %s1453_s17 = sshll.u32 (%p38_p0), %s1759_s14, 4  ;;  %s1454_s17 = int_to_ptr.vmem [resolvable:$true] %s1453_s17 }
 0xabf   : > { %v1400_v45 = vpop.permute.xlu0 %1399 }
 0xac0   : > { %v1402_v47 = vadd.f32 %v1400_v45, %v1388_v46 }
 0xac7   : > { %v1410_v48 = vpop.permute.xlu0 %1409 }
 0xac8   : > { %v1412_v49 = vadd.f32 %v1410_v48, %v1402_v47 }
 0xaca   : > { %1419 = vrot.lane.b32.xlu2 %v1412_v49, %s1758_s15 }
 0xacf   : > { %v1194_v53 = vpop.permute.xlu0 %1193 }
 0xad0   : > { %v1196_v26 = vmul.f32 %v1194_v53, %v1191_v52 }
 0xad2   : > { %1198 = vrot.lane.b32.xlu1 %v1196_v26, %s1758_s15 }
 0xb0f   : > { %v1315_v62 = vpop.permute.xlu1 %1314 }
 0xb10   : > { %1566 = vmatmul.msk.f32.vlgmr.msra.gmra.mxu2 %vm96_vm1, %v1315_v62 }
 0xb24   : > { %v1420_v63 = vpop.permute.xlu2 %1419 }
 0xb25   : > { %1571 = vmatmul.msk.f32.vlgmr.msrb.gmra.mxu3 %vm96_vm1, %v1420_v63 }
 0xb26   : > { %v1185_v6 = vpop.permute.xlu0 %1184 }
 0xb27   : > { %v1187_v10 = vadd.f32 %v1185_v6, %v1172_v8 }
 0xb44   : > { %v1199_v11 = vpop.permute.xlu1 %1198 }
 0xb45   : > { %v1201_v12 = vadd.f32 %v1199_v11, %v1187_v10 }
 0xb47   : > { %1561 = vmatmul.msk.f32.vlgmr.msra.gmra.mxu1 %vm96_vm1, %v1201_v12  ;;  %vm1443_vm1 = vcmask (%p38_p0), 254976  }
 0xb93   : > { %v1335_v14 = vpop.f32.mrf.mxu2  }
 0xb94   : > { %v2373_v1 = vmov %v1335_v14  ;;  %1446 = vst.msk [vmem:[#allocation2 + $0x2] sm:$0x3] (%p38_p0), %vm1443_vm1, %v1335_v14 }
 0xba8   : > { %v1440_v15 = vpop.f32.mrf.mxu3  }
 0xba9   : > { %v2372_v0 = vmov %v1440_v15  ;;  %1448 = vst.msk [vmem:[#allocation2 + $0x4] sm:$0x3] (%p38_p0), %vm1443_vm1, %v1440_v15 }
 0xbc1   :  { %40 = sbr.rel (!%p38_p0) target bundleno = 2 (0x2), region = 76 }
 0xbc4   : > { %v1226_v16 = vpop.f32.mrf.mxu1  }
 0xbc5   : > { %v2374_v2 = vmov %v1226_v16  ;;  %1444 = vst.msk [vmem:[#allocation2] sm:$0x3] (%p38_p0), %vm1443_vm1, %v1226_v16 }
 0xbc6   :  { %1461 = dma.vmem_to_hbm [thread:$0]  %s1454_s17, 96, %s1456_s16, [#allocation3], %s1760_s18, %s1760_s18, %s1761_s19  }
 0xbc7   :  { %1730 = dma.done.wait [#allocation3], 96  }
 0xbc8   :  { %1731 = vsyncadd [#allocation3], 4294967200 }
 0xbc9   :  { %1466 = vsyncpa [#allocation3], 1 }

// kernel: tpu_custom_call.1
= control target key start
LH: loop header
LB: loop body
LE: loop exit
PB: predicated region body
PF: predicated region fallthrough
CT: control target
= control target key end

     0   :  { %15 = vsyncpa [#allocation3], 0  ;;  %v1817_v0 = vmov 0.0   ;;  %v1819_v1 = vmov 0.0   ;;  %v1821_v2 = vmov 0.0   ;;  %v1823_v3 = vmov 0.0   ;;  %s2361_s0 = inlined_call_operand.vmem [shape: f32[2,8,32], index: 0, kind: input, shape index: {}]   ;;  %s2362_s1 = inlined_call_operand.vmem [shape: f32[2,64], index: 1, kind: input, shape index: {}]   ;;  %s2363_s2 = inlined_call_operand.vmem [shape: f32[2,16,32], index: 2, kind: input, shape index: {}]   ;;  %s2364_s3 = inlined_call_operand.vmem [shape: f32[4,64,32], index: 3, kind: input, shape index: {}]   ;;  %s2365_s4 = inlined_call_operand.vmem [shape: f32[64,32], index: 4, kind: input, shape index: {}]   ;;  %s2366_s5 = inlined_call_operand.vmem [shape: f32[3,32,32], index: 5, kind: input, shape index: {}]   ;;  %s2367_s6 = inlined_call_operand.vmem [shape: f32[32,192], index: 6, kind: input, shape index: {}]   ;;  %s2368_s7 = inlined_call_operand.vmem [shape: f32[3,64,32], index: 7, kind: input, shape index: {}]   ;;  %s2369_s8 = inlined_call_operand.vmem [shape: f32[32,288], index: 8, kind: input, shape index: {}]   ;;  %s2370_s9 = inlined_call_operand.vmem [shape: f32[3,32,32], index: 9, kind: input, shape index: {}]   ;;  %s2371_s10 = inlined_call_operand.hbm [shape: f32[3,2,32], index: 10, kind: output, shape index: {}]  }
   0x1   :  { %v1825_v4 = vmov 0.0   ;;  %s1827_s13 = smov 0  }
   0x2 LB: > { %v91_v5 = vld [vmem:[%s2365_s4 + $0x18] sm:$0xff]  ;;  %v90_v6 = vld [vmem:[%s2365_s4 + $0x10] sm:$0xff]  ;;  %s1489_s20 = sshll.u32 %s1754_s13, 6  ;;  %v89_v8 = vld [vmem:[%s2365_s4 + $0x8] sm:$0xff]  ;;  %v122_v9 = vrot.slane %v1746_v3, 7  ;;  %vm123_vm0 = vcmask 1041409   ;;  %s1754_s13 = sphi %s1827_s13, %s41_s13   ;;  %v1750_v4 = vphi %v1825_v4, %v1934_v4   ;;  %v1746_v3 = vphi %v1823_v3, %v1931_v3   ;;  %v1742_v2 = vphi %v1821_v2, %v2374_v2   ;;  %v1738_v1 = vphi %v1819_v1, %v2373_v1   ;;  %v1734_v0 = vphi %v1817_v0, %v2372_v0  }
   0x3   : > { %139 = vmatpush.msra.mxu2 %v91_v5  ;;  %v95_v7 = vld [vmem:[%s2365_s4 + $0x38] sm:$0xff]  ;;  %v94_v10 = vld [vmem:[%s2365_s4 + $0x30] sm:$0xff]  ;;  %s55_s27 = scalar_lea.vmem %s2364_s3, %s1489_s20  ;;  %v93_v11 = vld [vmem:[%s2365_s4 + $0x28] sm:$0xff]  ;;  %vm96_vm1 = vcmask 261120   ;;  %vm64_vm2 = vcmask 523264   ;;  %vm199_vm3 = vcmask 57344  }
   0x4   : > { %112 = vmatpush.msra.mxu1 %v95_v7  ;;  %v63_v12 = vld [vmem:[%s55_s27 + $0x38] sm:$0xff]  ;;  %v62_v13 = vld [vmem:[%s55_s27 + $0x30] sm:$0xff]  ;;  %v88_v14 = vld [vmem:[%s2365_s4] sm:$0xff]  ;;  %v124_v15 = vsel %vm123_vm0, %v122_v9, %v1750_v4  ;;  %vm248_vm8 = vcmask 64512   ;;  %s1756_s12 = smov 32   ;;  %s1757_s14 = smov 96  }
   0x5   : > { %140 = vmatpush.msra.mxu2 %v90_v6  ;;  %76 = vmatpush.msra.mxu0 %v63_v12  ;;  %v61_v16 = vld [vmem:[%s55_s27 + $0x28] sm:$0xff]  ;;  %v60_v17 = vld [vmem:[%s55_s27 + $0x20] sm:$0xff]  ;;  %v59_v18 = vld [vmem:[%s55_s27 + $0x18] sm:$0xff]  ;;  %s1758_s15 = smov 64   ;;  %vm440_vm13 = vcmask 122880   ;;  %s41_s13 = sadd.s32 1, %s1754_s13  }
   0x6   : > { %113 = vmatpush.msra.mxu1 %v94_v10  ;;  %v58_v19 = vld [vmem:[%s55_s27 + $0x10] sm:$0xff]  ;;  %v57_v20 = vld [vmem:[%s55_s27 + $0x8] sm:$0xff]  ;;  %v56_v21 = vld [vmem:[%s55_s27] sm:$0xff]  ;;  %p38_p0 = scmp.ge.s32.totalorder %s41_s13, 4  }
   0x7   : > { %141 = vmatpush.msra.mxu2 %v89_v8  ;;  %77 = vmatpush.msra.mxu0 %v62_v13  ;;  %v53_v22 = vld [vmem:[%s2362_s1] sm:$0x3]  ;;  %v48_v26 = vld [vmem:[%s2361_s0 + $0x8] sm:$0xff]  ;;  %v301_v45 = vld [vmem:[%s2367_s6 + $0x30] sm:$0xff]  ;;  %s1455_s16 = sshll.u32 (%p38_p0), %s2371_s10, 4  ;;  %s1760_s18 = smov (%p38_p0), 32   ;;  %s1456_s16 = int_to_ptr.hbm [resolvable:$true] %s1455_s16 }
   0x8   : > { %114 = vmatpush.msra.mxu1 %v93_v11  ;;  %v92_v23 = vld [vmem:[%s2365_s4 + $0x20] sm:$0xff]  ;;  %v302_v46 = vld [vmem:[%s2367_s6 + $0x38] sm:$0xff]  ;;  %v300_v48 = vld [vmem:[%s2367_s6 + $0x28] sm:$0xff]  ;;  %s1761_s19 = smov (%p38_p0), 2  }
   0x9   : > { %142 = vmatpush.msra.mxu2 %v88_v14  ;;  %78 = vmatpush.msra.mxu0 %v61_v16  ;;  %v47_v25 = vld [vmem:[%s2361_s0] sm:$0xff]  ;;  %v297_v12 = vld [vmem:[%s2367_s6 + $0x10] sm:$0xff]  ;;  %v298_v13 = vld [vmem:[%s2367_s6 + $0x18] sm:$0xff] }
   0xa   : > { %1492 = vmatmul.msk.f32.vlgmr.msra.gmra.mxu2 %vm96_vm1, %v124_v15  ;;  %115 = vmatpush.msra.mxu1 %v92_v23  ;;  %v299_v47 = vld [vmem:[%s2367_s6 + $0x20] sm:$0xff]  ;;  %v296_v15 = vld [vmem:[%s2367_s6 + $0x8] sm:$0xff]  ;;  %v352_v16 = vld [vmem:[%s2366_s5 + $0x18] sm:$0xff] }
   0xb   : > { %79 = vmatpush.msra.mxu0 %v60_v17  ;;  %1493 = vmatpush.xpose.msk.msra.mxu3 %vm96_vm1, %v47_v25  ;;  %v295_v14 = vld [vmem:[%s2367_s6] sm:$0xff]  ;;  %v351_v17 = vld [vmem:[%s2366_s5 + $0x10] sm:$0xff]  ;;  %v1952_v23 = vld [vmem:[%s2363_s2 + $0x18] sm:$0xff] }
   0xc   : > { %267 = vmatpush.msrb.mxu1 %v47_v25  ;;  %290 = vmatpush.msrb.mxu2 %v48_v26 }
   0xd   : > { %80 = vmatpush.msra.mxu0 %v59_v18  ;;  %v350_v18 = vld [vmem:[%s2366_s5 + $0x8] sm:$0xff] }
   0xf   : > { %81 = vmatpush.msra.mxu0 %v58_v19  ;;  %1495 = vmatpush.xpose.msk.msrb.mxu3 %vm96_vm1, %v48_v26  ;;  %v349_v19 = vld [vmem:[%s2366_s5] sm:$0xff]  ;;  %v1976_v26 = vld [vmem:[%s2363_s2 + $0x10] sm:$0xff] }
  0x11   : > { %82 = vmatpush.msra.mxu0 %v57_v20 }
  0x13   : > { %83 = vmatpush.msra.mxu0 %v56_v21 }
  0x14   : > { %1490 = vmatmul.msk.f32.vlgmr.msra.gmra.mxu0 %vm64_vm2, %v53_v22  ;;  %v1947_v22 = vld [vmem:[%s2363_s2 + $0x8] sm:$0xff] }
  0x15   : > { %341 = vmatpush.msrb.mxu0 %v302_v46  ;;  %1502 = vmatpush.xpose.msk.msra.mxu2 %vm96_vm1, %v1947_v22 }
  0x17   : > { %342 = vmatpush.msrb.mxu0 %v300_v48 }
  0x19   : > { %343 = vmatpush.msrb.mxu0 %v298_v13 }
  0x1b   : > { %344 = vmatpush.msrb.mxu0 %v296_v15 }
  0x1d   : > { %507 = vmatpush.msra.mxu0 %v1947_v22 }
  0x8d   : > { %v144_v27 = vpop.f32.mrf.mxu2 }
  0x91   : > { %v85_v24 = vpop.f32.mrf.mxu0 }
  0x92   : > { %1491 = vmatmul.msk.f32.vlgmr.msra.gmra.mxu1 %vm96_vm1, %v85_v24  ;;  %v1961_v24 = vld [vmem:[%s2363_s2] sm:$0xff] }
  0x93   : > { %368 = vmatpush.msra.mxu1 %v352_v16  ;;  %508 = vmatpush.msra.mxu0 %v1961_v24 }
  0x94   : > { %1503 = vmatpush.xpose.msk.msra.mxu2 %vm96_vm1, %v1961_v24 }
  0x95   : > { %369 = vmatpush.msra.mxu1 %v351_v17 }
  0x97   : > { %370 = vmatpush.msra.mxu1 %v350_v18 }
  0x99   : > { %371 = vmatpush.msra.mxu1 %v349_v19 }
 0x10f   : > { %v117_v28 = vpop.f32.mrf.mxu1 }
 0x110   : > { %v145_v29 = vadd.f32 %v144_v27, %v117_v28  ;;  %v1513_v27 = vld [vmem:[%s2366_s5 + $0x38] sm:$0xff]  ;;  %v1512_v28 = vld [vmem:[%s2366_s5 + $0x30] sm:$0xff] }
 0x112   : > { %1494 = vmatmul.msk.f32.vlgmr.msra.gmra.mxu3 %vm96_vm1, %v145_v29  ;;  %v148_v30 = vrot.slane %v145_v29, 1  ;;  %v1511_v29 = vld [vmem:[%s2366_s5 + $0x28] sm:$0xff] }
 0x113   : > { %321 = vmatpush.msra.mxu3 %v301_v45 }
 0x115   : > { %322 = vmatpush.msra.mxu3 %v299_v47 }
 0x117   : > { %323 = vmatpush.msra.mxu3 %v297_v12 }
 0x119   : > { %324 = vmatpush.msra.mxu3 %v295_v14 }
 0x11a   : > { %1496 = vmatmul.msk.f32.vlgmr.msrb.gmra.mxu3 %vm96_vm1, %v148_v30  ;;  %v1510_v30 = vld [vmem:[%s2366_s5 + $0x20] sm:$0xff] }
 0x11b   : > { %1505 = vmatpush.xpose.msk.msrb.mxu3 %vm96_vm1, %v1952_v23 }
 0x11f   : > { %1506 = vmatpush.xpose.msk.msrb.mxu3 %vm96_vm1, %v1976_v26 }
 0x195   : > { %v171_v31 = vpop.f32.mrf.mxu3 }
 0x196   : > { %v200_v34 = vsel %vm199_vm3, %v171_v31, -inf }
 0x19d   : > { %v196_v32 = vpop.f32.mrf.mxu3 }
 0x19e   : > { %v203_v33 = vsel %vm199_vm3, %v196_v32, -inf }
 0x19f   : > { %204 = vmax.xlane.f32.xlu0 %v203_v33 }
 0x1a7   : > { %201 = vmax.xlane.f32.xlu0 %v200_v34 }
 0x212   : > { %v205_v35 = vpop.xlane.xlu0 %204 }
 0x213   : > { %v207_v36 = vsub.f32 %v196_v32, %v205_v35 }
 0x215   : > { %v210_v37 = vmul.f32 1.442695, %v207_v36  ;;  %v1526_v36 = vld [vmem:[%s2366_s5 + $0x58] sm:$0xff] }
 0x217   : > { %1626 = vpow2.f32 %v210_v37  ;;  %v1525_v37 = vld [vmem:[%s2366_s5 + $0x50] sm:$0xff] }
 0x21a   : > { %v202_v38 = vpop.xlane.xlu0 %201 }
 0x21b   : > { %v206_v39 = vsub.f32 %v171_v31, %v202_v38  ;;  %v1524_v38 = vld [vmem:[%s2366_s5 + $0x48] sm:$0xff] }
 0x21d   : > { %v1627_v40 = vpop.eup %1626  ;;  %v208_v41 = vmul.f32 1.442695, %v206_v39  ;;  %v1523_v39 = vld [vmem:[%s2366_s5 + $0x40] sm:$0xff] }
 0x21e   : > { %v215_v42 = vsel %vm199_vm3, %v1627_v40, 0.0 }
 0x21f   : > { %1628 = vpow2.f32 %v208_v41  ;;  %216 = vadd.xlane.f32.xlu1 %v215_v42 }
 0x225   : > { %v1629_v43 = vpop.eup %1628 }
 0x226   : > { %v212_v44 = vsel %vm199_vm3, %v1629_v43, 0.0 }
 0x227   : > { %213 = vadd.xlane.f32.xlu1 %v212_v44 }
 0x292   : > { %v217_v49 = vpop.xlane.xlu1 %216 }
 0x293   : > { %1630 = vrcp.f32 %v217_v49  ;;  %v243_v54 = vand.u32 2147483648, %v217_v49  ;;  %v241_v56 = vand.u32 2147483647, %v217_v49  ;;  %vm237_vm5 = vweird.f32 %v217_v49 }
 0x295   : > { %v244_v59 = vor.u32 1.1754944e-38, %v243_v54  ;;  %vm242_vm7 = vcmp.eq.f32.partialorder %v241_v56, 8.507059e+37 }
 0x299   : > { %v1631_v50 = vpop.eup %1630 }
 0x29a   : > { %v233_v51 = vmul.f32 %v1631_v50, %v217_v49  ;;  %v214_v52 = vpop.xlane.xlu1 %213  ;;  %vm238_vm4 = vweird.f32 %v1631_v50 }
 0x29b   : > { %1632 = vrcp.f32 %v214_v52  ;;  %vm239_vm6 = vmor %vm237_vm5, %vm238_vm4  ;;  %v229_v4 = vand.u32 2147483648, %v214_v52  ;;  %v227_v6 = vand.u32 2147483647, %v214_v52  ;;  %vm223_vm10 = vweird.f32 %v214_v52 }
 0x29c   : > { %v234_v53 = vsub.f32 1.0, %v233_v51  ;;  %vm489_vm4 = vcmask 130048  }
 0x29d   : > { %v230_v8 = vor.u32 1.1754944e-38, %v229_v4  ;;  %vm228_vm12 = vcmp.eq.f32.partialorder %v227_v6, 8.507059e+37 }
 0x29e   : > { %v235_v55 = vmul.f32 %v1631_v50, %v234_v53 }
 0x2a0   : > { %v236_v57 = vadd.f32 %v1631_v50, %v235_v55 }
 0x2a1   : > { %v1633_v58 = vpop.eup %1632 }
 0x2a2   : > { %v219_v60 = vmul.f32 %v1633_v58, %v214_v52  ;;  %v240_v61 = vsel %vm239_vm6, %v1631_v50, %v236_v57  ;;  %vm224_vm9 = vweird.f32 %v1633_v58 }
 0x2a3   : > { %v245_v62 = vsel %vm242_vm7, %v244_v59, %v240_v61  ;;  %vm225_vm11 = vmor %vm223_vm10, %vm224_vm9 }
 0x2a4   : > { %v220_v63 = vsub.f32 1.0, %v219_v60  ;;  %v247_v3 = vmul.f32 %v1627_v40, %v245_v62 }
 0x2a6   : > { %v221_v5 = vmul.f32 %v1633_v58, %v220_v63  ;;  %1498 = vmatmul.msk.f32.vlgmr.msrb.gmra.mxu2 %vm248_vm8, %v247_v3 }
 0x2a7   : > { %556 = vmatpush.msrb.mxu2 %v1513_v27 }
 0x2a8   : > { %v222_v7 = vadd.f32 %v1633_v58, %v221_v5 }
 0x2a9   : > { %557 = vmatpush.msrb.mxu2 %v1512_v28 }
 0x2aa   : > { %v226_v9 = vsel %vm225_vm11, %v1633_v58, %v222_v7 }
 0x2ab   : > { %v231_v10 = vsel %vm228_vm12, %v230_v8, %v226_v9  ;;  %558 = vmatpush.msrb.mxu2 %v1511_v29 }
 0x2ac   : > { %v246_v11 = vmul.f32 %v1629_v43, %v231_v10 }
 0x2ad   : > { %559 = vmatpush.msrb.mxu2 %v1510_v30 }
 0x2ae   : > { %1497 = vmatmul.msk.f32.vlgmr.msrb.gmra.mxu1 %vm248_vm8, %v246_v11 }
 0x2af   : > { %530 = vmatpush.msrb.mxu1 %v1952_v23 }
 0x2b1   : > { %531 = vmatpush.msrb.mxu1 %v1976_v26 }
 0x2b6   : > { %1501 = vmatmul.msk.f32.vlgmr.msra.gmra.mxu1 %vm96_vm1, %v1742_v2 }
 0x2b7   : > { %683 = vmatpush.msra.mxu1 %v1947_v22 }
 0x2b9   : > { %684 = vmatpush.msra.mxu1 %v1961_v24 }
 0x329   : > { %v1931_v3 = vpop.f32.mrf.mxu2  }
 0x32a   : > { %v305_v20 = vrot.slane %v1931_v3, 7 }
 0x32b   : > { %v1934_v4 = vpop.f32.mrf.mxu1  }
 0x32c   : > { %v1938_v21 = vsel %vm123_vm0, %v305_v20, %v1934_v4 }
 0x32d   : > { %1499 = vmatmul.msk.f32.vlgmr.msra.gmra.mxu3 %vm96_vm1, %v1938_v21  ;;  %1500 = vmatmul.msk.f32.vlgmr.msrb.gmra.mxu0 %vm96_vm1, %v1938_v21 }
 0x32e   : > { %1518 = vmatpush.xpose.msk.msrb.mxu0 %vm96_vm1, %v1952_v23  ;;  %1515 = vmatpush.xpose.msk.msra.mxu3 %vm96_vm1, %v1947_v22 }
 0x332   : > { %1519 = vmatpush.xpose.msk.msrb.mxu0 %vm96_vm1, %v1976_v26  ;;  %1516 = vmatpush.xpose.msk.msra.mxu3 %vm96_vm1, %v1961_v24 }
 0x333   : > { %v373_v31 = vpop.f32.mrf.mxu1 }
 0x3b0   : > { %v326_v25 = vpop.f32.mrf.mxu3 }
 0x3b1   : > { %568 = vrot.lane.b32.xlu0 %v326_v25, %s1756_s12  ;;  %378 = vrot.lane.b32.xlu2 %v326_v25, %s1757_s14  ;;  %v376_v32 = vmul.f32 %v373_v31, %v326_v25 }
 0x3b9   : > { %564 = vrot.lane.b32.xlu2 %v326_v25, %s1758_s15 }
 0x40b   : > { %v379_v33 = vpop.permute.xlu2 %378 }
 0x40c   : > { %v381_v34 = vadd.f32 %v379_v33, %v376_v32 }
 0x40e   : > { %v383_v35 = vrot.slane %v381_v34, 1  ;;  %1504 = vmatmul.msk.f32.vlgmr.msra.gmra.mxu2 %vm96_vm1, %v381_v34 }
 0x40f   : > { %706 = vmatpush.msra.mxu2 %v1952_v23 }
 0x410   : > { %1507 = vmatmul.msk.f32.vlgmr.msrb.gmra.mxu3 %vm96_vm1, %v383_v35 }
 0x411   : > { %707 = vmatpush.msra.mxu2 %v1976_v26  ;;  %732 = vmatpush.msrb.mxu3 %v1526_v36  ;;  %v346_v36 = vpop.f32.mrf.mxu0 }
 0x413   : > { %733 = vmatpush.msrb.mxu3 %v1525_v37  ;;  %v565_v43 = vpop.permute.xlu2 %564  ;;  %v892_v37 = vld [vmem:[%s2368_s7 + $0x30] sm:$0xff] }
 0x415   : > { %734 = vmatpush.msrb.mxu3 %v1524_v38  ;;  %v891_v38 = vld [vmem:[%s2368_s7 + $0x28] sm:$0xff] }
 0x416   : > { %1514 = vmatmul.msk.f32.vlgmr.msrb.gmra.mxu2 %vm96_vm1, %v1738_v1 }
 0x417   : > { %857 = vmatpush.msrb.mxu2 %v1947_v22  ;;  %735 = vmatpush.msrb.mxu3 %v1523_v39 }
 0x419   : > { %858 = vmatpush.msrb.mxu2 %v1961_v24 }
 0x423   : > { %v569_v47 = vpop.permute.xlu0 %568 }
 0x491   : > { %v409_v40 = vpop.f32.mrf.mxu2 }
 0x492   : > { %v441_v41 = vsel %vm440_vm13, %v409_v40, -inf }
 0x493   : > { %442 = vmax.xlane.f32.xlu1 %v441_v41  ;;  %v437_v42 = vpop.f32.mrf.mxu3 }
 0x494   : > { %v444_v46 = vsel %vm440_vm13, %v437_v42, -inf }
 0x499   : > { %v561_v44 = vpop.f32.mrf.mxu2 }
 0x49a   : > { %v567_v45 = vmul.f32 %v565_v43, %v561_v44 }
 0x49b   : > { %445 = vmax.xlane.f32.xlu1 %v444_v46 }
 0x49c   : > { %v2023_v48 = vadd.f32 %v569_v47, %v567_v45 }
 0x49e   : > { %1517 = vmatmul.msk.f32.vlgmr.msra.gmra.mxu3 %vm96_vm1, %v2023_v48  ;;  %v573_v33 = vrot.slane %v2023_v48, 1 }
 0x49f   : > { %880 = vmatpush.msra.mxu3 %v1952_v23 }
 0x4a1   : > { %881 = vmatpush.msra.mxu3 %v1976_v26 }
 0x4a6   : > { %1527 = vmatmul.msk.f32.vlgmr.msrb.gmra.mxu3 %vm96_vm1, %v1734_v0 }
 0x506   : > { %v443_v49 = vpop.xlane.xlu1 %442 }
 0x507   : > { %v447_v50 = vsub.f32 %v409_v40, %v443_v49 }
 0x509   : > { %v449_v51 = vmul.f32 1.442695, %v447_v50 }
 0x50b   : > { %1634 = vpow2.f32 %v449_v51 }
 0x50e   : > { %v446_v52 = vpop.xlane.xlu1 %445 }
 0x50f   : > { %v448_v53 = vsub.f32 %v437_v42, %v446_v52 }
 0x511   : > { %v1635_v54 = vpop.eup %1634  ;;  %v451_v55 = vmul.f32 1.442695, %v448_v53  ;;  %v889_v53 = vld [vmem:[%s2368_s7 + $0x18] sm:$0xff] }
 0x512   : > { %v453_v56 = vsel %vm440_vm13, %v1635_v54, 0.0 }
 0x513   : > { %1636 = vpow2.f32 %v451_v55  ;;  %454 = vadd.xlane.f32.xlu2 %v453_v56  ;;  %v888_v55 = vld [vmem:[%s2368_s7 + $0x10] sm:$0xff]  ;;  %v887_v56 = vld [vmem:[%s2368_s7 + $0x8] sm:$0xff] }
 0x519   : > { %v1637_v57 = vpop.eup %1636 }
 0x51a   : > { %v456_v58 = vsel %vm440_vm13, %v1637_v57, 0.0 }
 0x51b   : > { %457 = vadd.xlane.f32.xlu0 %v456_v58 }
 0x521   : > { %v593_v59 = vpop.f32.mrf.mxu3 }
 0x522   : > { %v618_v60 = vsel %vm440_vm13, %v593_v59, -inf }
 0x523   : > { %619 = vmax.xlane.f32.xlu1 %v618_v60 }
 0x586   : > { %v455_v61 = vpop.xlane.xlu2 %454 }
 0x587   : > { %1638 = vrcp.f32 %v455_v61  ;;  %v470_v7 = vand.u32 2147483648, %v455_v61  ;;  %v468_v9 = vand.u32 2147483647, %v455_v61  ;;  %vm464_vm15 = vweird.f32 %v455_v61 }
 0x589   : > { %v471_v12 = vor.u32 1.1754944e-38, %v470_v7  ;;  %vm469_vm3 = vcmp.eq.f32.partialorder %v468_v9, 8.507059e+37  ;;  %v1552_v7 = vld [vmem:[%s2368_s7 + $0xa0] sm:$0xff]  ;;  %v1061_v9 = vld [vmem:[%s2369_s8 + $0x58] sm:$0xff] }
 0x58d   : > { %v1639_v62 = vpop.eup %1638 }
 0x58e   : > { %v460_v63 = vmul.f32 %v1639_v62, %v455_v61  ;;  %v458_v5 = vpop.xlane.xlu0 %457  ;;  %vm465_vm14 = vweird.f32 %v1639_v62  ;;  %v1555_v61 = vld [vmem:[%s2368_s7 + $0xb8] sm:$0xff] }
 0x58f   : > { %1640 = vrcp.f32 %v458_v5  ;;  %vm466_vm2 = vmor %vm464_vm15, %vm465_vm14  ;;  %v484_v20 = vand.u32 2147483648, %v458_v5  ;;  %v482_v28 = vand.u32 2147483647, %v458_v5  ;;  %vm478_vm6 = vweird.f32 %v458_v5 }
 0x590   : > { %v461_v6 = vsub.f32 1.0, %v460_v63  ;;  %v1554_v63 = vld [vmem:[%s2368_s7 + $0xb0] sm:$0xff] }
 0x591   : > { %v485_v30 = vor.u32 1.1754944e-38, %v484_v20  ;;  %vm483_vm8 = vcmp.eq.f32.partialorder %v482_v28, 8.507059e+37 }
 0x592   : > { %v462_v8 = vmul.f32 %v1639_v62, %v461_v6  ;;  %v1553_v6 = vld [vmem:[%s2368_s7 + $0xa8] sm:$0xff] }
 0x594   : > { %v463_v10 = vadd.f32 %v1639_v62, %v462_v8 }
 0x595   : > { %v1641_v11 = vpop.eup %1640 }
 0x596   : > { %v467_v13 = vsel %vm466_vm2, %v1639_v62, %v463_v10  ;;  %v474_v14 = vmul.f32 %v1641_v11, %v458_v5  ;;  %v620_v15 = vpop.xlane.xlu1 %619  ;;  %vm479_vm5 = vweird.f32 %v1641_v11  ;;  %v1058_v10 = vld [vmem:[%s2369_s8 + $0x40] sm:$0xff] }
 0x597   : > { %v472_v16 = vsel %vm469_vm3, %v471_v12, %v467_v13  ;;  %v624_v17 = vsub.f32 %v593_v59, %v620_v15  ;;  %vm480_vm7 = vmor %vm478_vm6, %vm479_vm5  ;;  %v886_v59 = vld [vmem:[%s2368_s7] sm:$0xff]  ;;  %v1055_v12 = vld [vmem:[%s2369_s8 + $0x28] sm:$0xff] }
 0x598   : > { %v475_v18 = vsub.f32 1.0, %v474_v14  ;;  %v487_v19 = vmul.f32 %v1635_v54, %v472_v16  ;;  %v737_v54 = vpop.f32.mrf.mxu3  ;;  %v1052_v13 = vld [vmem:[%s2369_s8 + $0x10] sm:$0xff] }
 0x599   : > { %v626_v25 = vmul.f32 1.442695, %v624_v17 }
 0x59a   : > { %v476_v27 = vmul.f32 %v1641_v11, %v475_v18  ;;  %1508 = vmatmul.msk.f32.vlgmr.msra.gmra.mxu0 %vm489_vm4, %v487_v19 }
 0x59b   : > { %1642 = vpow2.f32 %v626_v25  ;;  %1528 = vmatpush.xpose.msk.msra.mxu0 %vm96_vm1, %v1947_v22 }
 0x59c   : > { %v477_v29 = vadd.f32 %v1641_v11, %v476_v27 }
 0x59e   : > { %v481_v31 = vsel %vm480_vm7, %v1641_v11, %v477_v29 }
 0x59f   : > { %v486_v32 = vsel %vm483_vm8, %v485_v30, %v481_v31  ;;  %1529 = vmatpush.xpose.msk.msra.mxu0 %vm96_vm1, %v1961_v24  ;;  %v893_v24 = vld [vmem:[%s2368_s7 + $0x38] sm:$0xff] }
 0x5a0   : > { %v488_v34 = vmul.f32 %v1637_v57, %v486_v32  ;;  %v740_v57 = vmul.f32 %v737_v54, %v346_v36 }
 0x5a1   : > { %v1643_v35 = vpop.eup %1642 }
 0x5a2   : > { %1509 = vmatmul.msk.f32.vlgmr.msrb.gmra.mxu1 %vm489_vm4, %v488_v34  ;;  %1520 = vmatmul.msk.f32.vlgmr.msrb.gmra.mxu0 %vm96_vm1, %v573_v33  ;;  %v630_v22 = vsel %vm440_vm13, %v1643_v35, 0.0 }
 0x5a3   : > { %631 = vadd.xlane.f32.xlu1 %v630_v22  ;;  %1531 = vmatpush.xpose.msk.msrb.mxu1 %vm96_vm1, %v1952_v23  ;;  %v890_v23 = vld [vmem:[%s2368_s7 + $0x20] sm:$0xff] }
 0x5a4   : > { %906 = vmatpush.msrb.mxu0 %v893_v24 }
 0x5a6   : > { %907 = vmatpush.msrb.mxu0 %v892_v37 }
 0x5a7   : > { %1532 = vmatpush.xpose.msk.msrb.mxu1 %vm96_vm1, %v1976_v26 }
 0x5a8   : > { %908 = vmatpush.msrb.mxu0 %v891_v38 }
 0x5aa   : > { %909 = vmatpush.msrb.mxu0 %v890_v23 }
 0x5bc   : > { %742 = vrot.lane.b32.xlu1 %v346_v36, %s1757_s14 }
 0x616   : > { %v632_v26 = vpop.xlane.xlu1 %631 }
 0x617   : > { %1644 = vrcp.f32 %v632_v26  ;;  %v510_v39 = vpop.f32.mrf.mxu0  ;;  %v647_v45 = vand.u32 2147483648, %v632_v26  ;;  %v645_v47 = vand.u32 2147483647, %v632_v26  ;;  %vm641_vm10 = vweird.f32 %v632_v26 }
 0x619   : > { %v648_v49 = vor.u32 1.1754944e-38, %v647_v45  ;;  %vm646_vm12 = vcmp.eq.f32.partialorder %v645_v47, 8.507059e+37  ;;  %v1545_v45 = vld [vmem:[%s2368_s7 + $0x78] sm:$0xff]  ;;  %v1544_v47 = vld [vmem:[%s2368_s7 + $0x70] sm:$0xff] }
 0x61d   : > { %v1645_v40 = vpop.eup %1644 }
 0x61e   : > { %v637_v41 = vmul.f32 %v1645_v40, %v632_v26  ;;  %vm642_vm9 = vweird.f32 %v1645_v40 }
 0x61f   : > { %v615_v42 = vpop.f32.mrf.mxu0  ;;  %vm643_vm11 = vmor %vm641_vm10, %vm642_vm9  ;;  %v533_v5 = vpop.f32.mrf.mxu1 }
 0x620   : > { %v638_v43 = vsub.f32 1.0, %v637_v41  ;;  %v621_v44 = vsel %vm440_vm13, %v615_v42, -inf  ;;  %v916_v8 = vrot.slane %v533_v5, 7 }
 0x621   : > { %622 = vmax.xlane.f32.xlu2 %v621_v44 }
 0x622   : > { %v639_v46 = vmul.f32 %v1645_v40, %v638_v43  ;;  %v917_v11 = vsel %vm123_vm0, %v916_v8, %v510_v39 }
 0x624   : > { %v640_v48 = vadd.f32 %v1645_v40, %v639_v46  ;;  %v1541_v46 = vld [vmem:[%s2368_s7 + $0x58] sm:$0xff] }
 0x625   : > { %987 = vmatpush.msrb.mxu3 %v1541_v46 }
 0x626   : > { %v644_v50 = vsel %vm643_vm11, %v1645_v40, %v640_v48  ;;  %v1540_v48 = vld [vmem:[%s2368_s7 + $0x50] sm:$0xff] }
 0x627   : > { %v649_v51 = vsel %vm646_vm12, %v648_v49, %v644_v50  ;;  %v1543_v49 = vld [vmem:[%s2368_s7 + $0x68] sm:$0xff]  ;;  %988 = vmatpush.msrb.mxu3 %v1540_v48 }
 0x628   : > { %v664_v52 = vmul.f32 %v1643_v35, %v649_v51  ;;  %v1539_v50 = vld [vmem:[%s2368_s7 + $0x48] sm:$0xff]  ;;  %v1542_v51 = vld [vmem:[%s2368_s7 + $0x60] sm:$0xff] }
 0x629   : > { %989 = vmatpush.msrb.mxu3 %v1539_v50 }
 0x62a   : > { %1521 = vmatmul.msk.f32.vlgmr.msra.gmra.mxu1 %vm489_vm4, %v664_v52  ;;  %v1538_v52 = vld [vmem:[%s2368_s7 + $0x40] sm:$0xff] }
 0x62b   : > { %932 = vmatpush.msra.mxu1 %v889_v53  ;;  %990 = vmatpush.msrb.mxu3 %v1538_v52 }
 0x62d   : > { %933 = vmatpush.msra.mxu1 %v888_v55  ;;  %v1551_v55 = vld [vmem:[%s2368_s7 + $0x98] sm:$0xff] }
 0x62e   : > { %v743_v58 = vpop.permute.xlu1 %742 }
 0x62f   : > { %v745_v60 = vadd.f32 %v743_v58, %v740_v57  ;;  %934 = vmatpush.msra.mxu1 %v887_v56 }
 0x631   : > { %v747_v62 = vrot.slane %v745_v60, 1  ;;  %1530 = vmatmul.msk.f32.vlgmr.msra.gmra.mxu0 %vm96_vm1, %v745_v60  ;;  %935 = vmatpush.msra.mxu1 %v886_v59 }
 0x632   : > { %1016 = vmatpush.msra.mxu0 %v1555_v61 }
 0x633   : > { %1533 = vmatmul.msk.f32.vlgmr.msrb.gmra.mxu1 %vm96_vm1, %v747_v62 }
 0x634   : > { %1017 = vmatpush.msra.mxu0 %v1554_v63  ;;  %1042 = vmatpush.msrb.mxu1 %v1551_v55 }
 0x636   : > { %1018 = vmatpush.msra.mxu0 %v1553_v6 }
 0x638   : > { %1019 = vmatpush.msra.mxu0 %v1552_v7 }
 0x639   : > { %1536 = vmatmul.msk.f32.vlgmr.msrb.gmra.mxu0 %vm96_vm1, %v1742_v2 }
 0x63a   : > { %1114 = vmatpush.msrb.mxu0 %v1061_v9 }
 0x63b   : > { %1537 = vmatmul.msk.f32.vlgmr.msra.gmra.mxu1 %vm96_vm1, %v917_v11 }
 0x63c   : > { %1115 = vmatpush.msrb.mxu0 %v1058_v10 }
 0x63e   : > { %1116 = vmatpush.msrb.mxu0 %v1055_v12 }
 0x640   : > { %1117 = vmatpush.msrb.mxu0 %v1052_v13 }
 0x641   : > { %1556 = vmatmul.msk.f32.vlgmr.msra.gmra.mxu0 %vm96_vm1, %v1734_v0 }
 0x649   : > { %1560 = vmatmul.msk.f32.vlgmr.msrb.gmra.mxu0 %vm96_vm1, %v1938_v21 }
 0x694   : > { %v623_v2 = vpop.xlane.xlu2 %622 }
 0x695   : > { %v625_v14 = vsub.f32 %v615_v42, %v623_v2 }
 0x697   : > { %v628_v15 = vmul.f32 1.442695, %v625_v14 }
 0x699   : > { %1646 = vpow2.f32 %v628_v15 }
 0x69f   : > { %v1647_v16 = vpop.eup %1646 }
 0x6a0   : > { %v633_v17 = vsel %vm440_vm13, %v1647_v16, 0.0 }
 0x6a1   : > { %634 = vadd.xlane.f32.xlu2 %v633_v17 }
 0x6a7   : > { %v2109_v18 = vpop.f32.mrf.mxu1 }
 0x6ae   : > { %v767_v19 = vpop.f32.mrf.mxu0 }
 0x6af   : > { %v792_v20 = vsel %vm440_vm13, %v767_v19, -inf }
 0x6b0   : > { %793 = vmax.xlane.f32.xlu2 %v792_v20  ;;  %v789_v25 = vpop.f32.mrf.mxu1  ;;  %v1060_v20 = vld [vmem:[%s2369_s8 + $0x50] sm:$0xff] }
 0x6b1   : > { %v795_v0 = vsel %vm440_vm13, %v789_v25, -inf }
 0x6b2   : > { %796 = vmax.xlane.f32.xlu1 %v795_v0 }
 0x714   : > { %v635_v27 = vpop.xlane.xlu2 %634 }
 0x715   : > { %1648 = vrcp.f32 %v635_v27  ;;  %v661_v31 = vand.u32 2147483648, %v635_v27  ;;  %v659_v33 = vand.u32 2147483647, %v635_v27  ;;  %vm655_vm15 = vweird.f32 %v635_v27 }
 0x717   : > { %v662_v35 = vor.u32 1.1754944e-38, %v661_v31  ;;  %vm660_vm3 = vcmp.eq.f32.partialorder %v659_v33, 8.507059e+37 }
 0x71b   : > { %v1649_v28 = vpop.eup %1648 }
 0x71c   : > { %v651_v29 = vmul.f32 %v1649_v28, %v635_v27  ;;  %vm656_vm14 = vweird.f32 %v1649_v28  ;;  %v1057_v27 = vld [vmem:[%s2369_s8 + $0x38] sm:$0xff] }
 0x71d   : > { %vm657_vm2 = vmor %vm655_vm15, %vm656_vm14 }
 0x71e   : > { %v652_v30 = vsub.f32 1.0, %v651_v29  ;;  %v1054_v29 = vld [vmem:[%s2369_s8 + $0x20] sm:$0xff] }
 0x720   : > { %v653_v32 = vmul.f32 %v1649_v28, %v652_v30  ;;  %v1050_v30 = vld [vmem:[%s2369_s8] sm:$0xff] }
 0x722   : > { %v654_v34 = vadd.f32 %v1649_v28, %v653_v32  ;;  %v1051_v32 = vld [vmem:[%s2369_s8 + $0x8] sm:$0xff] }
 0x723   : > { %v794_v22 = vpop.xlane.xlu2 %793 }
 0x724   : > { %v658_v36 = vsel %vm657_vm2, %v1649_v28, %v654_v34  ;;  %v798_v24 = vsub.f32 %v767_v19, %v794_v22  ;;  %v1053_v28 = vld [vmem:[%s2369_s8 + $0x18] sm:$0xff]  ;;  %v1550_v34 = vld [vmem:[%s2368_s7 + $0x90] sm:$0xff] }
 0x725   : > { %v663_v37 = vsel %vm660_vm3, %v662_v35, %v658_v36  ;;  %v797_v38 = vpop.xlane.xlu1 %796  ;;  %1043 = vmatpush.msrb.mxu1 %v1550_v34 }
 0x726   : > { %v800_v23 = vmul.f32 1.442695, %v798_v24  ;;  %v799_v26 = vsub.f32 %v789_v25, %v797_v38  ;;  %v665_v39 = vmul.f32 %v1647_v16, %v663_v37  ;;  %v1059_v16 = vld [vmem:[%s2369_s8 + $0x48] sm:$0xff]  ;;  %v1056_v25 = vld [vmem:[%s2369_s8 + $0x30] sm:$0xff]  ;;  %v2188_v24 = vpop.f32.mrf.mxu0 }
 0x728   : > { %1650 = vpow2.f32 %v800_v23  ;;  %v802_v40 = vmul.f32 1.442695, %v799_v26  ;;  %1522 = vmatmul.msk.f32.vlgmr.msra.gmra.mxu2 %vm489_vm4, %v665_v39 }
 0x729   : > { %961 = vmatpush.msra.mxu2 %v1545_v45 }
 0x72a   : > { %1652 = vpow2.f32 %v802_v40 }
 0x72b   : > { %962 = vmatpush.msra.mxu2 %v1544_v47 }
 0x72d   : > { %963 = vmatpush.msra.mxu2 %v1543_v49 }
 0x72e   : > { %v1651_v41 = vpop.eup %1650  ;;  %v2193_v26 = vpop.f32.mrf.mxu0 }
 0x72f   : > { %v804_v42 = vsel %vm440_vm13, %v1651_v41, 0.0  ;;  %964 = vmatpush.msra.mxu2 %v1542_v51 }
 0x730   : > { %v1653_v43 = vpop.eup %1652  ;;  %805 = vadd.xlane.f32.xlu2 %v804_v42 }
 0x731   : > { %v807_v44 = vsel %vm440_vm13, %v1653_v43, 0.0 }
 0x732   : > { %808 = vadd.xlane.f32.xlu0 %v807_v44 }
 0x7a3   : > { %v806_v53 = vpop.xlane.xlu2 %805 }
 0x7a4   : > { %1654 = vrcp.f32 %v806_v53  ;;  %v821_v61 = vand.u32 2147483648, %v806_v53  ;;  %v819_v63 = vand.u32 2147483647, %v806_v53  ;;  %vm815_vm5 = vweird.f32 %v806_v53 }
 0x7a5   : > { %v809_v54 = vpop.xlane.xlu0 %808 }
 0x7a6   : > { %1656 = vrcp.f32 %v809_v54  ;;  %v835_v6 = vand.u32 2147483648, %v809_v54  ;;  %v833_v9 = vand.u32 2147483647, %v809_v54  ;;  %v822_v10 = vor.u32 1.1754944e-38, %v821_v61 }
 0x7a7   : > { %vm820_vm8 = vcmp.eq.f32.partialorder %v819_v63, 8.507059e+37  ;;  %vm829_vm9 = vweird.f32 %v809_v54 }
 0x7a8   : > { %v836_v2 = vor.u32 1.1754944e-38, %v835_v6  ;;  %vm834_vm11 = vcmp.eq.f32.partialorder %v833_v9, 8.507059e+37 }
 0x7aa   : > { %v1655_v56 = vpop.eup %1654 }
 0x7ab   : > { %v811_v57 = vmul.f32 %v1655_v56, %v806_v53  ;;  %vm816_vm13 = vweird.f32 %v1655_v56  ;;  %v709_v0 = vpop.f32.mrf.mxu2 }
 0x7ac   : > { %v1657_v58 = vpop.eup %1656  ;;  %vm817_vm7 = vmor %vm815_vm5, %vm816_vm13  ;;  %v971_v31 = vrot.slane %v709_v0, 7 }
 0x7ad   : > { %v812_v59 = vsub.f32 1.0, %v811_v57  ;;  %v825_v60 = vmul.f32 %v1657_v58, %v809_v54  ;;  %vm830_vm6 = vweird.f32 %v1657_v58 }
 0x7ae   : > { %vm831_vm10 = vmor %vm829_vm9, %vm830_vm6  ;;  %v972_v33 = vsel %vm123_vm0, %v971_v31, %v2109_v18  ;;  %v1548_v18 = vld [vmem:[%s2368_s7 + $0x80] sm:$0xff] }
 0x7af   : > { %v813_v62 = vmul.f32 %v1655_v56, %v812_v59  ;;  %v826_v5 = vsub.f32 1.0, %v825_v60 }
 0x7b1   : > { %v814_v7 = vadd.f32 %v1655_v56, %v813_v62  ;;  %v827_v8 = vmul.f32 %v1657_v58, %v826_v5 }
 0x7b3   : > { %v818_v11 = vsel %vm817_vm7, %v1655_v56, %v814_v7  ;;  %v828_v12 = vadd.f32 %v1657_v58, %v827_v8 }
 0x7b4   : > { %v823_v13 = vsel %vm820_vm8, %v822_v10, %v818_v11 }
 0x7b5   : > { %v832_v14 = vsel %vm831_vm10, %v1657_v58, %v828_v12  ;;  %v838_v15 = vmul.f32 %v1651_v41, %v823_v13  ;;  %v1119_v41 = vpop.f32.mrf.mxu0 }
 0x7b6   : > { %v837_v17 = vsel %vm834_vm11, %v836_v2, %v832_v14 }
 0x7b7   : > { %1534 = vmatmul.msk.f32.vlgmr.msrb.gmra.mxu2 %vm489_vm4, %v838_v15  ;;  %v839_v19 = vmul.f32 %v1653_v43, %v837_v17 }
 0x7b8   : > { %1074 = vmatpush.msrb.mxu2 %v1059_v16 }
 0x7b9   : > { %1535 = vmatmul.msk.f32.vlgmr.msra.gmra.mxu3 %vm489_vm4, %v839_v19 }
 0x7ba   : > { %1094 = vmatpush.msra.mxu3 %v1060_v20  ;;  %1075 = vmatpush.msrb.mxu2 %v1056_v25 }
 0x7bc   : > { %1095 = vmatpush.msra.mxu3 %v1057_v27  ;;  %1076 = vmatpush.msrb.mxu2 %v1053_v28 }
 0x7be   : > { %1096 = vmatpush.msra.mxu3 %v1054_v29  ;;  %1077 = vmatpush.msrb.mxu2 %v1050_v30 }
 0x7bf   : > { %1546 = vmatmul.msk.f32.vlgmr.msra.gmra.mxu2 %vm96_vm1, %v1738_v1  ;;  %v1549_v1 = vld [vmem:[%s2368_s7 + $0x88] sm:$0xff] }
 0x7c0   : > { %1097 = vmatpush.msra.mxu3 %v1051_v32  ;;  %1044 = vmatpush.msrb.mxu1 %v1549_v1 }
 0x7c1   : > { %1547 = vmatmul.msk.f32.vlgmr.msrb.gmra.mxu3 %vm96_vm1, %v972_v33 }
 0x7c2   : > { %1045 = vmatpush.msrb.mxu1 %v1548_v18 }
 0x7c7   : > { %1558 = vmatmul.msk.f32.vlgmr.msrb.gmra.mxu2 %vm96_vm1, %v1938_v21 }
 0x7c9   : > { %1559 = vmatmul.msk.f32.vlgmr.msra.gmra.mxu3 %vm96_vm1, %v1938_v21 }
 0x83a   : > { %v860_v35 = vpop.f32.mrf.mxu2 }
 0x83c   : > { %v883_v22 = vpop.f32.mrf.mxu3 }
 0x83d   : > { %v1026_v36 = vrot.slane %v883_v22, 7 }
 0x83f   : > { %v1027_v21 = vsel %vm123_vm0, %v1026_v36, %v860_v35  ;;  %v937_v35 = vpop.f32.mrf.mxu1 }
 0x840   : > { %1557 = vmatmul.msk.f32.vlgmr.msrb.gmra.mxu1 %vm96_vm1, %v1027_v21 }
 0x842   : > { %v966_v37 = vpop.f32.mrf.mxu2 }
 0x844   : > { %v992_v38 = vpop.f32.mrf.mxu3 }
 0x845   : > { %v2191_v23 = vadd.f32 %v992_v38, %v966_v37 }
 0x84a   : > { %v2195_v39 = vpop.f32.mrf.mxu2 }
 0x84b   : > { %1123 = vrot.lane.b32.xlu1 %v2195_v39, %s1757_s14 }
 0x84c   : > { %v2199_v40 = vpop.f32.mrf.mxu3 }
 0x84d   : > { %1234 = vrot.lane.b32.xlu2 %v2199_v40, %s1758_s15  ;;  %1230 = vrot.lane.b32.xlu0 %v2199_v40, %s1757_s14 }
 0x855   : > { %1340 = vrot.lane.b32.xlu0 %v1119_v41, %s1758_s15 }
 0x8a7   : > { %v1235_v44 = vpop.permute.xlu2 %1234 }
 0x8bd   : > { %v1124_v52 = vpop.permute.xlu1 %1123 }
 0x8be   : > { %v1126_v54 = vmax.f32 %v2195_v39, %v1124_v52 }
 0x8bf   : > { %v1231_v42 = vpop.permute.xlu0 %1230 }
 0x8c0   : > { %v1233_v43 = vmax.f32 %v2195_v39, %v1231_v42  ;;  %v1338_v46 = vmax.f32 %v2199_v40, %v1231_v42 }
 0x8c2   : > { %v1237_v45 = vmax.f32 %v1233_v43, %v1235_v44 }
 0x8c4   : > { %1242 = vrot.lane.b32.xlu2 %v1237_v45, %s1756_s12  ;;  %v1238_v2 = vsub.f32 %v2195_v39, %v1237_v45 }
 0x8c6   : > { %v1239_v14 = vmul.f32 1.442695, %v1238_v2 }
 0x8c7   : > { %v1341_v47 = vpop.permute.xlu0 %1340 }
 0x8c8   : > { %v1343_v48 = vmax.f32 %v1338_v46, %v1341_v47 }
 0x8ca   : > { %1348 = vrot.lane.b32.xlu0 %v1343_v48, %s1756_s12  ;;  %v1344_v29 = vsub.f32 %v2199_v40, %v1343_v48 }
 0x8cc   : > { %1248 = vrot.lane.b32.xlu2 %v1237_v45, %s1758_s15  ;;  %v1345_v31 = vmul.f32 1.442695, %v1344_v29  ;;  %v1047_v45 = vpop.f32.mrf.mxu1 }
 0x8cd   : > { %v2257_v46 = vadd.f32 %v1047_v45, %v2193_v26 }
 0x8d2   : > { %1354 = vrot.lane.b32.xlu0 %v1343_v48, %s1758_s15 }
 0x8d4   : > { %1127 = vrot.lane.b32.xlu2 %v2195_v39, %s1758_s15 }
 0x91e   : > { %v1243_v49 = vpop.permute.xlu2 %1242 }
 0x91f   : > { %v1245_v51 = vsub.f32 %v2199_v40, %v1243_v49 }
 0x921   : > { %v1246_v55 = vmul.f32 1.442695, %v1245_v51 }
 0x923   : > { %1658 = vpow2.f32 %v1246_v55 }
 0x926   : > { %v1249_v50 = vpop.permute.xlu2 %1248 }
 0x927   : > { %v1251_v53 = vsub.f32 %v2199_v40, %v1249_v50  ;;  %v2264_v50 = vadd.f32 %v937_v35, %v2188_v24 }
 0x929   : > { %v1252_v56 = vmul.f32 1.442695, %v1251_v53  ;;  %v2223_v59 = vpop.eup %1658 }
 0x92b   : > { %1660 = vpow2.f32 %v1252_v56 }
 0x92e   : > { %v1128_v57 = vpop.permute.xlu2 %1127 }
 0x92f   : > { %v2217_v58 = vmax.f32 %v1126_v54, %v1128_v57 }
 0x931   : > { %1141 = vrot.lane.b32.xlu2 %v2217_v58, %s1758_s15  ;;  %1135 = vrot.lane.b32.xlu0 %v2217_v58, %s1756_s12  ;;  %v2225_v60 = vpop.eup %1660  ;;  %v1131_v24 = vsub.f32 %v2195_v39, %v2217_v58 }
 0x939   : > { %1260 = vrot.lane.b32.xlu2 %v2225_v60, %s1758_s15  ;;  %1255 = vrot.lane.b32.xlu0 %v2223_v59, %s1757_s14 }
 0x93c   : > { %v1349_v61 = vpop.permute.xlu0 %1348 }
 0x93d   : > { %v1351_v62 = vsub.f32 %v2199_v40, %v1349_v61  ;;  %v1132_v61 = vmul.f32 1.442695, %v1131_v24  ;;  %v1204_v24 = vld [vmem:[%s2370_s9 + $0x10] sm:$0xff] }
 0x93f   : > { %v1352_v63 = vmul.f32 1.442695, %v1351_v62 }
 0x941   : > { %1662 = vpow2.f32 %v1352_v63 }
 0x944   : > { %v1355_v5 = vpop.permute.xlu0 %1354 }
 0x945   : > { %v1357_v6 = vsub.f32 %v1119_v41, %v1355_v5 }
 0x947   : > { %v2232_v7 = vpop.eup %1662  ;;  %v1358_v8 = vmul.f32 1.442695, %v1357_v6 }
 0x948   : > { %1361 = vrot.lane.b32.xlu1 %v2232_v7, %s1757_s14 }
 0x949   : > { %1664 = vpow2.f32 %v1358_v8 }
 0x94f   : > { %v2236_v9 = vpop.eup %1664 }
 0x950   : > { %1366 = vrot.lane.b32.xlu0 %v2236_v9, %s1758_s15 }
 0x98b   : > { %v1142_v10 = vpop.permute.xlu2 %1141 }
 0x98c   : > { %v1144_v11 = vsub.f32 %v2195_v39, %v1142_v10 }
 0x98e   : > { %v1145_v12 = vmul.f32 1.442695, %v1144_v11 }
 0x990   : > { %1666 = vpow2.f32 %v1145_v12 }
 0x991   : > { %1668 = vpow2.f32 %v1239_v14 }
 0x993   : > { %v1261_v0 = vpop.permute.xlu2 %1260 }
 0x996   : > { %v2241_v13 = vpop.eup %1666 }
 0x997   : > { %1153 = vrot.lane.b32.xlu2 %v2241_v13, %s1758_s15  ;;  %v1669_v19 = vpop.eup %1668 }
 0x9a3   : > { %v1136_v15 = vpop.permute.xlu0 %1135 }
 0x9a4   : > { %v1138_v16 = vsub.f32 %v2195_v39, %v1136_v15 }
 0x9a6   : > { %v1139_v17 = vmul.f32 1.442695, %v1138_v16 }
 0x9a8   : > { %1670 = vpow2.f32 %v1139_v17 }
 0x9ab   : > { %v1256_v20 = vpop.permute.xlu0 %1255 }
 0x9ac   : > { %v1258_v25 = vadd.f32 %v1669_v19, %v1256_v20 }
 0x9ae   : > { %v2247_v27 = vpop.eup %1670  ;;  %v1263_v28 = vadd.f32 %v1261_v0, %v1258_v25 }
 0x9af   : > { %1148 = vrot.lane.b32.xlu1 %v2247_v27, %s1757_s14 }
 0x9b0   : > { %1672 = vrcp.f32 %v1263_v28  ;;  %v1275_v34 = vand.u32 2147483648, %v1263_v28  ;;  %v1273_v18 = vand.u32 2147483647, %v1263_v28  ;;  %vm1269_vm4 = vweird.f32 %v1263_v28 }
 0x9b1   : > { %1674 = vpow2.f32 %v1345_v31 }
 0x9b2   : > { %v1276_v21 = vor.u32 1.1754944e-38, %v1275_v34  ;;  %vm1274_vm14 = vcmp.eq.f32.partialorder %v1273_v18, 8.507059e+37 }
 0x9b6   : > { %v1673_v30 = vpop.eup %1672 }
 0x9b7   : > { %v1265_v32 = vmul.f32 %v1673_v30, %v1263_v28  ;;  %vm1270_vm0 = vweird.f32 %v1673_v30  ;;  %v1675_v38 = vpop.eup %1674 }
 0x9b8   : > { %vm1271_vm12 = vmor %vm1269_vm4, %vm1270_vm0 }
 0x9b9   : > { %v1266_v33 = vsub.f32 1.0, %v1265_v32 }
 0x9ba   : > { %v1362_v36 = vpop.permute.xlu1 %1361 }
 0x9bb   : > { %v1267_v1 = vmul.f32 %v1673_v30, %v1266_v33  ;;  %v1364_v40 = vadd.f32 %v1675_v38, %v1362_v36 }
 0x9bd   : > { %v1268_v22 = vadd.f32 %v1673_v30, %v1267_v1 }
 0x9bf   : > { %v1272_v37 = vsel %vm1271_vm12, %v1673_v30, %v1268_v22 }
 0x9c0   : > { %v1277_v41 = vsel %vm1274_vm14, %v1276_v21, %v1272_v37 }
 0x9c1   : > { %1295 = vrot.lane.b32.xlu2 %v1277_v41, %s1758_s15  ;;  %1285 = vrot.lane.b32.xlu0 %v1277_v41, %s1756_s12  ;;  %v2254_v42 = vmul.f32 %v1669_v19, %v1277_v41 }
 0x9c2   : > { %v1367_v43 = vpop.permute.xlu0 %1366 }
 0x9c3   : > { %v1369_v44 = vadd.f32 %v1367_v43, %v1364_v40  ;;  %v1565_v43 = vld [vmem:[%s2370_s9 + $0x38] sm:$0xff] }
 0x9c4   : > { %1330 = vmatpush.msra.mxu2 %v1565_v43 }
 0x9c5   : > { %1676 = vrcp.f32 %v1369_v44  ;;  %v1381_v51 = vand.u32 2147483648, %v1369_v44  ;;  %v1379_v53 = vand.u32 2147483647, %v1369_v44  ;;  %vm1375_vm2 = vweird.f32 %v1369_v44 }
 0x9c6   : > { %1678 = vpow2.f32 %v1132_v61  ;;  %v1203_v61 = vld [vmem:[%s2370_s9 + $0x8] sm:$0xff] }
 0x9c7   : > { %v1382_v54 = vor.u32 1.1754944e-38, %v1381_v51  ;;  %vm1380_vm13 = vcmp.eq.f32.partialorder %v1379_v53, 8.507059e+37 }
 0x9c9   : > { %1299 = vrot.lane.b32.xlu2 %v2257_v46, %s1756_s12  ;;  %1394 = vrot.lane.b32.xlu0 %v2191_v23, %s1757_s14 }
 0x9cb   : > { %v1677_v47 = vpop.eup %1676 }
 0x9cc   : > { %v1371_v48 = vmul.f32 %v1677_v47, %v1369_v44  ;;  %vm1376_vm15 = vweird.f32 %v1677_v47  ;;  %v1679_v62 = vpop.eup %1678  ;;  %v1564_v44 = vld [vmem:[%s2370_s9 + $0x30] sm:$0xff] }
 0x9cd   : > { %vm1377_vm3 = vmor %vm1375_vm2, %vm1376_vm15  ;;  %1331 = vmatpush.msra.mxu2 %v1564_v44 }
 0x9ce   : > { %v1372_v49 = vsub.f32 1.0, %v1371_v48 }
 0x9d0   : > { %v1373_v52 = vmul.f32 %v1677_v47, %v1372_v49 }
 0x9d1   : > { %1280 = vrot.lane.b32.xlu0 %v2264_v50, %s1757_s14 }
 0x9d2   : > { %v1374_v26 = vadd.f32 %v1677_v47, %v1373_v52 }
 0x9d4   : > { %v1378_v55 = vsel %vm1377_vm3, %v1677_v47, %v1374_v26 }
 0x9d5   : > { %v1383_v56 = vsel %vm1380_vm13, %v1382_v54, %v1378_v55  ;;  %v1570_v54 = vld [vmem:[%s2370_s9 + $0x58] sm:$0xff]  ;;  %v1569_v55 = vld [vmem:[%s2370_s9 + $0x50] sm:$0xff] }
 0x9d6   : > { %1390 = vrot.lane.b32.xlu1 %v1383_v56, %s1756_s12  ;;  %v2269_v57 = vmul.f32 %v1675_v38, %v1383_v56  ;;  %1435 = vmatpush.msrb.mxu3 %v1570_v54 }
 0x9d8   : > { %1436 = vmatpush.msrb.mxu3 %v1569_v55 }
 0x9de   : > { %1403 = vrot.lane.b32.xlu1 %v1383_v56, %s1758_s15  ;;  %v1568_v56 = vld [vmem:[%s2370_s9 + $0x48] sm:$0xff] }
 0x9df   : > { %1437 = vmatpush.msrb.mxu3 %v1568_v56 }
 0x9e6   : > { %1385 = vrot.lane.b32.xlu1 %v2264_v50, %s1758_s15 }
 0x9f1   : > { %v1154_v6 = vpop.permute.xlu2 %1153 }
 0xa1b   : > { %v1296_v14 = vpop.permute.xlu2 %1295 }
 0xa1c   : > { %v1298_v30 = vmul.f32 %v2225_v60, %v1296_v14 }
 0xa21   : > { %v1149_v63 = vpop.permute.xlu1 %1148 }
 0xa22   : > { %v1151_v5 = vadd.f32 %v1679_v62, %v1149_v63 }
 0xa23   : > { %v1300_v29 = vpop.permute.xlu2 %1299 }
 0xa24   : > { %v1156_v8 = vadd.f32 %v1154_v6, %v1151_v5  ;;  %v1302_v31 = vmul.f32 %v1300_v29, %v1298_v30  ;;  %v1202_v5 = vld [vmem:[%s2370_s9] sm:$0xff] }
 0xa26   : > { %1680 = vrcp.f32 %v1156_v8  ;;  %v1168_v2 = vand.u32 2147483648, %v1156_v8  ;;  %v1166_v16 = vand.u32 2147483647, %v1156_v8  ;;  %vm1162_vm6 = vweird.f32 %v1156_v8 }
 0xa28   : > { %v1169_v58 = vor.u32 1.1754944e-38, %v1168_v2  ;;  %vm1167_vm8 = vcmp.eq.f32.partialorder %v1166_v16, 8.507059e+37 }
 0xa2c   : > { %v1681_v10 = vpop.eup %1680 }
 0xa2d   : > { %v1158_v11 = vmul.f32 %v1681_v10, %v1156_v8  ;;  %vm1163_vm5 = vweird.f32 %v1681_v10 }
 0xa2e   : > { %vm1164_vm7 = vmor %vm1162_vm6, %vm1163_vm5 }
 0xa2f   : > { %v1159_v12 = vsub.f32 1.0, %v1158_v11 }
 0xa31   : > { %v1160_v15 = vmul.f32 %v1681_v10, %v1159_v12 }
 0xa33   : > { %v1286_v17 = vpop.permute.xlu0 %1285  ;;  %v1161_v19 = vadd.f32 %v1681_v10, %v1160_v15 }
 0xa34   : > { %v1288_v39 = vmul.f32 %v2223_v59, %v1286_v17 }
 0xa35   : > { %v1165_v20 = vsel %vm1164_vm7, %v1681_v10, %v1161_v19 }
 0xa36   : > { %v1289_v25 = vmul.f32 %v1288_v39, %v2191_v23  ;;  %v1170_v0 = vsel %vm1167_vm8, %v1169_v58, %v1165_v20 }
 0xa37   : > { %1174 = vrot.lane.b32.xlu1 %v1170_v0, %s1756_s12  ;;  %v2279_v28 = vmul.f32 %v1679_v62, %v1170_v0 }
 0xa38   : > { %1291 = vrot.lane.b32.xlu2 %v1289_v25, %s1757_s14 }
 0xa39   : > { %v1172_v8 = vmul.f32 %v2279_v28, %v2264_v50 }
 0xa3b   : > { %v1395_v33 = vpop.permute.xlu0 %1394 }
 0xa3f   : > { %1179 = vrot.lane.b32.xlu1 %v2191_v23, %s1756_s12 }
 0xa40   : > { %1304 = vrot.lane.b32.xlu2 %v1302_v31, %s1758_s15 }
 0xa43   : > { %v1281_v35 = vpop.permute.xlu0 %1280 }
 0xa44   : > { %v1283_v22 = vmul.f32 %v1281_v35, %v2254_v42  ;;  %v1563_v42 = vld [vmem:[%s2370_s9 + $0x28] sm:$0xff] }
 0xa45   : > { %1332 = vmatpush.msra.mxu2 %v1563_v42 }
 0xa48   : > { %1188 = vrot.lane.b32.xlu2 %v1170_v0, %s1758_s15  ;;  %v1391_v59 = vpop.permute.xlu1 %1390 }
 0xa49   : > { %v1393_v32 = vmul.f32 %v2232_v7, %v1391_v59 }
 0xa4b   : > { %v1397_v34 = vmul.f32 %v1395_v33, %v1393_v32 }
 0xa4d   : > { %1399 = vrot.lane.b32.xlu0 %v1397_v34, %s1757_s14 }
 0xa50   : > { %v1404_v1 = vpop.permute.xlu1 %1403 }
 0xa51   : > { %v1406_v18 = vmul.f32 %v2236_v9, %v1404_v1 }
 0xa53   : > { %v1407_v60 = vmul.f32 %v1406_v18, %v2257_v46 }
 0xa55   : > { %1409 = vrot.lane.b32.xlu0 %v1407_v60, %s1758_s15 }
 0xa58   : > { %v1386_v37 = vpop.permute.xlu1 %1385 }
 0xa5d   : > { %1193 = vrot.lane.b32.xlu0 %v2257_v46, %s1758_s15  ;;  %v1388_v46 = vmul.f32 %v1386_v37, %v2269_v57  ;;  %v1205_v57 = vld [vmem:[%s2370_s9 + $0x18] sm:$0xff] }
 0xa5e   : > { %1221 = vmatpush.msra.mxu1 %v1205_v57 }
 0xa60   : > { %1222 = vmatpush.msra.mxu1 %v1204_v24 }
 0xa62   : > { %1223 = vmatpush.msra.mxu1 %v1203_v61 }
 0xa64   : > { %1224 = vmatpush.msra.mxu1 %v1202_v5 }
 0xa92   : > { %v1292_v23 = vpop.permute.xlu2 %1291 }
 0xa93   : > { %v1294_v36 = vadd.f32 %v1292_v23, %v1283_v22 }
 0xa9a   : > { %v1305_v7 = vpop.permute.xlu2 %1304 }
 0xa9b   : > { %v1307_v21 = vadd.f32 %v1305_v7, %v1294_v36 }
 0xa9d   : > { %1314 = vrot.lane.b32.xlu1 %v1307_v21, %s1756_s12 }
 0xaa2   : > { %v1189_v51 = vpop.permute.xlu2 %1188 }
 0xaa3   : > { %v1191_v52 = vmul.f32 %v2241_v13, %v1189_v51  ;;  %v1567_v13 = vld [vmem:[%s2370_s9 + $0x40] sm:$0xff] }
 0xaa4   : > { %1438 = vmatpush.msrb.mxu3 %v1567_v13 }
 0xaa9   : > { %v1175_v38 = vpop.permute.xlu1 %1174 }
 0xaaa   : > { %v1177_v9 = vmul.f32 %v2247_v27, %v1175_v38  ;;  %v1562_v27 = vld [vmem:[%s2370_s9 + $0x20] sm:$0xff] }
 0xaab   : > { %1333 = vmatpush.msra.mxu2 %v1562_v27 }
 0xab1   : > { %v1180_v41 = vpop.permute.xlu1 %1179 }
 0xab2   : > { %v1182_v40 = vmul.f32 %v1180_v41, %v1177_v9 }
 0xab4   : > { %1184 = vrot.lane.b32.xlu0 %v1182_v40, %s1757_s14  ;;  %s1759_s14 = smov (%p38_p0), [#allocation2]  }
 0xab5   :  { %s1453_s17 = sshll.u32 (%p38_p0), %s1759_s14, 4  ;;  %s1454_s17 = int_to_ptr.vmem [resolvable:$true] %s1453_s17 }
 0xabf   : > { %v1400_v45 = vpop.permute.xlu0 %1399 }
 0xac0   : > { %v1402_v47 = vadd.f32 %v1400_v45, %v1388_v46 }
 0xac7   : > { %v1410_v48 = vpop.permute.xlu0 %1409 }
 0xac8   : > { %v1412_v49 = vadd.f32 %v1410_v48, %v1402_v47 }
 0xaca   : > { %1419 = vrot.lane.b32.xlu2 %v1412_v49, %s1758_s15 }
 0xacf   : > { %v1194_v53 = vpop.permute.xlu0 %1193 }
 0xad0   : > { %v1196_v26 = vmul.f32 %v1194_v53, %v1191_v52 }
 0xad2   : > { %1198 = vrot.lane.b32.xlu1 %v1196_v26, %s1758_s15 }
 0xb0f   : > { %v1315_v62 = vpop.permute.xlu1 %1314 }
 0xb10   : > { %1566 = vmatmul.msk.f32.vlgmr.msra.gmra.mxu2 %vm96_vm1, %v1315_v62 }
 0xb24   : > { %v1420_v63 = vpop.permute.xlu2 %1419 }
 0xb25   : > { %1571 = vmatmul.msk.f32.vlgmr.msrb.gmra.mxu3 %vm96_vm1, %v1420_v63 }
 0xb26   : > { %v1185_v6 = vpop.permute.xlu0 %1184 }
 0xb27   : > { %v1187_v10 = vadd.f32 %v1185_v6, %v1172_v8 }
 0xb44   : > { %v1199_v11 = vpop.permute.xlu1 %1198 }
 0xb45   : > { %v1201_v12 = vadd.f32 %v1199_v11, %v1187_v10 }
 0xb47   : > { %1561 = vmatmul.msk.f32.vlgmr.msra.gmra.mxu1 %vm96_vm1, %v1201_v12  ;;  %vm1443_vm1 = vcmask (%p38_p0), 254976  }
 0xb93   : > { %v1335_v14 = vpop.f32.mrf.mxu2  }
 0xb94   : > { %v2373_v1 = vmov %v1335_v14  ;;  %1446 = vst.msk [vmem:[#allocation2 + $0x2] sm:$0x3] (%p38_p0), %vm1443_vm1, %v1335_v14 }
 0xba8   : > { %v1440_v15 = vpop.f32.mrf.mxu3  }
 0xba9   : > { %v2372_v0 = vmov %v1440_v15  ;;  %1448 = vst.msk [vmem:[#allocation2 + $0x4] sm:$0x3] (%p38_p0), %vm1443_vm1, %v1440_v15 }
 0xbc1   :  { %40 = sbr.rel (!%p38_p0) target bundleno = 2 (0x2), region = 76 }
 0xbc4   : > { %v1226_v16 = vpop.f32.mrf.mxu1  }
 0xbc5   : > { %v2374_v2 = vmov %v1226_v16  ;;  %1444 = vst.msk [vmem:[#allocation2] sm:$0x3] (%p38_p0), %vm1443_vm1, %v1226_v16 }
 0xbc6   :  { %1461 = dma.vmem_to_hbm [thread:$0]  %s1454_s17, 96, %s1456_s16, [#allocation3], %s1760_s18, %s1760_s18, %s1761_s19  }
 0xbc7   :  { %1730 = dma.done.wait [#allocation3], 96  }
 0xbc8   :  { %1731 = vsyncadd [#allocation3], 4294967200 }
 0xbc9   :  { %1466 = vsyncpa [#allocation3], 1 }

</bundles_post_ra>
